<compile_context>
chip_gen: v7x
topology: tpu7x:2x2x1
jax: 0.10.0
libtpu: 0.0.40
codegen_flags: <defaults>
</compile_context>

<pallas_src>
import functools

import jax
import jax.numpy as jnp
from jax.experimental import pallas as pl
from jax.experimental.pallas import tpu as pltpu


_VMEM = pl.BlockSpec(memory_space=pltpu.MemorySpace.VMEM)


# ----------------------------------------------------------------------------
# Fused kernel: 2-layer bidirectional LSTM + FC head
# ----------------------------------------------------------------------------
def _bilstm_classifier_kernel(xf_ref, xb_ref,
                              wih0f_ref, wih0b_ref, whh0f_ref, whh0b_ref,
                              b0f_ref, b0b_ref,
                              wih1f_ref, whh1f_ref, b1f_ref,
                              wih1b_ref, b1b_ref,
                              fcw_ref, fcb_ref,
                              out_ref,
                              pref_scr, preb_scr, seq_scr,
                              *, seq_len, batch, hidden):
    T, B, H = seq_len, batch, hidden
    H2 = 2 * H

    def gate_update(g, c_prev):
        # PyTorch gate order along the 4H axis: [i | f | g | o].
        i = jax.nn.sigmoid(g[:, 0:H])
        f = jax.nn.sigmoid(g[:, H:2 * H])
        gg = jnp.tanh(g[:, 2 * H:3 * H])
        o = jax.nn.sigmoid(g[:, 3 * H:4 * H])
        c = f * c_prev + i * gg
        h = o * jnp.tanh(c)
        return h, c

    # ---------------- Layer 0 ----------------
    # Hoisted input projections: one matmul per direction covers all T steps.
    # xb_ref is already time-reversed, so row block s of preb_scr is exactly
    # what the backward direction consumes at step s (no per-step select).
    pref_scr[...] = (jnp.dot(xf_ref[...], wih0f_ref[...],
                             preferred_element_type=jnp.float32) + b0f_ref[...])
    preb_scr[...] = (jnp.dot(xb_ref[...], wih0b_ref[...],
                             preferred_element_type=jnp.float32) + b0b_ref[...])

    whh0f = whh0f_ref[...]                       # (H, 4H) bf16, loaded once
    whh0b = whh0b_ref[...]
    zeros = jnp.zeros((B, H), jnp.float32)
    h_f = h_b = c_f = c_b = zeros
    h0_b_last = None

    # Serial recurrence, statically unrolled (T is small & known at trace time).
    for s in range(T):
        r = s * B
        g_f = pref_scr[r:r + B, :] + jnp.dot(h_f.astype(jnp.bfloat16), whh0f,
                                             preferred_element_type=jnp.float32)
        g_b = preb_scr[r:r + B, :] + jnp.dot(h_b.astype(jnp.bfloat16), whh0b,
                                             preferred_element_type=jnp.float32)
        h_f, c_f = gate_update(g_f, c_f)         # forward hidden at time s
        h_b, c_b = gate_update(g_b, c_b)         # backward hidden at time T-1-s

        # Time-ordered layer-0 output sequence (= layer-1 input).
        seq_scr[r:r + B, 0:H] = h_f
        rb = (T - 1 - s) * B
        seq_scr[rb:rb + B, H:H2] = h_b
        if s == 0:
            h0_b_last = h_b                      # backward hidden at time T-1
    h0_f_last = h_f                              # forward hidden at time T-1

    # ---------------- Layer 1 ----------------
    # Backward direction: only its first step (processing time T-1 from a zero
    # state) contributes to lstm_out[:, -1, :], so it is a single step and the
    # forget-gate term vanishes (c_prev = 0).  Exact, not approximate.
    xb_last = jnp.concatenate([h0_f_last, h0_b_last], axis=1).astype(jnp.bfloat16)
    gb = (jnp.dot(xb_last, wih1b_ref[...], preferred_element_type=jnp.float32)
          + b1b_ref[...])
    i_b = jax.nn.sigmoid(gb[:, 0:H])
    g_b = jnp.tanh(gb[:, 2 * H:3 * H])
    o_b = jax.nn.sigmoid(gb[:, 3 * H:4 * H])
    last_bwd = o_b * jnp.tanh(i_b * g_b)

    # Forward direction: full recurrence.  Hoisted input projection reuses the
    # layer-0 forward scratch (same shape, no longer needed).
    x1 = seq_scr[...].astype(jnp.bfloat16)       # (T*B, 2H)
    pref_scr[...] = (jnp.dot(x1, wih1f_ref[...],
                             preferred_element_type=jnp.float32) + b1f_ref[...])
    whh1f = whh1f_ref[...]
    h1 = c1 = zeros
    for s in range(T):
        r = s * B
        g1 = pref_scr[r:r + B, :] + jnp.dot(h1.astype(jnp.bfloat16), whh1f,
                                            preferred_element_type=jnp.float32)
        h1, c1 = gate_update(g1, c1)
    last_fwd = h1                                # forward hidden at time T-1

    # ---------------- FC head (dropout is identity in eval mode) ------------
    last = jnp.concatenate([last_fwd, last_bwd], axis=1)       # (B, 2H) f32
    out_ref[...] = (jnp.dot(last, fcw_ref[...],
                            preferred_element_type=jnp.float32) + fcb_ref[...])


# ----------------------------------------------------------------------------
# One-time weight packing (done once, not per forward call)
# ----------------------------------------------------------------------------
def pack_params(params):
    """Transpose weights to (in, 4H) / (H, 4H) layouts and fuse the two biases.

    Gate order along the 4H axis is PyTorch's [i | f | g | o].  Directions are
    kept separate (no block-diagonal padding): each direction gets its own
    input-projection, recurrent and bias tensors.
    """
    H = params["lstm_l0_fwd"]["w_hh"].shape[1]

    def ih(p):
        return jnp.transpose(p["w_ih"]).astype(jnp.bfloat16)        # (in, 4H)

    def hh(p):
        return jnp.transpose(p["w_hh"]).astype(jnp.bfloat16)        # (H, 4H)

    def bias(p):
        return (p["b_ih"] + p["b_hh"])[None, :].astype(jnp.float32)  # (1, 4H)

    l0f, l0b = params["lstm_l0_fwd"], params["lstm_l0_bwd"]
    l1f, l1b = params["lstm_l1_fwd"], params["lstm_l1_bwd"]
    return {
        "embedding": params["embedding"],
        "hidden": H,
        "wih0_f": ih(l0f), "whh0_f": hh(l0f), "b0_f": bias(l0f),
        "wih0_b": ih(l0b), "whh0_b": hh(l0b), "b0_b": bias(l0b),
        "wih1_f": ih(l1f), "whh1_f": hh(l1f), "b1_f": bias(l1f),
        "wih1_b": ih(l1b), "b1_b": bias(l1b),        # whh1_b unused (one step)
        "fc_w": jnp.transpose(params["fc_w"]).astype(jnp.float32),   # (2H, out)
        "fc_b": params["fc_b"][None, :].astype(jnp.float32),         # (1, out)
    }


# ----------------------------------------------------------------------------
# Forward pass wrapper
# ----------------------------------------------------------------------------
def lstm_text_classifier_forward(token_ids, packed):
    """token_ids: (B, T) int32.  Returns logits (B, output_dim)."""
    B, T = token_ids.shape
    H = packed["hidden"]
    E = packed["embedding"].shape[1]
    out_dim = packed["fc_b"].shape[1]

    # Gather embeddings once into time-major order; the time-reversed copy for
    # the backward direction is just a re-index of the same gather result.
    tt = jnp.transpose(token_ids)                              # (T, B)
    emb = jnp.take(packed["embedding"], tt, axis=0)            # (T, B, E)
    x_fwd = emb.reshape(T * B, E).astype(jnp.bfloat16)
    x_bwd = emb[::-1].reshape(T * B, E).astype(jnp.bfloat16)

    kernel = functools.partial(_bilstm_classifier_kernel,
                               seq_len=T, batch=B, hidden=H)
    return pl.pallas_call(
        kernel,
        out_shape=jax.ShapeDtypeStruct((B, out_dim), jnp.float32),
        in_specs=[_VMEM] * 15,
        out_specs=_VMEM,
        scratch_shapes=[
            pltpu.VMEM((T * B, 4 * H), jnp.float32),   # fwd pre-activations (reused by layer 1)
            pltpu.VMEM((T * B, 4 * H), jnp.float32),   # bwd pre-activations
            pltpu.VMEM((T * B, 2 * H), jnp.float32),   # layer-0 output sequence
        ],
    )(x_fwd, x_bwd,
      packed["wih0_f"], packed["wih0_b"], packed["whh0_f"], packed["whh0_b"],
      packed["b0_f"], packed["b0_b"],
      packed["wih1_f"], packed["whh1_f"], packed["b1_f"],
      packed["wih1_b"], packed["b1_b"],
      packed["fc_w"], packed["fc_b"])


# ----------------------------------------------------------------------------
# Pure-JAX f32 reference (mirrors PyTorch nn.LSTM semantics) for validation
# ----------------------------------------------------------------------------
def _reference_lstm_dir(x_bte, p, reverse):
    B, _, _ = x_bte.shape
    H = p["w_hh"].shape[1]
    wih_t = jnp.transpose(p["w_ih"])
    whh_t = jnp.transpose(p["w_hh"])
    bias = p["b_ih"] + p["b_hh"]

    def step(carry, x_t):
        h, c = carry
        gates = x_t @ wih_t + h @ whh_t + bias
        i = jax.nn.sigmoid(gates[:, 0:H])
        f = jax.nn.sigmoid(gates[:, H:2 * H])
        g = jnp.tanh(gates[:, 2 * H:3 * H])
        o = jax.nn.sigmoid(gates[:, 3 * H:4 * H])
        c = f * c + i * g
        h = o * jnp.tanh(c)
        return (h, c), h

    xs = jnp.transpose(x_bte, (1, 0, 2))
    if reverse:
        xs = xs[::-1]
    init = (jnp.zeros((B, H), jnp.float32), jnp.zeros((B, H), jnp.float32))
    _, hs = jax.lax.scan(step, init, xs)
    if reverse:
        hs = hs[::-1]
    return jnp.transpose(hs, (1, 0, 2))


def reference_forward(token_ids, params):
    x = jnp.take(params["embedding"], token_ids, axis=0)       # (B, T, E)
    for layer in range(2):
        pf = params[f"lstm_l{layer}_fwd"]
        pb = params[f"lstm_l{layer}_bwd"]
        hf = _reference_lstm_dir(x, pf, reverse=False)
        hb = _reference_lstm_dir(x, pb, reverse=True)
        x = jnp.concatenate([hf, hb], axis=-1)
    last = x[:, -1, :]
    return last @ jnp.transpose(params["fc_w"]) + params["fc_b"]


# ----------------------------------------------------------------------------
# Deterministic parameter initialization (matches the PyTorch module's shapes)
# ----------------------------------------------------------------------------
def _init_lstm_dir(key, input_size, hidden):
    k1, k2, k3, k4 = jax.random.split(key, 4)
    s = 1.0 / jnp.sqrt(hidden)
    return {
        "w_ih": jax.random.uniform(k1, (4 * hidden, input_size), jnp.float32, -s, s),
        "w_hh": jax.random.uniform(k2, (4 * hidden, hidden), jnp.float32, -s, s),
        "b_ih": jax.random.uniform(k3, (4 * hidden,), jnp.float32, -s, s),
        "b_hh": jax.random.uniform(k4, (4 * hidden,), jnp.float32, -s, s),
    }


def init_params(key, vocab_size, embedding_dim, hidden_dim, output_dim):
    keys = jax.random.split(key, 8)
    return {
        "embedding": 0.1 * jax.random.normal(
            keys[0], (vocab_size, embedding_dim), jnp.float32),
        "lstm_l0_fwd": _init_lstm_dir(keys[1], embedding_dim, hidden_dim),
        "lstm_l0_bwd": _init_lstm_dir(keys[2], embedding_dim, hidden_dim),
        "lstm_l1_fwd": _init_lstm_dir(keys[3], 2 * hidden_dim, hidden_dim),
        "lstm_l1_bwd": _init_lstm_dir(keys[4], 2 * hidden_dim, hidden_dim),
        "fc_w": 0.1 * jax.random.normal(
            keys[5], (output_dim, 2 * hidden_dim), jnp.float32),
        "fc_b": jnp.zeros((output_dim,), jnp.float32),
    }


if __name__ == "__main__":
    vocab_size, embedding_dim, hidden_dim, output_dim = 50, 32, 32, 4
    B, T = 2, 8

    key = jax.random.PRNGKey(0)
    pkey, dkey = jax.random.split(key)
    params = init_params(pkey, vocab_size, embedding_dim, hidden_dim, output_dim)
    token_ids = jax.random.randint(dkey, (B, T), 0, vocab_size, dtype=jnp.int32)

    packed = pack_params(params)
    logits = lstm_text_classifier_forward(token_ids, packed)
    jax.block_until_ready(logits)

    assert logits.shape == (B, output_dim)
    assert bool(jnp.all(jnp.isfinite(logits)))

    ref = reference_forward(token_ids, params)
    max_err = float(jnp.max(jnp.abs(logits - ref)))
    assert max_err < 5e-2, f"mismatch vs f32 reference: {max_err}"

    print("KERNEL_OK")
</pallas_src>

<mosaic_0001>
module attributes {stable_mosaic.version = 11 : i64} {
  func.func @_bilstm_classifier_kernel(%arg0: memref<16x32xbf16, #tpu.memory_space<vmem>>, %arg1: memref<16x32xbf16, #tpu.memory_space<vmem>>, %arg2: memref<32x128xbf16, #tpu.memory_space<vmem>>, %arg3: memref<32x128xbf16, #tpu.memory_space<vmem>>, %arg4: memref<32x128xbf16, #tpu.memory_space<vmem>>, %arg5: memref<32x128xbf16, #tpu.memory_space<vmem>>, %arg6: memref<1x128xf32, #tpu.memory_space<vmem>>, %arg7: memref<1x128xf32, #tpu.memory_space<vmem>>, %arg8: memref<64x128xbf16, #tpu.memory_space<vmem>>, %arg9: memref<32x128xbf16, #tpu.memory_space<vmem>>, %arg10: memref<1x128xf32, #tpu.memory_space<vmem>>, %arg11: memref<64x128xbf16, #tpu.memory_space<vmem>>, %arg12: memref<1x128xf32, #tpu.memory_space<vmem>>, %arg13: memref<64x4xf32, #tpu.memory_space<vmem>>, %arg14: memref<1x4xf32, #tpu.memory_space<vmem>>, %arg15: memref<2x4xf32, #tpu.memory_space<vmem>>, %arg16: memref<16x128xf32, #tpu.memory_space<vmem>>, %arg17: memref<16x128xf32, #tpu.memory_space<vmem>>, %arg18: memref<16x64xf32, #tpu.memory_space<vmem>>) attributes {dimension_semantics = [], scalar_prefetch = 0 : i64, scratch_operands = 3 : i64, tpu.core_type = #tpu.core_type<tc>} {
    %c0 = arith.constant 0 : index
    %c0_0 = arith.constant 0 : index
    %0 = vector.load %arg0[%c0, %c0_0] : memref<16x32xbf16, #tpu.memory_space<vmem>>, vector<16x32xbf16>
    %c0_1 = arith.constant 0 : index
    %c0_2 = arith.constant 0 : index
    %1 = vector.load %arg2[%c0_1, %c0_2] : memref<32x128xbf16, #tpu.memory_space<vmem>>, vector<32x128xbf16>
    %cst = arith.constant dense<0.000000e+00> : vector<16x128xf32>
    %2 = tpu.matmul %0, %1, %cst {dimension_numbers = #tpu.dot_dimension_numbers<[1], [0], [0], [1], [0, 0, 1, 1], [], []>} : vector<16x32xbf16>, vector<32x128xbf16>, vector<16x128xf32> -> vector<16x128xf32>
    %c0_3 = arith.constant 0 : index
    %c0_4 = arith.constant 0 : index
    %3 = vector.load %arg6[%c0_3, %c0_4] : memref<1x128xf32, #tpu.memory_space<vmem>>, vector<1x128xf32>
    %4 = vector.broadcast %3 : vector<1x128xf32> to vector<16x128xf32>
    %5 = arith.addf %2, %4 : vector<16x128xf32>
    %c0_5 = arith.constant 0 : index
    %c0_6 = arith.constant 0 : index
    %6 = vector.load %arg16[%c0_5, %c0_6] : memref<16x128xf32, #tpu.memory_space<vmem>>, vector<16x128xf32>
    tpu.vector_store %arg16[%c0_5, %c0_6], %5 {strides = array<i32>} : memref<16x128xf32, #tpu.memory_space<vmem>>, vector<16x128xf32>,
    %c0_7 = arith.constant 0 : index
    %c0_8 = arith.constant 0 : index
    %7 = vector.load %arg1[%c0_7, %c0_8] : memref<16x32xbf16, #tpu.memory_space<vmem>>, vector<16x32xbf16>
    %c0_9 = arith.constant 0 : index
    %c0_10 = arith.constant 0 : index
    %8 = vector.load %arg3[%c0_9, %c0_10] : memref<32x128xbf16, #tpu.memory_space<vmem>>, vector<32x128xbf16>
    %cst_11 = arith.constant dense<0.000000e+00> : vector<16x128xf32>
    %9 = tpu.matmul %7, %8, %cst_11 {dimension_numbers = #tpu.dot_dimension_numbers<[1], [0], [0], [1], [0, 0, 1, 1], [], []>} : vector<16x32xbf16>, vector<32x128xbf16>, vector<16x128xf32> -> vector<16x128xf32>
    %c0_12 = arith.constant 0 : index
    %c0_13 = arith.constant 0 : index
    %10 = vector.load %arg7[%c0_12, %c0_13] : memref<1x128xf32, #tpu.memory_space<vmem>>, vector<1x128xf32>
    %11 = vector.broadcast %10 : vector<1x128xf32> to vector<16x128xf32>
    %12 = arith.addf %9, %11 : vector<16x128xf32>
    %c0_14 = arith.constant 0 : index
    %c0_15 = arith.constant 0 : index
    %13 = vector.load %arg17[%c0_14, %c0_15] : memref<16x128xf32, #tpu.memory_space<vmem>>, vector<16x128xf32>
    tpu.vector_store %arg17[%c0_14, %c0_15], %12 {strides = array<i32>} : memref<16x128xf32, #tpu.memory_space<vmem>>, vector<16x128xf32>,
    %c0_16 = arith.constant 0 : index
    %c0_17 = arith.constant 0 : index
    %14 = vector.load %arg4[%c0_16, %c0_17] : memref<32x128xbf16, #tpu.memory_space<vmem>>, vector<32x128xbf16>
    %c0_18 = arith.constant 0 : index
    %c0_19 = arith.constant 0 : index
    %15 = vector.load %arg5[%c0_18, %c0_19] : memref<32x128xbf16, #tpu.memory_space<vmem>>, vector<32x128xbf16>
    %cst_20 = arith.constant 0.000000e+00 : f32
    %16 = vector.broadcast %cst_20 : f32 to vector<2x32xf32>
    %c0_21 = arith.constant 0 : index
    %c0_22 = arith.constant 0 : index
    %17 = vector.load %arg16[%c0_21, %c0_22] : memref<16x128xf32, #tpu.memory_space<vmem>>, vector<2x128xf32>
    %18 = arith.truncf %16 : vector<2x32xf32> to vector<2x32xbf16>
    %cst_23 = arith.constant dense<0.000000e+00> : vector<2x128xf32>
    %19 = tpu.matmul %18, %14, %cst_23 {dimension_numbers = #tpu.dot_dimension_numbers<[1], [0], [0], [1], [0, 0, 1, 1], [], []>} : vector<2x32xbf16>, vector<32x128xbf16>, vector<2x128xf32> -> vector<2x128xf32>
    %20 = arith.addf %17, %19 : vector<2x128xf32>
    %c0_24 = arith.constant 0 : index
    %c0_25 = arith.constant 0 : index
    %21 = vector.load %arg17[%c0_24, %c0_25] : memref<16x128xf32, #tpu.memory_space<vmem>>, vector<2x128xf32>
    %22 = arith.truncf %16 : vector<2x32xf32> to vector<2x32xbf16>
    %cst_26 = arith.constant dense<0.000000e+00> : vector<2x128xf32>
    %23 = tpu.matmul %22, %15, %cst_26 {dimension_numbers = #tpu.dot_dimension_numbers<[1], [0], [0], [1], [0, 0, 1, 1], [], []>} : vector<2x32xbf16>, vector<32x128xbf16>, vector<2x128xf32> -> vector<2x128xf32>
    %24 = arith.addf %21, %23 : vector<2x128xf32>
    %25 = vector.extract_strided_slice %20 {offsets = [0, 0], sizes = [2, 32], strides = [1, 1]} : vector<2x128xf32> to vector<2x32xf32>
    %26 = arith.negf %25 : vector<2x32xf32>
    %27 = math.exp %26 : vector<2x32xf32>
    %cst_27 = arith.constant 1.000000e+00 : f32
    %28 = vector.broadcast %cst_27 : f32 to vector<2x32xf32>
    %29 = arith.addf %28, %27 : vector<2x32xf32>
    %30 = arith.divf %28, %29 : vector<2x32xf32>
    %31 = vector.extract_strided_slice %20 {offsets = [0, 32], sizes = [2, 32], strides = [1, 1]} : vector<2x128xf32> to vector<2x32xf32>
    %32 = arith.negf %31 : vector<2x32xf32>
    %33 = math.exp %32 : vector<2x32xf32>
    %cst_28 = arith.constant 1.000000e+00 : f32
    %34 = vector.broadcast %cst_28 : f32 to vector<2x32xf32>
    %35 = arith.addf %34, %33 : vector<2x32xf32>
    %36 = arith.divf %34, %35 : vector<2x32xf32>
    %37 = vector.extract_strided_slice %20 {offsets = [0, 64], sizes = [2, 32], strides = [1, 1]} : vector<2x128xf32> to vector<2x32xf32>
    %38 = math.tanh %37 : vector<2x32xf32>
    %39 = vector.extract_strided_slice %20 {offsets = [0, 96], sizes = [2, 32], strides = [1, 1]} : vector<2x128xf32> to vector<2x32xf32>
    %40 = arith.negf %39 : vector<2x32xf32>
    %41 = math.exp %40 : vector<2x32xf32>
    %cst_29 = arith.constant 1.000000e+00 : f32
    %42 = vector.broadcast %cst_29 : f32 to vector<2x32xf32>
    %43 = arith.addf %42, %41 : vector<2x32xf32>
    %44 = arith.divf %42, %43 : vector<2x32xf32>
    %45 = arith.mulf %36, %16 : vector<2x32xf32>
    %46 = arith.mulf %30, %38 : vector<2x32xf32>
    %47 = arith.addf %45, %46 : vector<2x32xf32>
    %48 = math.tanh %47 : vector<2x32xf32>
    %49 = arith.mulf %44, %48 : vector<2x32xf32>
    %50 = vector.extract_strided_slice %24 {offsets = [0, 0], sizes = [2, 32], strides = [1, 1]} : vector<2x128xf32> to vector<2x32xf32>
    %51 = arith.negf %50 : vector<2x32xf32>
    %52 = math.exp %51 : vector<2x32xf32>
    %cst_30 = arith.constant 1.000000e+00 : f32
    %53 = vector.broadcast %cst_30 : f32 to vector<2x32xf32>
    %54 = arith.addf %53, %52 : vector<2x32xf32>
    %55 = arith.divf %53, %54 : vector<2x32xf32>
    %56 = vector.extract_strided_slice %24 {offsets = [0, 32], sizes = [2, 32], strides = [1, 1]} : vector<2x128xf32> to vector<2x32xf32>
    %57 = arith.negf %56 : vector<2x32xf32>
    %58 = math.exp %57 : vector<2x32xf32>
    %cst_31 = arith.constant 1.000000e+00 : f32
    %59 = vector.broadcast %cst_31 : f32 to vector<2x32xf32>
    %60 = arith.addf %59, %58 : vector<2x32xf32>
    %61 = arith.divf %59, %60 : vector<2x32xf32>
    %62 = vector.extract_strided_slice %24 {offsets = [0, 64], sizes = [2, 32], strides = [1, 1]} : vector<2x128xf32> to vector<2x32xf32>
    %63 = math.tanh %62 : vector<2x32xf32>
    %64 = vector.extract_strided_slice %24 {offsets = [0, 96], sizes = [2, 32], strides = [1, 1]} : vector<2x128xf32> to vector<2x32xf32>
    %65 = arith.negf %64 : vector<2x32xf32>
    %66 = math.exp %65 : vector<2x32xf32>
    %cst_32 = arith.constant 1.000000e+00 : f32
    %67 = vector.broadcast %cst_32 : f32 to vector<2x32xf32>
    %68 = arith.addf %67, %66 : vector<2x32xf32>
    %69 = arith.divf %67, %68 : vector<2x32xf32>
    %70 = arith.mulf %61, %16 : vector<2x32xf32>
    %71 = arith.mulf %55, %63 : vector<2x32xf32>
    %72 = arith.addf %70, %71 : vector<2x32xf32>
    %73 = math.tanh %72 : vector<2x32xf32>
    %74 = arith.mulf %69, %73 : vector<2x32xf32>
    %c0_33 = arith.constant 0 : index
    %c0_34 = arith.constant 0 : index
    %75 = vector.load %arg18[%c0_33, %c0_34] : memref<16x64xf32, #tpu.memory_space<vmem>>, vector<2x32xf32>
    tpu.vector_store %arg18[%c0_33, %c0_34], %49 {strides = array<i32>} : memref<16x64xf32, #tpu.memory_space<vmem>>, vector<2x32xf32>,
    %c14 = arith.constant 14 : index
    %c32 = arith.constant 32 : index
    %76 = vector.load %arg18[%c14, %c32] : memref<16x64xf32, #tpu.memory_space<vmem>>, vector<2x32xf32>
    tpu.vector_store %arg18[%c14, %c32], %74 {strides = array<i32>} : memref<16x64xf32, #tpu.memory_space<vmem>>, vector<2x32xf32>,
    %c2 = arith.constant 2 : index
    %c0_35 = arith.constant 0 : index
    %77 = vector.load %arg16[%c2, %c0_35] : memref<16x128xf32, #tpu.memory_space<vmem>>, vector<2x128xf32>
    %78 = arith.truncf %49 : vector<2x32xf32> to vector<2x32xbf16>
    %cst_36 = arith.constant dense<0.000000e+00> : vector<2x128xf32>
    %79 = tpu.matmul %78, %14, %cst_36 {dimension_numbers = #tpu.dot_dimension_numbers<[1], [0], [0], [1], [0, 0, 1, 1], [], []>} : vector<2x32xbf16>, vector<32x128xbf16>, vector<2x128xf32> -> vector<2x128xf32>
    %80 = arith.addf %77, %79 : vector<2x128xf32>
    %c2_37 = arith.constant 2 : index
    %c0_38 = arith.constant 0 : index
    %81 = vector.load %arg17[%c2_37, %c0_38] : memref<16x128xf32, #tpu.memory_space<vmem>>, vector<2x128xf32>
    %82 = arith.truncf %74 : vector<2x32xf32> to vector<2x32xbf16>
    %cst_39 = arith.constant dense<0.000000e+00> : vector<2x128xf32>
    %83 = tpu.matmul %82, %15, %cst_39 {dimension_numbers = #tpu.dot_dimension_numbers<[1], [0], [0], [1], [0, 0, 1, 1], [], []>} : vector<2x32xbf16>, vector<32x128xbf16>, vector<2x128xf32> -> vector<2x128xf32>
    %84 = arith.addf %81, %83 : vector<2x128xf32>
    %85 = vector.extract_strided_slice %80 {offsets = [0, 0], sizes = [2, 32], strides = [1, 1]} : vector<2x128xf32> to vector<2x32xf32>
    %86 = arith.negf %85 : vector<2x32xf32>
    %87 = math.exp %86 : vector<2x32xf32>
    %cst_40 = arith.constant 1.000000e+00 : f32
    %88 = vector.broadcast %cst_40 : f32 to vector<2x32xf32>
    %89 = arith.addf %88, %87 : vector<2x32xf32>
    %90 = arith.divf %88, %89 : vector<2x32xf32>
    %91 = vector.extract_strided_slice %80 {offsets = [0, 32], sizes = [2, 32], strides = [1, 1]} : vector<2x128xf32> to vector<2x32xf32>
    %92 = arith.negf %91 : vector<2x32xf32>
    %93 = math.exp %92 : vector<2x32xf32>
    %cst_41 = arith.constant 1.000000e+00 : f32
    %94 = vector.broadcast %cst_41 : f32 to vector<2x32xf32>
    %95 = arith.addf %94, %93 : vector<2x32xf32>
    %96 = arith.divf %94, %95 : vector<2x32xf32>
    %97 = vector.extract_strided_slice %80 {offsets = [0, 64], sizes = [2, 32], strides = [1, 1]} : vector<2x128xf32> to vector<2x32xf32>
    %98 = math.tanh %97 : vector<2x32xf32>
    %99 = vector.extract_strided_slice %80 {offsets = [0, 96], sizes = [2, 32], strides = [1, 1]} : vector<2x128xf32> to vector<2x32xf32>
    %100 = arith.negf %99 : vector<2x32xf32>
    %101 = math.exp %100 : vector<2x32xf32>
    %cst_42 = arith.constant 1.000000e+00 : f32
    %102 = vector.broadcast %cst_42 : f32 to vector<2x32xf32>
    %103 = arith.addf %102, %101 : vector<2x32xf32>
    %104 = arith.divf %102, %103 : vector<2x32xf32>
    %105 = arith.mulf %96, %47 : vector<2x32xf32>
    %106 = arith.mulf %90, %98 : vector<2x32xf32>
    %107 = arith.addf %105, %106 : vector<2x32xf32>
    %108 = math.tanh %107 : vector<2x32xf32>
    %109 = arith.mulf %104, %108 : vector<2x32xf32>
    %110 = vector.extract_strided_slice %84 {offsets = [0, 0], sizes = [2, 32], strides = [1, 1]} : vector<2x128xf32> to vector<2x32xf32>
    %111 = arith.negf %110 : vector<2x32xf32>
    %112 = math.exp %111 : vector<2x32xf32>
    %cst_43 = arith.constant 1.000000e+00 : f32
    %113 = vector.broadcast %cst_43 : f32 to vector<2x32xf32>
    %114 = arith.addf %113, %112 : vector<2x32xf32>
    %115 = arith.divf %113, %114 : vector<2x32xf32>
    %116 = vector.extract_strided_slice %84 {offsets = [0, 32], sizes = [2, 32], strides = [1, 1]} : vector<2x128xf32> to vector<2x32xf32>
    %117 = arith.negf %116 : vector<2x32xf32>
    %118 = math.exp %117 : vector<2x32xf32>
    %cst_44 = arith.constant 1.000000e+00 : f32
    %119 = vector.broadcast %cst_44 : f32 to vector<2x32xf32>
    %120 = arith.addf %119, %118 : vector<2x32xf32>
    %121 = arith.divf %119, %120 : vector<2x32xf32>
    %122 = vector.extract_strided_slice %84 {offsets = [0, 64], sizes = [2, 32], strides = [1, 1]} : vector<2x128xf32> to vector<2x32xf32>
    %123 = math.tanh %122 : vector<2x32xf32>
    %124 = vector.extract_strided_slice %84 {offsets = [0, 96], sizes = [2, 32], strides = [1, 1]} : vector<2x128xf32> to vector<2x32xf32>
    %125 = arith.negf %124 : vector<2x32xf32>
    %126 = math.exp %125 : vector<2x32xf32>
    %cst_45 = arith.constant 1.000000e+00 : f32
    %127 = vector.broadcast %cst_45 : f32 to vector<2x32xf32>
    %128 = arith.addf %127, %126 : vector<2x32xf32>
    %129 = arith.divf %127, %128 : vector<2x32xf32>
    %130 = arith.mulf %121, %72 : vector<2x32xf32>
    %131 = arith.mulf %115, %123 : vector<2x32xf32>
    %132 = arith.addf %130, %131 : vector<2x32xf32>
    %133 = math.tanh %132 : vector<2x32xf32>
    %134 = arith.mulf %129, %133 : vector<2x32xf32>
    %c2_46 = arith.constant 2 : index
    %c0_47 = arith.constant 0 : index
    %135 = vector.load %arg18[%c2_46, %c0_47] : memref<16x64xf32, #tpu.memory_space<vmem>>, vector<2x32xf32>
    tpu.vector_store %arg18[%c2_46, %c0_47], %109 {strides = array<i32>} : memref<16x64xf32, #tpu.memory_space<vmem>>, vector<2x32xf32>,
    %c12 = arith.constant 12 : index
    %c32_48 = arith.constant 32 : index
    %136 = vector.load %arg18[%c12, %c32_48] : memref<16x64xf32, #tpu.memory_space<vmem>>, vector<2x32xf32>
    tpu.vector_store %arg18[%c12, %c32_48], %134 {strides = array<i32>} : memref<16x64xf32, #tpu.memory_space<vmem>>, vector<2x32xf32>,
    %c4 = arith.constant 4 : index
    %c0_49 = arith.constant 0 : index
    %137 = vector.load %arg16[%c4, %c0_49] : memref<16x128xf32, #tpu.memory_space<vmem>>, vector<2x128xf32>
    %138 = arith.truncf %109 : vector<2x32xf32> to vector<2x32xbf16>
    %cst_50 = arith.constant dense<0.000000e+00> : vector<2x128xf32>
    %139 = tpu.matmul %138, %14, %cst_50 {dimension_numbers = #tpu.dot_dimension_numbers<[1], [0], [0], [1], [0, 0, 1, 1], [], []>} : vector<2x32xbf16>, vector<32x128xbf16>, vector<2x128xf32> -> vector<2x128xf32>
    %140 = arith.addf %137, %139 : vector<2x128xf32>
    %c4_51 = arith.constant 4 : index
    %c0_52 = arith.constant 0 : index
    %141 = vector.load %arg17[%c4_51, %c0_52] : memref<16x128xf32, #tpu.memory_space<vmem>>, vector<2x128xf32>
    %142 = arith.truncf %134 : vector<2x32xf32> to vector<2x32xbf16>
    %cst_53 = arith.constant dense<0.000000e+00> : vector<2x128xf32>
    %143 = tpu.matmul %142, %15, %cst_53 {dimension_numbers = #tpu.dot_dimension_numbers<[1], [0], [0], [1], [0, 0, 1, 1], [], []>} : vector<2x32xbf16>, vector<32x128xbf16>, vector<2x128xf32> -> vector<2x128xf32>
    %144 = arith.addf %141, %143 : vector<2x128xf32>
    %145 = vector.extract_strided_slice %140 {offsets = [0, 0], sizes = [2, 32], strides = [1, 1]} : vector<2x128xf32> to vector<2x32xf32>
    %146 = arith.negf %145 : vector<2x32xf32>
    %147 = math.exp %146 : vector<2x32xf32>
    %cst_54 = arith.constant 1.000000e+00 : f32
    %148 = vector.broadcast %cst_54 : f32 to vector<2x32xf32>
    %149 = arith.addf %148, %147 : vector<2x32xf32>
    %150 = arith.divf %148, %149 : vector<2x32xf32>
    %151 = vector.extract_strided_slice %140 {offsets = [0, 32], sizes = [2, 32], strides = [1, 1]} : vector<2x128xf32> to vector<2x32xf32>
    %152 = arith.negf %151 : vector<2x32xf32>
    %153 = math.exp %152 : vector<2x32xf32>
    %cst_55 = arith.constant 1.000000e+00 : f32
    %154 = vector.broadcast %cst_55 : f32 to vector<2x32xf32>
    %155 = arith.addf %154, %153 : vector<2x32xf32>
    %156 = arith.divf %154, %155 : vector<2x32xf32>
    %157 = vector.extract_strided_slice %140 {offsets = [0, 64], sizes = [2, 32], strides = [1, 1]} : vector<2x128xf32> to vector<2x32xf32>
    %158 = math.tanh %157 : vector<2x32xf32>
    %159 = vector.extract_strided_slice %140 {offsets = [0, 96], sizes = [2, 32], strides = [1, 1]} : vector<2x128xf32> to vector<2x32xf32>
    %160 = arith.negf %159 : vector<2x32xf32>
    %161 = math.exp %160 : vector<2x32xf32>
    %cst_56 = arith.constant 1.000000e+00 : f32
    %162 = vector.broadcast %cst_56 : f32 to vector<2x32xf32>
    %163 = arith.addf %162, %161 : vector<2x32xf32>
    %164 = arith.divf %162, %163 : vector<2x32xf32>
    %165 = arith.mulf %156, %107 : vector<2x32xf32>
    %166 = arith.mulf %150, %158 : vector<2x32xf32>
    %167 = arith.addf %165, %166 : vector<2x32xf32>
    %168 = math.tanh %167 : vector<2x32xf32>
    %169 = arith.mulf %164, %168 : vector<2x32xf32>
    %170 = vector.extract_strided_slice %144 {offsets = [0, 0], sizes = [2, 32], strides = [1, 1]} : vector<2x128xf32> to vector<2x32xf32>
    %171 = arith.negf %170 : vector<2x32xf32>
    %172 = math.exp %171 : vector<2x32xf32>
    %cst_57 = arith.constant 1.000000e+00 : f32
    %173 = vector.broadcast %cst_57 : f32 to vector<2x32xf32>
    %174 = arith.addf %173, %172 : vector<2x32xf32>
    %175 = arith.divf %173, %174 : vector<2x32xf32>
    %176 = vector.extract_strided_slice %144 {offsets = [0, 32], sizes = [2, 32], strides = [1, 1]} : vector<2x128xf32> to vector<2x32xf32>
    %177 = arith.negf %176 : vector<2x32xf32>
    %178 = math.exp %177 : vector<2x32xf32>
    %cst_58 = arith.constant 1.000000e+00 : f32
    %179 = vector.broadcast %cst_58 : f32 to vector<2x32xf32>
    %180 = arith.addf %179, %178 : vector<2x32xf32>
    %181 = arith.divf %179, %180 : vector<2x32xf32>
    %182 = vector.extract_strided_slice %144 {offsets = [0, 64], sizes = [2, 32], strides = [1, 1]} : vector<2x128xf32> to vector<2x32xf32>
    %183 = math.tanh %182 : vector<2x32xf32>
    %184 = vector.extract_strided_slice %144 {offsets = [0, 96], sizes = [2, 32], strides = [1, 1]} : vector<2x128xf32> to vector<2x32xf32>
    %185 = arith.negf %184 : vector<2x32xf32>
    %186 = math.exp %185 : vector<2x32xf32>
    %cst_59 = arith.constant 1.000000e+00 : f32
    %187 = vector.broadcast %cst_59 : f32 to vector<2x32xf32>
    %188 = arith.addf %187, %186 : vector<2x32xf32>
    %189 = arith.divf %187, %188 : vector<2x32xf32>
    %190 = arith.mulf %181, %132 : vector<2x32xf32>
    %191 = arith.mulf %175, %183 : vector<2x32xf32>
    %192 = arith.addf %190, %191 : vector<2x32xf32>
    %193 = math.tanh %192 : vector<2x32xf32>
    %194 = arith.mulf %189, %193 : vector<2x32xf32>
    %c4_60 = arith.constant 4 : index
    %c0_61 = arith.constant 0 : index
    %195 = vector.load %arg18[%c4_60, %c0_61] : memref<16x64xf32, #tpu.memory_space<vmem>>, vector<2x32xf32>
    tpu.vector_store %arg18[%c4_60, %c0_61], %169 {strides = array<i32>} : memref<16x64xf32, #tpu.memory_space<vmem>>, vector<2x32xf32>,
    %c10 = arith.constant 10 : index
    %c32_62 = arith.constant 32 : index
    %196 = vector.load %arg18[%c10, %c32_62] : memref<16x64xf32, #tpu.memory_space<vmem>>, vector<2x32xf32>
    tpu.vector_store %arg18[%c10, %c32_62], %194 {strides = array<i32>} : memref<16x64xf32, #tpu.memory_space<vmem>>, vector<2x32xf32>,
    %c6 = arith.constant 6 : index
    %c0_63 = arith.constant 0 : index
    %197 = vector.load %arg16[%c6, %c0_63] : memref<16x128xf32, #tpu.memory_space<vmem>>, vector<2x128xf32>
    %198 = arith.truncf %169 : vector<2x32xf32> to vector<2x32xbf16>
    %cst_64 = arith.constant dense<0.000000e+00> : vector<2x128xf32>
    %199 = tpu.matmul %198, %14, %cst_64 {dimension_numbers = #tpu.dot_dimension_numbers<[1], [0], [0], [1], [0, 0, 1, 1], [], []>} : vector<2x32xbf16>, vector<32x128xbf16>, vector<2x128xf32> -> vector<2x128xf32>
    %200 = arith.addf %197, %199 : vector<2x128xf32>
    %c6_65 = arith.constant 6 : index
    %c0_66 = arith.constant 0 : index
    %201 = vector.load %arg17[%c6_65, %c0_66] : memref<16x128xf32, #tpu.memory_space<vmem>>, vector<2x128xf32>
    %202 = arith.truncf %194 : vector<2x32xf32> to vector<2x32xbf16>
    %cst_67 = arith.constant dense<0.000000e+00> : vector<2x128xf32>
    %203 = tpu.matmul %202, %15, %cst_67 {dimension_numbers = #tpu.dot_dimension_numbers<[1], [0], [0], [1], [0, 0, 1, 1], [], []>} : vector<2x32xbf16>, vector<32x128xbf16>, vector<2x128xf32> -> vector<2x128xf32>
    %204 = arith.addf %201, %203 : vector<2x128xf32>
    %205 = vector.extract_strided_slice %200 {offsets = [0, 0], sizes = [2, 32], strides = [1, 1]} : vector<2x128xf32> to vector<2x32xf32>
    %206 = arith.negf %205 : vector<2x32xf32>
    %207 = math.exp %206 : vector<2x32xf32>
    %cst_68 = arith.constant 1.000000e+00 : f32
    %208 = vector.broadcast %cst_68 : f32 to vector<2x32xf32>
    %209 = arith.addf %208, %207 : vector<2x32xf32>
    %210 = arith.divf %208, %209 : vector<2x32xf32>
    %211 = vector.extract_strided_slice %200 {offsets = [0, 32], sizes = [2, 32], strides = [1, 1]} : vector<2x128xf32> to vector<2x32xf32>
    %212 = arith.negf %211 : vector<2x32xf32>
    %213 = math.exp %212 : vector<2x32xf32>
    %cst_69 = arith.constant 1.000000e+00 : f32
    %214 = vector.broadcast %cst_69 : f32 to vector<2x32xf32>
    %215 = arith.addf %214, %213 : vector<2x32xf32>
    %216 = arith.divf %214, %215 : vector<2x32xf32>
    %217 = vector.extract_strided_slice %200 {offsets = [0, 64], sizes = [2, 32], strides = [1, 1]} : vector<2x128xf32> to vector<2x32xf32>
    %218 = math.tanh %217 : vector<2x32xf32>
    %219 = vector.extract_strided_slice %200 {offsets = [0, 96], sizes = [2, 32], strides = [1, 1]} : vector<2x128xf32> to vector<2x32xf32>
    %220 = arith.negf %219 : vector<2x32xf32>
    %221 = math.exp %220 : vector<2x32xf32>
    %cst_70 = arith.constant 1.000000e+00 : f32
    %222 = vector.broadcast %cst_70 : f32 to vector<2x32xf32>
    %223 = arith.addf %222, %221 : vector<2x32xf32>
    %224 = arith.divf %222, %223 : vector<2x32xf32>
    %225 = arith.mulf %216, %167 : vector<2x32xf32>
    %226 = arith.mulf %210, %218 : vector<2x32xf32>
    %227 = arith.addf %225, %226 : vector<2x32xf32>
    %228 = math.tanh %227 : vector<2x32xf32>
    %229 = arith.mulf %224, %228 : vector<2x32xf32>
    %230 = vector.extract_strided_slice %204 {offsets = [0, 0], sizes = [2, 32], strides = [1, 1]} : vector<2x128xf32> to vector<2x32xf32>
    %231 = arith.negf %230 : vector<2x32xf32>
    %232 = math.exp %231 : vector<2x32xf32>
    %cst_71 = arith.constant 1.000000e+00 : f32
    %233 = vector.broadcast %cst_71 : f32 to vector<2x32xf32>
    %234 = arith.addf %233, %232 : vector<2x32xf32>
    %235 = arith.divf %233, %234 : vector<2x32xf32>
    %236 = vector.extract_strided_slice %204 {offsets = [0, 32], sizes = [2, 32], strides = [1, 1]} : vector<2x128xf32> to vector<2x32xf32>
    %237 = arith.negf %236 : vector<2x32xf32>
    %238 = math.exp %237 : vector<2x32xf32>
    %cst_72 = arith.constant 1.000000e+00 : f32
    %239 = vector.broadcast %cst_72 : f32 to vector<2x32xf32>
    %240 = arith.addf %239, %238 : vector<2x32xf32>
    %241 = arith.divf %239, %240 : vector<2x32xf32>
    %242 = vector.extract_strided_slice %204 {offsets = [0, 64], sizes = [2, 32], strides = [1, 1]} : vector<2x128xf32> to vector<2x32xf32>
    %243 = math.tanh %242 : vector<2x32xf32>
    %244 = vector.extract_strided_slice %204 {offsets = [0, 96], sizes = [2, 32], strides = [1, 1]} : vector<2x128xf32> to vector<2x32xf32>
    %245 = arith.negf %244 : vector<2x32xf32>
    %246 = math.exp %245 : vector<2x32xf32>
    %cst_73 = arith.constant 1.000000e+00 : f32
    %247 = vector.broadcast %cst_73 : f32 to vector<2x32xf32>
    %248 = arith.addf %247, %246 : vector<2x32xf32>
    %249 = arith.divf %247, %248 : vector<2x32xf32>
    %250 = arith.mulf %241, %192 : vector<2x32xf32>
    %251 = arith.mulf %235, %243 : vector<2x32xf32>
    %252 = arith.addf %250, %251 : vector<2x32xf32>
    %253 = math.tanh %252 : vector<2x32xf32>
    %254 = arith.mulf %249, %253 : vector<2x32xf32>
    %c6_74 = arith.constant 6 : index
    %c0_75 = arith.constant 0 : index
    %255 = vector.load %arg18[%c6_74, %c0_75] : memref<16x64xf32, #tpu.memory_space<vmem>>, vector<2x32xf32>
    tpu.vector_store %arg18[%c6_74, %c0_75], %229 {strides = array<i32>} : memref<16x64xf32, #tpu.memory_space<vmem>>, vector<2x32xf32>,
    %c8 = arith.constant 8 : index
    %c32_76 = arith.constant 32 : index
    %256 = vector.load %arg18[%c8, %c32_76] : memref<16x64xf32, #tpu.memory_space<vmem>>, vector<2x32xf32>
    tpu.vector_store %arg18[%c8, %c32_76], %254 {strides = array<i32>} : memref<16x64xf32, #tpu.memory_space<vmem>>, vector<2x32xf32>,
    %c8_77 = arith.constant 8 : index
    %c0_78 = arith.constant 0 : index
    %257 = vector.load %arg16[%c8_77, %c0_78] : memref<16x128xf32, #tpu.memory_space<vmem>>, vector<2x128xf32>
    %258 = arith.truncf %229 : vector<2x32xf32> to vector<2x32xbf16>
    %cst_79 = arith.constant dense<0.000000e+00> : vector<2x128xf32>
    %259 = tpu.matmul %258, %14, %cst_79 {dimension_numbers = #tpu.dot_dimension_numbers<[1], [0], [0], [1], [0, 0, 1, 1], [], []>} : vector<2x32xbf16>, vector<32x128xbf16>, vector<2x128xf32> -> vector<2x128xf32>
    %260 = arith.addf %257, %259 : vector<2x128xf32>
    %c8_80 = arith.constant 8 : index
    %c0_81 = arith.constant 0 : index
    %261 = vector.load %arg17[%c8_80, %c0_81] : memref<16x128xf32, #tpu.memory_space<vmem>>, vector<2x128xf32>
    %262 = arith.truncf %254 : vector<2x32xf32> to vector<2x32xbf16>
    %cst_82 = arith.constant dense<0.000000e+00> : vector<2x128xf32>
    %263 = tpu.matmul %262, %15, %cst_82 {dimension_numbers = #tpu.dot_dimension_numbers<[1], [0], [0], [1], [0, 0, 1, 1], [], []>} : vector<2x32xbf16>, vector<32x128xbf16>, vector<2x128xf32> -> vector<2x128xf32>
    %264 = arith.addf %261, %263 : vector<2x128xf32>
    %265 = vector.extract_strided_slice %260 {offsets = [0, 0], sizes = [2, 32], strides = [1, 1]} : vector<2x128xf32> to vector<2x32xf32>
    %266 = arith.negf %265 : vector<2x32xf32>
    %267 = math.exp %266 : vector<2x32xf32>
    %cst_83 = arith.constant 1.000000e+00 : f32
    %268 = vector.broadcast %cst_83 : f32 to vector<2x32xf32>
    %269 = arith.addf %268, %267 : vector<2x32xf32>
    %270 = arith.divf %268, %269 : vector<2x32xf32>
    %271 = vector.extract_strided_slice %260 {offsets = [0, 32], sizes = [2, 32], strides = [1, 1]} : vector<2x128xf32> to vector<2x32xf32>
    %272 = arith.negf %271 : vector<2x32xf32>
    %273 = math.exp %272 : vector<2x32xf32>
    %cst_84 = arith.constant 1.000000e+00 : f32
    %274 = vector.broadcast %cst_84 : f32 to vector<2x32xf32>
    %275 = arith.addf %274, %273 : vector<2x32xf32>
    %276 = arith.divf %274, %275 : vector<2x32xf32>
    %277 = vector.extract_strided_slice %260 {offsets = [0, 64], sizes = [2, 32], strides = [1, 1]} : vector<2x128xf32> to vector<2x32xf32>
    %278 = math.tanh %277 : vector<2x32xf32>
    %279 = vector.extract_strided_slice %260 {offsets = [0, 96], sizes = [2, 32], strides = [1, 1]} : vector<2x128xf32> to vector<2x32xf32>
    %280 = arith.negf %279 : vector<2x32xf32>
    %281 = math.exp %280 : vector<2x32xf32>
    %cst_85 = arith.constant 1.000000e+00 : f32
    %282 = vector.broadcast %cst_85 : f32 to vector<2x32xf32>
    %283 = arith.addf %282, %281 : vector<2x32xf32>
    %284 = arith.divf %282, %283 : vector<2x32xf32>
    %285 = arith.mulf %276, %227 : vector<2x32xf32>
    %286 = arith.mulf %270, %278 : vector<2x32xf32>
    %287 = arith.addf %285, %286 : vector<2x32xf32>
    %288 = math.tanh %287 : vector<2x32xf32>
    %289 = arith.mulf %284, %288 : vector<2x32xf32>
    %290 = vector.extract_strided_slice %264 {offsets = [0, 0], sizes = [2, 32], strides = [1, 1]} : vector<2x128xf32> to vector<2x32xf32>
    %291 = arith.negf %290 : vector<2x32xf32>
    %292 = math.exp %291 : vector<2x32xf32>
    %cst_86 = arith.constant 1.000000e+00 : f32
    %293 = vector.broadcast %cst_86 : f32 to vector<2x32xf32>
    %294 = arith.addf %293, %292 : vector<2x32xf32>
    %295 = arith.divf %293, %294 : vector<2x32xf32>
    %296 = vector.extract_strided_slice %264 {offsets = [0, 32], sizes = [2, 32], strides = [1, 1]} : vector<2x128xf32> to vector<2x32xf32>
    %297 = arith.negf %296 : vector<2x32xf32>
    %298 = math.exp %297 : vector<2x32xf32>
    %cst_87 = arith.constant 1.000000e+00 : f32
    %299 = vector.broadcast %cst_87 : f32 to vector<2x32xf32>
    %300 = arith.addf %299, %298 : vector<2x32xf32>
    %301 = arith.divf %299, %300 : vector<2x32xf32>
    %302 = vector.extract_strided_slice %264 {offsets = [0, 64], sizes = [2, 32], strides = [1, 1]} : vector<2x128xf32> to vector<2x32xf32>
    %303 = math.tanh %302 : vector<2x32xf32>
    %304 = vector.extract_strided_slice %264 {offsets = [0, 96], sizes = [2, 32], strides = [1, 1]} : vector<2x128xf32> to vector<2x32xf32>
    %305 = arith.negf %304 : vector<2x32xf32>
    %306 = math.exp %305 : vector<2x32xf32>
    %cst_88 = arith.constant 1.000000e+00 : f32
    %307 = vector.broadcast %cst_88 : f32 to vector<2x32xf32>
    %308 = arith.addf %307, %306 : vector<2x32xf32>
    %309 = arith.divf %307, %308 : vector<2x32xf32>
    %310 = arith.mulf %301, %252 : vector<2x32xf32>
    %311 = arith.mulf %295, %303 : vector<2x32xf32>
    %312 = arith.addf %310, %311 : vector<2x32xf32>
    %313 = math.tanh %312 : vector<2x32xf32>
    %314 = arith.mulf %309, %313 : vector<2x32xf32>
    %c8_89 = arith.constant 8 : index
    %c0_90 = arith.constant 0 : index
    %315 = vector.load %arg18[%c8_89, %c0_90] : memref<16x64xf32, #tpu.memory_space<vmem>>, vector<2x32xf32>
    tpu.vector_store %arg18[%c8_89, %c0_90], %289 {strides = array<i32>} : memref<16x64xf32, #tpu.memory_space<vmem>>, vector<2x32xf32>,
    %c6_91 = arith.constant 6 : index
    %c32_92 = arith.constant 32 : index
    %316 = vector.load %arg18[%c6_91, %c32_92] : memref<16x64xf32, #tpu.memory_space<vmem>>, vector<2x32xf32>
    tpu.vector_store %arg18[%c6_91, %c32_92], %314 {strides = array<i32>} : memref<16x64xf32, #tpu.memory_space<vmem>>, vector<2x32xf32>,
    %c10_93 = arith.constant 10 : index
    %c0_94 = arith.constant 0 : index
    %317 = vector.load %arg16[%c10_93, %c0_94] : memref<16x128xf32, #tpu.memory_space<vmem>>, vector<2x128xf32>
    %318 = arith.truncf %289 : vector<2x32xf32> to vector<2x32xbf16>
    %cst_95 = arith.constant dense<0.000000e+00> : vector<2x128xf32>
    %319 = tpu.matmul %318, %14, %cst_95 {dimension_numbers = #tpu.dot_dimension_numbers<[1], [0], [0], [1], [0, 0, 1, 1], [], []>} : vector<2x32xbf16>, vector<32x128xbf16>, vector<2x128xf32> -> vector<2x128xf32>
    %320 = arith.addf %317, %319 : vector<2x128xf32>
    %c10_96 = arith.constant 10 : index
    %c0_97 = arith.constant 0 : index
    %321 = vector.load %arg17[%c10_96, %c0_97] : memref<16x128xf32, #tpu.memory_space<vmem>>, vector<2x128xf32>
    %322 = arith.truncf %314 : vector<2x32xf32> to vector<2x32xbf16>
    %cst_98 = arith.constant dense<0.000000e+00> : vector<2x128xf32>
    %323 = tpu.matmul %322, %15, %cst_98 {dimension_numbers = #tpu.dot_dimension_numbers<[1], [0], [0], [1], [0, 0, 1, 1], [], []>} : vector<2x32xbf16>, vector<32x128xbf16>, vector<2x128xf32> -> vector<2x128xf32>
    %324 = arith.addf %321, %323 : vector<2x128xf32>
    %325 = vector.extract_strided_slice %320 {offsets = [0, 0], sizes = [2, 32], strides = [1, 1]} : vector<2x128xf32> to vector<2x32xf32>
    %326 = arith.negf %325 : vector<2x32xf32>
    %327 = math.exp %326 : vector<2x32xf32>
    %cst_99 = arith.constant 1.000000e+00 : f32
    %328 = vector.broadcast %cst_99 : f32 to vector<2x32xf32>
    %329 = arith.addf %328, %327 : vector<2x32xf32>
    %330 = arith.divf %328, %329 : vector<2x32xf32>
    %331 = vector.extract_strided_slice %320 {offsets = [0, 32], sizes = [2, 32], strides = [1, 1]} : vector<2x128xf32> to vector<2x32xf32>
    %332 = arith.negf %331 : vector<2x32xf32>
    %333 = math.exp %332 : vector<2x32xf32>
    %cst_100 = arith.constant 1.000000e+00 : f32
    %334 = vector.broadcast %cst_100 : f32 to vector<2x32xf32>
    %335 = arith.addf %334, %333 : vector<2x32xf32>
    %336 = arith.divf %334, %335 : vector<2x32xf32>
    %337 = vector.extract_strided_slice %320 {offsets = [0, 64], sizes = [2, 32], strides = [1, 1]} : vector<2x128xf32> to vector<2x32xf32>
    %338 = math.tanh %337 : vector<2x32xf32>
    %339 = vector.extract_strided_slice %320 {offsets = [0, 96], sizes = [2, 32], strides = [1, 1]} : vector<2x128xf32> to vector<2x32xf32>
    %340 = arith.negf %339 : vector<2x32xf32>
    %341 = math.exp %340 : vector<2x32xf32>
    %cst_101 = arith.constant 1.000000e+00 : f32
    %342 = vector.broadcast %cst_101 : f32 to vector<2x32xf32>
    %343 = arith.addf %342, %341 : vector<2x32xf32>
    %344 = arith.divf %342, %343 : vector<2x32xf32>
    %345 = arith.mulf %336, %287 : vector<2x32xf32>
    %346 = arith.mulf %330, %338 : vector<2x32xf32>
    %347 = arith.addf %345, %346 : vector<2x32xf32>
    %348 = math.tanh %347 : vector<2x32xf32>
    %349 = arith.mulf %344, %348 : vector<2x32xf32>
    %350 = vector.extract_strided_slice %324 {offsets = [0, 0], sizes = [2, 32], strides = [1, 1]} : vector<2x128xf32> to vector<2x32xf32>
    %351 = arith.negf %350 : vector<2x32xf32>
    %352 = math.exp %351 : vector<2x32xf32>
    %cst_102 = arith.constant 1.000000e+00 : f32
    %353 = vector.broadcast %cst_102 : f32 to vector<2x32xf32>
    %354 = arith.addf %353, %352 : vector<2x32xf32>
    %355 = arith.divf %353, %354 : vector<2x32xf32>
    %356 = vector.extract_strided_slice %324 {offsets = [0, 32], sizes = [2, 32], strides = [1, 1]} : vector<2x128xf32> to vector<2x32xf32>
    %357 = arith.negf %356 : vector<2x32xf32>
    %358 = math.exp %357 : vector<2x32xf32>
    %cst_103 = arith.constant 1.000000e+00 : f32
    %359 = vector.broadcast %cst_103 : f32 to vector<2x32xf32>
    %360 = arith.addf %359, %358 : vector<2x32xf32>
    %361 = arith.divf %359, %360 : vector<2x32xf32>
    %362 = vector.extract_strided_slice %324 {offsets = [0, 64], sizes = [2, 32], strides = [1, 1]} : vector<2x128xf32> to vector<2x32xf32>
    %363 = math.tanh %362 : vector<2x32xf32>
    %364 = vector.extract_strided_slice %324 {offsets = [0, 96], sizes = [2, 32], strides = [1, 1]} : vector<2x128xf32> to vector<2x32xf32>
    %365 = arith.negf %364 : vector<2x32xf32>
    %366 = math.exp %365 : vector<2x32xf32>
    %cst_104 = arith.constant 1.000000e+00 : f32
    %367 = vector.broadcast %cst_104 : f32 to vector<2x32xf32>
    %368 = arith.addf %367, %366 : vector<2x32xf32>
    %369 = arith.divf %367, %368 : vector<2x32xf32>
    %370 = arith.mulf %361, %312 : vector<2x32xf32>
    %371 = arith.mulf %355, %363 : vector<2x32xf32>
    %372 = arith.addf %370, %371 : vector<2x32xf32>
    %373 = math.tanh %372 : vector<2x32xf32>
    %374 = arith.mulf %369, %373 : vector<2x32xf32>
    %c10_105 = arith.constant 10 : index
    %c0_106 = arith.constant 0 : index
    %375 = vector.load %arg18[%c10_105, %c0_106] : memref<16x64xf32, #tpu.memory_space<vmem>>, vector<2x32xf32>
    tpu.vector_store %arg18[%c10_105, %c0_106], %349 {strides = array<i32>} : memref<16x64xf32, #tpu.memory_space<vmem>>, vector<2x32xf32>,
    %c4_107 = arith.constant 4 : index
    %c32_108 = arith.constant 32 : index
    %376 = vector.load %arg18[%c4_107, %c32_108] : memref<16x64xf32, #tpu.memory_space<vmem>>, vector<2x32xf32>
    tpu.vector_store %arg18[%c4_107, %c32_108], %374 {strides = array<i32>} : memref<16x64xf32, #tpu.memory_space<vmem>>, vector<2x32xf32>,
    %c12_109 = arith.constant 12 : index
    %c0_110 = arith.constant 0 : index
    %377 = vector.load %arg16[%c12_109, %c0_110] : memref<16x128xf32, #tpu.memory_space<vmem>>, vector<2x128xf32>
    %378 = arith.truncf %349 : vector<2x32xf32> to vector<2x32xbf16>
    %cst_111 = arith.constant dense<0.000000e+00> : vector<2x128xf32>
    %379 = tpu.matmul %378, %14, %cst_111 {dimension_numbers = #tpu.dot_dimension_numbers<[1], [0], [0], [1], [0, 0, 1, 1], [], []>} : vector<2x32xbf16>, vector<32x128xbf16>, vector<2x128xf32> -> vector<2x128xf32>
    %380 = arith.addf %377, %379 : vector<2x128xf32>
    %c12_112 = arith.constant 12 : index
    %c0_113 = arith.constant 0 : index
    %381 = vector.load %arg17[%c12_112, %c0_113] : memref<16x128xf32, #tpu.memory_space<vmem>>, vector<2x128xf32>
    %382 = arith.truncf %374 : vector<2x32xf32> to vector<2x32xbf16>
    %cst_114 = arith.constant dense<0.000000e+00> : vector<2x128xf32>
    %383 = tpu.matmul %382, %15, %cst_114 {dimension_numbers = #tpu.dot_dimension_numbers<[1], [0], [0], [1], [0, 0, 1, 1], [], []>} : vector<2x32xbf16>, vector<32x128xbf16>, vector<2x128xf32> -> vector<2x128xf32>
    %384 = arith.addf %381, %383 : vector<2x128xf32>
    %385 = vector.extract_strided_slice %380 {offsets = [0, 0], sizes = [2, 32], strides = [1, 1]} : vector<2x128xf32> to vector<2x32xf32>
    %386 = arith.negf %385 : vector<2x32xf32>
    %387 = math.exp %386 : vector<2x32xf32>
    %cst_115 = arith.constant 1.000000e+00 : f32
    %388 = vector.broadcast %cst_115 : f32 to vector<2x32xf32>
    %389 = arith.addf %388, %387 : vector<2x32xf32>
    %390 = arith.divf %388, %389 : vector<2x32xf32>
    %391 = vector.extract_strided_slice %380 {offsets = [0, 32], sizes = [2, 32], strides = [1, 1]} : vector<2x128xf32> to vector<2x32xf32>
    %392 = arith.negf %391 : vector<2x32xf32>
    %393 = math.exp %392 : vector<2x32xf32>
    %cst_116 = arith.constant 1.000000e+00 : f32
    %394 = vector.broadcast %cst_116 : f32 to vector<2x32xf32>
    %395 = arith.addf %394, %393 : vector<2x32xf32>
    %396 = arith.divf %394, %395 : vector<2x32xf32>
    %397 = vector.extract_strided_slice %380 {offsets = [0, 64], sizes = [2, 32], strides = [1, 1]} : vector<2x128xf32> to vector<2x32xf32>
    %398 = math.tanh %397 : vector<2x32xf32>
    %399 = vector.extract_strided_slice %380 {offsets = [0, 96], sizes = [2, 32], strides = [1, 1]} : vector<2x128xf32> to vector<2x32xf32>
    %400 = arith.negf %399 : vector<2x32xf32>
    %401 = math.exp %400 : vector<2x32xf32>
    %cst_117 = arith.constant 1.000000e+00 : f32
    %402 = vector.broadcast %cst_117 : f32 to vector<2x32xf32>
    %403 = arith.addf %402, %401 : vector<2x32xf32>
    %404 = arith.divf %402, %403 : vector<2x32xf32>
    %405 = arith.mulf %396, %347 : vector<2x32xf32>
    %406 = arith.mulf %390, %398 : vector<2x32xf32>
    %407 = arith.addf %405, %406 : vector<2x32xf32>
    %408 = math.tanh %407 : vector<2x32xf32>
    %409 = arith.mulf %404, %408 : vector<2x32xf32>
    %410 = vector.extract_strided_slice %384 {offsets = [0, 0], sizes = [2, 32], strides = [1, 1]} : vector<2x128xf32> to vector<2x32xf32>
    %411 = arith.negf %410 : vector<2x32xf32>
    %412 = math.exp %411 : vector<2x32xf32>
    %cst_118 = arith.constant 1.000000e+00 : f32
    %413 = vector.broadcast %cst_118 : f32 to vector<2x32xf32>
    %414 = arith.addf %413, %412 : vector<2x32xf32>
    %415 = arith.divf %413, %414 : vector<2x32xf32>
    %416 = vector.extract_strided_slice %384 {offsets = [0, 32], sizes = [2, 32], strides = [1, 1]} : vector<2x128xf32> to vector<2x32xf32>
    %417 = arith.negf %416 : vector<2x32xf32>
    %418 = math.exp %417 : vector<2x32xf32>
    %cst_119 = arith.constant 1.000000e+00 : f32
    %419 = vector.broadcast %cst_119 : f32 to vector<2x32xf32>
    %420 = arith.addf %419, %418 : vector<2x32xf32>
    %421 = arith.divf %419, %420 : vector<2x32xf32>
    %422 = vector.extract_strided_slice %384 {offsets = [0, 64], sizes = [2, 32], strides = [1, 1]} : vector<2x128xf32> to vector<2x32xf32>
    %423 = math.tanh %422 : vector<2x32xf32>
    %424 = vector.extract_strided_slice %384 {offsets = [0, 96], sizes = [2, 32], strides = [1, 1]} : vector<2x128xf32> to vector<2x32xf32>
    %425 = arith.negf %424 : vector<2x32xf32>
    %426 = math.exp %425 : vector<2x32xf32>
    %cst_120 = arith.constant 1.000000e+00 : f32
    %427 = vector.broadcast %cst_120 : f32 to vector<2x32xf32>
    %428 = arith.addf %427, %426 : vector<2x32xf32>
    %429 = arith.divf %427, %428 : vector<2x32xf32>
    %430 = arith.mulf %421, %372 : vector<2x32xf32>
    %431 = arith.mulf %415, %423 : vector<2x32xf32>
    %432 = arith.addf %430, %431 : vector<2x32xf32>
    %433 = math.tanh %432 : vector<2x32xf32>
    %434 = arith.mulf %429, %433 : vector<2x32xf32>
    %c12_121 = arith.constant 12 : index
    %c0_122 = arith.constant 0 : index
    %435 = vector.load %arg18[%c12_121, %c0_122] : memref<16x64xf32, #tpu.memory_space<vmem>>, vector<2x32xf32>
    tpu.vector_store %arg18[%c12_121, %c0_122], %409 {strides = array<i32>} : memref<16x64xf32, #tpu.memory_space<vmem>>, vector<2x32xf32>,
    %c2_123 = arith.constant 2 : index
    %c32_124 = arith.constant 32 : index
    %436 = vector.load %arg18[%c2_123, %c32_124] : memref<16x64xf32, #tpu.memory_space<vmem>>, vector<2x32xf32>
    tpu.vector_store %arg18[%c2_123, %c32_124], %434 {strides = array<i32>} : memref<16x64xf32, #tpu.memory_space<vmem>>, vector<2x32xf32>,
    %c14_125 = arith.constant 14 : index
    %c0_126 = arith.constant 0 : index
    %437 = vector.load %arg16[%c14_125, %c0_126] : memref<16x128xf32, #tpu.memory_space<vmem>>, vector<2x128xf32>
    %438 = arith.truncf %409 : vector<2x32xf32> to vector<2x32xbf16>
    %cst_127 = arith.constant dense<0.000000e+00> : vector<2x128xf32>
    %439 = tpu.matmul %438, %14, %cst_127 {dimension_numbers = #tpu.dot_dimension_numbers<[1], [0], [0], [1], [0, 0, 1, 1], [], []>} : vector<2x32xbf16>, vector<32x128xbf16>, vector<2x128xf32> -> vector<2x128xf32>
    %440 = arith.addf %437, %439 : vector<2x128xf32>
    %c14_128 = arith.constant 14 : index
    %c0_129 = arith.constant 0 : index
    %441 = vector.load %arg17[%c14_128, %c0_129] : memref<16x128xf32, #tpu.memory_space<vmem>>, vector<2x128xf32>
    %442 = arith.truncf %434 : vector<2x32xf32> to vector<2x32xbf16>
    %cst_130 = arith.constant dense<0.000000e+00> : vector<2x128xf32>
    %443 = tpu.matmul %442, %15, %cst_130 {dimension_numbers = #tpu.dot_dimension_numbers<[1], [0], [0], [1], [0, 0, 1, 1], [], []>} : vector<2x32xbf16>, vector<32x128xbf16>, vector<2x128xf32> -> vector<2x128xf32>
    %444 = arith.addf %441, %443 : vector<2x128xf32>
    %445 = vector.extract_strided_slice %440 {offsets = [0, 0], sizes = [2, 32], strides = [1, 1]} : vector<2x128xf32> to vector<2x32xf32>
    %446 = arith.negf %445 : vector<2x32xf32>
    %447 = math.exp %446 : vector<2x32xf32>
    %cst_131 = arith.constant 1.000000e+00 : f32
    %448 = vector.broadcast %cst_131 : f32 to vector<2x32xf32>
    %449 = arith.addf %448, %447 : vector<2x32xf32>
    %450 = arith.divf %448, %449 : vector<2x32xf32>
    %451 = vector.extract_strided_slice %440 {offsets = [0, 32], sizes = [2, 32], strides = [1, 1]} : vector<2x128xf32> to vector<2x32xf32>
    %452 = arith.negf %451 : vector<2x32xf32>
    %453 = math.exp %452 : vector<2x32xf32>
    %cst_132 = arith.constant 1.000000e+00 : f32
    %454 = vector.broadcast %cst_132 : f32 to vector<2x32xf32>
    %455 = arith.addf %454, %453 : vector<2x32xf32>
    %456 = arith.divf %454, %455 : vector<2x32xf32>
    %457 = vector.extract_strided_slice %440 {offsets = [0, 64], sizes = [2, 32], strides = [1, 1]} : vector<2x128xf32> to vector<2x32xf32>
    %458 = math.tanh %457 : vector<2x32xf32>
    %459 = vector.extract_strided_slice %440 {offsets = [0, 96], sizes = [2, 32], strides = [1, 1]} : vector<2x128xf32> to vector<2x32xf32>
    %460 = arith.negf %459 : vector<2x32xf32>
    %461 = math.exp %460 : vector<2x32xf32>
    %cst_133 = arith.constant 1.000000e+00 : f32
    %462 = vector.broadcast %cst_133 : f32 to vector<2x32xf32>
    %463 = arith.addf %462, %461 : vector<2x32xf32>
    %464 = arith.divf %462, %463 : vector<2x32xf32>
    %465 = arith.mulf %456, %407 : vector<2x32xf32>
    %466 = arith.mulf %450, %458 : vector<2x32xf32>
    %467 = arith.addf %465, %466 : vector<2x32xf32>
    %468 = math.tanh %467 : vector<2x32xf32>
    %469 = arith.mulf %464, %468 : vector<2x32xf32>
    %470 = vector.extract_strided_slice %444 {offsets = [0, 0], sizes = [2, 32], strides = [1, 1]} : vector<2x128xf32> to vector<2x32xf32>
    %471 = arith.negf %470 : vector<2x32xf32>
    %472 = math.exp %471 : vector<2x32xf32>
    %cst_134 = arith.constant 1.000000e+00 : f32
    %473 = vector.broadcast %cst_134 : f32 to vector<2x32xf32>
    %474 = arith.addf %473, %472 : vector<2x32xf32>
    %475 = arith.divf %473, %474 : vector<2x32xf32>
    %476 = vector.extract_strided_slice %444 {offsets = [0, 32], sizes = [2, 32], strides = [1, 1]} : vector<2x128xf32> to vector<2x32xf32>
    %477 = arith.negf %476 : vector<2x32xf32>
    %478 = math.exp %477 : vector<2x32xf32>
    %cst_135 = arith.constant 1.000000e+00 : f32
    %479 = vector.broadcast %cst_135 : f32 to vector<2x32xf32>
    %480 = arith.addf %479, %478 : vector<2x32xf32>
    %481 = arith.divf %479, %480 : vector<2x32xf32>
    %482 = vector.extract_strided_slice %444 {offsets = [0, 64], sizes = [2, 32], strides = [1, 1]} : vector<2x128xf32> to vector<2x32xf32>
    %483 = math.tanh %482 : vector<2x32xf32>
    %484 = vector.extract_strided_slice %444 {offsets = [0, 96], sizes = [2, 32], strides = [1, 1]} : vector<2x128xf32> to vector<2x32xf32>
    %485 = arith.negf %484 : vector<2x32xf32>
    %486 = math.exp %485 : vector<2x32xf32>
    %cst_136 = arith.constant 1.000000e+00 : f32
    %487 = vector.broadcast %cst_136 : f32 to vector<2x32xf32>
    %488 = arith.addf %487, %486 : vector<2x32xf32>
    %489 = arith.divf %487, %488 : vector<2x32xf32>
    %490 = arith.mulf %481, %432 : vector<2x32xf32>
    %491 = arith.mulf %475, %483 : vector<2x32xf32>
    %492 = arith.addf %490, %491 : vector<2x32xf32>
    %493 = math.tanh %492 : vector<2x32xf32>
    %494 = arith.mulf %489, %493 : vector<2x32xf32>
    %c14_137 = arith.constant 14 : index
    %c0_138 = arith.constant 0 : index
    %495 = vector.load %arg18[%c14_137, %c0_138] : memref<16x64xf32, #tpu.memory_space<vmem>>, vector<2x32xf32>
    tpu.vector_store %arg18[%c14_137, %c0_138], %469 {strides = array<i32>} : memref<16x64xf32, #tpu.memory_space<vmem>>, vector<2x32xf32>,
    %c0_139 = arith.constant 0 : index
    %c32_140 = arith.constant 32 : index
    %496 = vector.load %arg18[%c0_139, %c32_140] : memref<16x64xf32, #tpu.memory_space<vmem>>, vector<2x32xf32>
    tpu.vector_store %arg18[%c0_139, %c32_140], %494 {strides = array<i32>} : memref<16x64xf32, #tpu.memory_space<vmem>>, vector<2x32xf32>,
    %497 = tpu.concatenate %469, %74 in 1 : vector<2x32xf32>, vector<2x32xf32> -> vector<2x64xf32>
    %498 = arith.truncf %497 : vector<2x64xf32> to vector<2x64xbf16>
    %c0_141 = arith.constant 0 : index
    %c0_142 = arith.constant 0 : index
    %499 = vector.load %arg11[%c0_141, %c0_142] : memref<64x128xbf16, #tpu.memory_space<vmem>>, vector<64x128xbf16>
    %cst_143 = arith.constant dense<0.000000e+00> : vector<2x128xf32>
    %500 = tpu.matmul %498, %499, %cst_143 {dimension_numbers = #tpu.dot_dimension_numbers<[1], [0], [0], [1], [0, 0, 1, 1], [], []>} : vector<2x64xbf16>, vector<64x128xbf16>, vector<2x128xf32> -> vector<2x128xf32>
    %c0_144 = arith.constant 0 : index
    %c0_145 = arith.constant 0 : index
    %501 = vector.load %arg12[%c0_144, %c0_145] : memref<1x128xf32, #tpu.memory_space<vmem>>, vector<1x128xf32>
    %502 = vector.broadcast %501 : vector<1x128xf32> to vector<2x128xf32>
    %503 = arith.addf %500, %502 : vector<2x128xf32>
    %504 = vector.extract_strided_slice %503 {offsets = [0, 0], sizes = [2, 32], strides = [1, 1]} : vector<2x128xf32> to vector<2x32xf32>
    %505 = arith.negf %504 : vector<2x32xf32>
    %506 = math.exp %505 : vector<2x32xf32>
    %cst_146 = arith.constant 1.000000e+00 : f32
    %507 = vector.broadcast %cst_146 : f32 to vector<2x32xf32>
    %508 = arith.addf %507, %506 : vector<2x32xf32>
    %509 = arith.divf %507, %508 : vector<2x32xf32>
    %510 = vector.extract_strided_slice %503 {offsets = [0, 64], sizes = [2, 32], strides = [1, 1]} : vector<2x128xf32> to vector<2x32xf32>
    %511 = math.tanh %510 : vector<2x32xf32>
    %512 = vector.extract_strided_slice %503 {offsets = [0, 96], sizes = [2, 32], strides = [1, 1]} : vector<2x128xf32> to vector<2x32xf32>
    %513 = arith.negf %512 : vector<2x32xf32>
    %514 = math.exp %513 : vector<2x32xf32>
    %cst_147 = arith.constant 1.000000e+00 : f32
    %515 = vector.broadcast %cst_147 : f32 to vector<2x32xf32>
    %516 = arith.addf %515, %514 : vector<2x32xf32>
    %517 = arith.divf %515, %516 : vector<2x32xf32>
    %518 = arith.mulf %509, %511 : vector<2x32xf32>
    %519 = math.tanh %518 : vector<2x32xf32>
    %520 = arith.mulf %517, %519 : vector<2x32xf32>
    %c0_148 = arith.constant 0 : index
    %c0_149 = arith.constant 0 : index
    %521 = vector.load %arg18[%c0_148, %c0_149] : memref<16x64xf32, #tpu.memory_space<vmem>>, vector<16x64xf32>
    %522 = arith.truncf %521 : vector<16x64xf32> to vector<16x64xbf16>
    %c0_150 = arith.constant 0 : index
    %c0_151 = arith.constant 0 : index
    %523 = vector.load %arg8[%c0_150, %c0_151] : memref<64x128xbf16, #tpu.memory_space<vmem>>, vector<64x128xbf16>
    %cst_152 = arith.constant dense<0.000000e+00> : vector<16x128xf32>
    %524 = tpu.matmul %522, %523, %cst_152 {dimension_numbers = #tpu.dot_dimension_numbers<[1], [0], [0], [1], [0, 0, 1, 1], [], []>} : vector<16x64xbf16>, vector<64x128xbf16>, vector<16x128xf32> -> vector<16x128xf32>
    %c0_153 = arith.constant 0 : index
    %c0_154 = arith.constant 0 : index
    %525 = vector.load %arg10[%c0_153, %c0_154] : memref<1x128xf32, #tpu.memory_space<vmem>>, vector<1x128xf32>
    %526 = vector.broadcast %525 : vector<1x128xf32> to vector<16x128xf32>
    %527 = arith.addf %524, %526 : vector<16x128xf32>
    %c0_155 = arith.constant 0 : index
    %c0_156 = arith.constant 0 : index
    %528 = vector.load %arg16[%c0_155, %c0_156] : memref<16x128xf32, #tpu.memory_space<vmem>>, vector<16x128xf32>
    tpu.vector_store %arg16[%c0_155, %c0_156], %527 {strides = array<i32>} : memref<16x128xf32, #tpu.memory_space<vmem>>, vector<16x128xf32>,
    %c0_157 = arith.constant 0 : index
    %c0_158 = arith.constant 0 : index
    %529 = vector.load %arg9[%c0_157, %c0_158] : memref<32x128xbf16, #tpu.memory_space<vmem>>, vector<32x128xbf16>
    %c0_159 = arith.constant 0 : index
    %c0_160 = arith.constant 0 : index
    %530 = vector.load %arg16[%c0_159, %c0_160] : memref<16x128xf32, #tpu.memory_space<vmem>>, vector<2x128xf32>
    %531 = arith.truncf %16 : vector<2x32xf32> to vector<2x32xbf16>
    %cst_161 = arith.constant dense<0.000000e+00> : vector<2x128xf32>
    %532 = tpu.matmul %531, %529, %cst_161 {dimension_numbers = #tpu.dot_dimension_numbers<[1], [0], [0], [1], [0, 0, 1, 1], [], []>} : vector<2x32xbf16>, vector<32x128xbf16>, vector<2x128xf32> -> vector<2x128xf32>
    %533 = arith.addf %530, %532 : vector<2x128xf32>
    %534 = vector.extract_strided_slice %533 {offsets = [0, 0], sizes = [2, 32], strides = [1, 1]} : vector<2x128xf32> to vector<2x32xf32>
    %535 = arith.negf %534 : vector<2x32xf32>
    %536 = math.exp %535 : vector<2x32xf32>
    %cst_162 = arith.constant 1.000000e+00 : f32
    %537 = vector.broadcast %cst_162 : f32 to vector<2x32xf32>
    %538 = arith.addf %537, %536 : vector<2x32xf32>
    %539 = arith.divf %537, %538 : vector<2x32xf32>
    %540 = vector.extract_strided_slice %533 {offsets = [0, 32], sizes = [2, 32], strides = [1, 1]} : vector<2x128xf32> to vector<2x32xf32>
    %541 = arith.negf %540 : vector<2x32xf32>
    %542 = math.exp %541 : vector<2x32xf32>
    %cst_163 = arith.constant 1.000000e+00 : f32
    %543 = vector.broadcast %cst_163 : f32 to vector<2x32xf32>
    %544 = arith.addf %543, %542 : vector<2x32xf32>
    %545 = arith.divf %543, %544 : vector<2x32xf32>
    %546 = vector.extract_strided_slice %533 {offsets = [0, 64], sizes = [2, 32], strides = [1, 1]} : vector<2x128xf32> to vector<2x32xf32>
    %547 = math.tanh %546 : vector<2x32xf32>
    %548 = vector.extract_strided_slice %533 {offsets = [0, 96], sizes = [2, 32], strides = [1, 1]} : vector<2x128xf32> to vector<2x32xf32>
    %549 = arith.negf %548 : vector<2x32xf32>
    %550 = math.exp %549 : vector<2x32xf32>
    %cst_164 = arith.constant 1.000000e+00 : f32
    %551 = vector.broadcast %cst_164 : f32 to vector<2x32xf32>
    %552 = arith.addf %551, %550 : vector<2x32xf32>
    %553 = arith.divf %551, %552 : vector<2x32xf32>
    %554 = arith.mulf %545, %16 : vector<2x32xf32>
    %555 = arith.mulf %539, %547 : vector<2x32xf32>
    %556 = arith.addf %554, %555 : vector<2x32xf32>
    %557 = math.tanh %556 : vector<2x32xf32>
    %558 = arith.mulf %553, %557 : vector<2x32xf32>
    %c2_165 = arith.constant 2 : index
    %c0_166 = arith.constant 0 : index
    %559 = vector.load %arg16[%c2_165, %c0_166] : memref<16x128xf32, #tpu.memory_space<vmem>>, vector<2x128xf32>
    %560 = arith.truncf %558 : vector<2x32xf32> to vector<2x32xbf16>
    %cst_167 = arith.constant dense<0.000000e+00> : vector<2x128xf32>
    %561 = tpu.matmul %560, %529, %cst_167 {dimension_numbers = #tpu.dot_dimension_numbers<[1], [0], [0], [1], [0, 0, 1, 1], [], []>} : vector<2x32xbf16>, vector<32x128xbf16>, vector<2x128xf32> -> vector<2x128xf32>
    %562 = arith.addf %559, %561 : vector<2x128xf32>
    %563 = vector.extract_strided_slice %562 {offsets = [0, 0], sizes = [2, 32], strides = [1, 1]} : vector<2x128xf32> to vector<2x32xf32>
    %564 = arith.negf %563 : vector<2x32xf32>
    %565 = math.exp %564 : vector<2x32xf32>
    %cst_168 = arith.constant 1.000000e+00 : f32
    %566 = vector.broadcast %cst_168 : f32 to vector<2x32xf32>
    %567 = arith.addf %566, %565 : vector<2x32xf32>
    %568 = arith.divf %566, %567 : vector<2x32xf32>
    %569 = vector.extract_strided_slice %562 {offsets = [0, 32], sizes = [2, 32], strides = [1, 1]} : vector<2x128xf32> to vector<2x32xf32>
    %570 = arith.negf %569 : vector<2x32xf32>
    %571 = math.exp %570 : vector<2x32xf32>
    %cst_169 = arith.constant 1.000000e+00 : f32
    %572 = vector.broadcast %cst_169 : f32 to vector<2x32xf32>
    %573 = arith.addf %572, %571 : vector<2x32xf32>
    %574 = arith.divf %572, %573 : vector<2x32xf32>
    %575 = vector.extract_strided_slice %562 {offsets = [0, 64], sizes = [2, 32], strides = [1, 1]} : vector<2x128xf32> to vector<2x32xf32>
    %576 = math.tanh %575 : vector<2x32xf32>
    %577 = vector.extract_strided_slice %562 {offsets = [0, 96], sizes = [2, 32], strides = [1, 1]} : vector<2x128xf32> to vector<2x32xf32>
    %578 = arith.negf %577 : vector<2x32xf32>
    %579 = math.exp %578 : vector<2x32xf32>
    %cst_170 = arith.constant 1.000000e+00 : f32
    %580 = vector.broadcast %cst_170 : f32 to vector<2x32xf32>
    %581 = arith.addf %580, %579 : vector<2x32xf32>
    %582 = arith.divf %580, %581 : vector<2x32xf32>
    %583 = arith.mulf %574, %556 : vector<2x32xf32>
    %584 = arith.mulf %568, %576 : vector<2x32xf32>
    %585 = arith.addf %583, %584 : vector<2x32xf32>
    %586 = math.tanh %585 : vector<2x32xf32>
    %587 = arith.mulf %582, %586 : vector<2x32xf32>
    %c4_171 = arith.constant 4 : index
    %c0_172 = arith.constant 0 : index
    %588 = vector.load %arg16[%c4_171, %c0_172] : memref<16x128xf32, #tpu.memory_space<vmem>>, vector<2x128xf32>
    %589 = arith.truncf %587 : vector<2x32xf32> to vector<2x32xbf16>
    %cst_173 = arith.constant dense<0.000000e+00> : vector<2x128xf32>
    %590 = tpu.matmul %589, %529, %cst_173 {dimension_numbers = #tpu.dot_dimension_numbers<[1], [0], [0], [1], [0, 0, 1, 1], [], []>} : vector<2x32xbf16>, vector<32x128xbf16>, vector<2x128xf32> -> vector<2x128xf32>
    %591 = arith.addf %588, %590 : vector<2x128xf32>
    %592 = vector.extract_strided_slice %591 {offsets = [0, 0], sizes = [2, 32], strides = [1, 1]} : vector<2x128xf32> to vector<2x32xf32>
    %593 = arith.negf %592 : vector<2x32xf32>
    %594 = math.exp %593 : vector<2x32xf32>
    %cst_174 = arith.constant 1.000000e+00 : f32
    %595 = vector.broadcast %cst_174 : f32 to vector<2x32xf32>
    %596 = arith.addf %595, %594 : vector<2x32xf32>
    %597 = arith.divf %595, %596 : vector<2x32xf32>
    %598 = vector.extract_strided_slice %591 {offsets = [0, 32], sizes = [2, 32], strides = [1, 1]} : vector<2x128xf32> to vector<2x32xf32>
    %599 = arith.negf %598 : vector<2x32xf32>
    %600 = math.exp %599 : vector<2x32xf32>
    %cst_175 = arith.constant 1.000000e+00 : f32
    %601 = vector.broadcast %cst_175 : f32 to vector<2x32xf32>
    %602 = arith.addf %601, %600 : vector<2x32xf32>
    %603 = arith.divf %601, %602 : vector<2x32xf32>
    %604 = vector.extract_strided_slice %591 {offsets = [0, 64], sizes = [2, 32], strides = [1, 1]} : vector<2x128xf32> to vector<2x32xf32>
    %605 = math.tanh %604 : vector<2x32xf32>
    %606 = vector.extract_strided_slice %591 {offsets = [0, 96], sizes = [2, 32], strides = [1, 1]} : vector<2x128xf32> to vector<2x32xf32>
    %607 = arith.negf %606 : vector<2x32xf32>
    %608 = math.exp %607 : vector<2x32xf32>
    %cst_176 = arith.constant 1.000000e+00 : f32
    %609 = vector.broadcast %cst_176 : f32 to vector<2x32xf32>
    %610 = arith.addf %609, %608 : vector<2x32xf32>
    %611 = arith.divf %609, %610 : vector<2x32xf32>
    %612 = arith.mulf %603, %585 : vector<2x32xf32>
    %613 = arith.mulf %597, %605 : vector<2x32xf32>
    %614 = arith.addf %612, %613 : vector<2x32xf32>
    %615 = math.tanh %614 : vector<2x32xf32>
    %616 = arith.mulf %611, %615 : vector<2x32xf32>
    %c6_177 = arith.constant 6 : index
    %c0_178 = arith.constant 0 : index
    %617 = vector.load %arg16[%c6_177, %c0_178] : memref<16x128xf32, #tpu.memory_space<vmem>>, vector<2x128xf32>
    %618 = arith.truncf %616 : vector<2x32xf32> to vector<2x32xbf16>
    %cst_179 = arith.constant dense<0.000000e+00> : vector<2x128xf32>
    %619 = tpu.matmul %618, %529, %cst_179 {dimension_numbers = #tpu.dot_dimension_numbers<[1], [0], [0], [1], [0, 0, 1, 1], [], []>} : vector<2x32xbf16>, vector<32x128xbf16>, vector<2x128xf32> -> vector<2x128xf32>
    %620 = arith.addf %617, %619 : vector<2x128xf32>
    %621 = vector.extract_strided_slice %620 {offsets = [0, 0], sizes = [2, 32], strides = [1, 1]} : vector<2x128xf32> to vector<2x32xf32>
    %622 = arith.negf %621 : vector<2x32xf32>
    %623 = math.exp %622 : vector<2x32xf32>
    %cst_180 = arith.constant 1.000000e+00 : f32
    %624 = vector.broadcast %cst_180 : f32 to vector<2x32xf32>
    %625 = arith.addf %624, %623 : vector<2x32xf32>
    %626 = arith.divf %624, %625 : vector<2x32xf32>
    %627 = vector.extract_strided_slice %620 {offsets = [0, 32], sizes = [2, 32], strides = [1, 1]} : vector<2x128xf32> to vector<2x32xf32>
    %628 = arith.negf %627 : vector<2x32xf32>
    %629 = math.exp %628 : vector<2x32xf32>
    %cst_181 = arith.constant 1.000000e+00 : f32
    %630 = vector.broadcast %cst_181 : f32 to vector<2x32xf32>
    %631 = arith.addf %630, %629 : vector<2x32xf32>
    %632 = arith.divf %630, %631 : vector<2x32xf32>
    %633 = vector.extract_strided_slice %620 {offsets = [0, 64], sizes = [2, 32], strides = [1, 1]} : vector<2x128xf32> to vector<2x32xf32>
    %634 = math.tanh %633 : vector<2x32xf32>
    %635 = vector.extract_strided_slice %620 {offsets = [0, 96], sizes = [2, 32], strides = [1, 1]} : vector<2x128xf32> to vector<2x32xf32>
    %636 = arith.negf %635 : vector<2x32xf32>
    %637 = math.exp %636 : vector<2x32xf32>
    %cst_182 = arith.constant 1.000000e+00 : f32
    %638 = vector.broadcast %cst_182 : f32 to vector<2x32xf32>
    %639 = arith.addf %638, %637 : vector<2x32xf32>
    %640 = arith.divf %638, %639 : vector<2x32xf32>
    %641 = arith.mulf %632, %614 : vector<2x32xf32>
    %642 = arith.mulf %626, %634 : vector<2x32xf32>
    %643 = arith.addf %641, %642 : vector<2x32xf32>
    %644 = math.tanh %643 : vector<2x32xf32>
    %645 = arith.mulf %640, %644 : vector<2x32xf32>
    %c8_183 = arith.constant 8 : index
    %c0_184 = arith.constant 0 : index
    %646 = vector.load %arg16[%c8_183, %c0_184] : memref<16x128xf32, #tpu.memory_space<vmem>>, vector<2x128xf32>
    %647 = arith.truncf %645 : vector<2x32xf32> to vector<2x32xbf16>
    %cst_185 = arith.constant dense<0.000000e+00> : vector<2x128xf32>
    %648 = tpu.matmul %647, %529, %cst_185 {dimension_numbers = #tpu.dot_dimension_numbers<[1], [0], [0], [1], [0, 0, 1, 1], [], []>} : vector<2x32xbf16>, vector<32x128xbf16>, vector<2x128xf32> -> vector<2x128xf32>
    %649 = arith.addf %646, %648 : vector<2x128xf32>
    %650 = vector.extract_strided_slice %649 {offsets = [0, 0], sizes = [2, 32], strides = [1, 1]} : vector<2x128xf32> to vector<2x32xf32>
    %651 = arith.negf %650 : vector<2x32xf32>
    %652 = math.exp %651 : vector<2x32xf32>
    %cst_186 = arith.constant 1.000000e+00 : f32
    %653 = vector.broadcast %cst_186 : f32 to vector<2x32xf32>
    %654 = arith.addf %653, %652 : vector<2x32xf32>
    %655 = arith.divf %653, %654 : vector<2x32xf32>
    %656 = vector.extract_strided_slice %649 {offsets = [0, 32], sizes = [2, 32], strides = [1, 1]} : vector<2x128xf32> to vector<2x32xf32>
    %657 = arith.negf %656 : vector<2x32xf32>
    %658 = math.exp %657 : vector<2x32xf32>
    %cst_187 = arith.constant 1.000000e+00 : f32
    %659 = vector.broadcast %cst_187 : f32 to vector<2x32xf32>
    %660 = arith.addf %659, %658 : vector<2x32xf32>
    %661 = arith.divf %659, %660 : vector<2x32xf32>
    %662 = vector.extract_strided_slice %649 {offsets = [0, 64], sizes = [2, 32], strides = [1, 1]} : vector<2x128xf32> to vector<2x32xf32>
    %663 = math.tanh %662 : vector<2x32xf32>
    %664 = vector.extract_strided_slice %649 {offsets = [0, 96], sizes = [2, 32], strides = [1, 1]} : vector<2x128xf32> to vector<2x32xf32>
    %665 = arith.negf %664 : vector<2x32xf32>
    %666 = math.exp %665 : vector<2x32xf32>
    %cst_188 = arith.constant 1.000000e+00 : f32
    %667 = vector.broadcast %cst_188 : f32 to vector<2x32xf32>
    %668 = arith.addf %667, %666 : vector<2x32xf32>
    %669 = arith.divf %667, %668 : vector<2x32xf32>
    %670 = arith.mulf %661, %643 : vector<2x32xf32>
    %671 = arith.mulf %655, %663 : vector<2x32xf32>
    %672 = arith.addf %670, %671 : vector<2x32xf32>
    %673 = math.tanh %672 : vector<2x32xf32>
    %674 = arith.mulf %669, %673 : vector<2x32xf32>
    %c10_189 = arith.constant 10 : index
    %c0_190 = arith.constant 0 : index
    %675 = vector.load %arg16[%c10_189, %c0_190] : memref<16x128xf32, #tpu.memory_space<vmem>>, vector<2x128xf32>
    %676 = arith.truncf %674 : vector<2x32xf32> to vector<2x32xbf16>
    %cst_191 = arith.constant dense<0.000000e+00> : vector<2x128xf32>
    %677 = tpu.matmul %676, %529, %cst_191 {dimension_numbers = #tpu.dot_dimension_numbers<[1], [0], [0], [1], [0, 0, 1, 1], [], []>} : vector<2x32xbf16>, vector<32x128xbf16>, vector<2x128xf32> -> vector<2x128xf32>
    %678 = arith.addf %675, %677 : vector<2x128xf32>
    %679 = vector.extract_strided_slice %678 {offsets = [0, 0], sizes = [2, 32], strides = [1, 1]} : vector<2x128xf32> to vector<2x32xf32>
    %680 = arith.negf %679 : vector<2x32xf32>
    %681 = math.exp %680 : vector<2x32xf32>
    %cst_192 = arith.constant 1.000000e+00 : f32
    %682 = vector.broadcast %cst_192 : f32 to vector<2x32xf32>
    %683 = arith.addf %682, %681 : vector<2x32xf32>
    %684 = arith.divf %682, %683 : vector<2x32xf32>
    %685 = vector.extract_strided_slice %678 {offsets = [0, 32], sizes = [2, 32], strides = [1, 1]} : vector<2x128xf32> to vector<2x32xf32>
    %686 = arith.negf %685 : vector<2x32xf32>
    %687 = math.exp %686 : vector<2x32xf32>
    %cst_193 = arith.constant 1.000000e+00 : f32
    %688 = vector.broadcast %cst_193 : f32 to vector<2x32xf32>
    %689 = arith.addf %688, %687 : vector<2x32xf32>
    %690 = arith.divf %688, %689 : vector<2x32xf32>
    %691 = vector.extract_strided_slice %678 {offsets = [0, 64], sizes = [2, 32], strides = [1, 1]} : vector<2x128xf32> to vector<2x32xf32>
    %692 = math.tanh %691 : vector<2x32xf32>
    %693 = vector.extract_strided_slice %678 {offsets = [0, 96], sizes = [2, 32], strides = [1, 1]} : vector<2x128xf32> to vector<2x32xf32>
    %694 = arith.negf %693 : vector<2x32xf32>
    %695 = math.exp %694 : vector<2x32xf32>
    %cst_194 = arith.constant 1.000000e+00 : f32
    %696 = vector.broadcast %cst_194 : f32 to vector<2x32xf32>
    %697 = arith.addf %696, %695 : vector<2x32xf32>
    %698 = arith.divf %696, %697 : vector<2x32xf32>
    %699 = arith.mulf %690, %672 : vector<2x32xf32>
    %700 = arith.mulf %684, %692 : vector<2x32xf32>
    %701 = arith.addf %699, %700 : vector<2x32xf32>
    %702 = math.tanh %701 : vector<2x32xf32>
    %703 = arith.mulf %698, %702 : vector<2x32xf32>
    %c12_195 = arith.constant 12 : index
    %c0_196 = arith.constant 0 : index
    %704 = vector.load %arg16[%c12_195, %c0_196] : memref<16x128xf32, #tpu.memory_space<vmem>>, vector<2x128xf32>
    %705 = arith.truncf %703 : vector<2x32xf32> to vector<2x32xbf16>
    %cst_197 = arith.constant dense<0.000000e+00> : vector<2x128xf32>
    %706 = tpu.matmul %705, %529, %cst_197 {dimension_numbers = #tpu.dot_dimension_numbers<[1], [0], [0], [1], [0, 0, 1, 1], [], []>} : vector<2x32xbf16>, vector<32x128xbf16>, vector<2x128xf32> -> vector<2x128xf32>
    %707 = arith.addf %704, %706 : vector<2x128xf32>
    %708 = vector.extract_strided_slice %707 {offsets = [0, 0], sizes = [2, 32], strides = [1, 1]} : vector<2x128xf32> to vector<2x32xf32>
    %709 = arith.negf %708 : vector<2x32xf32>
    %710 = math.exp %709 : vector<2x32xf32>
    %cst_198 = arith.constant 1.000000e+00 : f32
    %711 = vector.broadcast %cst_198 : f32 to vector<2x32xf32>
    %712 = arith.addf %711, %710 : vector<2x32xf32>
    %713 = arith.divf %711, %712 : vector<2x32xf32>
    %714 = vector.extract_strided_slice %707 {offsets = [0, 32], sizes = [2, 32], strides = [1, 1]} : vector<2x128xf32> to vector<2x32xf32>
    %715 = arith.negf %714 : vector<2x32xf32>
    %716 = math.exp %715 : vector<2x32xf32>
    %cst_199 = arith.constant 1.000000e+00 : f32
    %717 = vector.broadcast %cst_199 : f32 to vector<2x32xf32>
    %718 = arith.addf %717, %716 : vector<2x32xf32>
    %719 = arith.divf %717, %718 : vector<2x32xf32>
    %720 = vector.extract_strided_slice %707 {offsets = [0, 64], sizes = [2, 32], strides = [1, 1]} : vector<2x128xf32> to vector<2x32xf32>
    %721 = math.tanh %720 : vector<2x32xf32>
    %722 = vector.extract_strided_slice %707 {offsets = [0, 96], sizes = [2, 32], strides = [1, 1]} : vector<2x128xf32> to vector<2x32xf32>
    %723 = arith.negf %722 : vector<2x32xf32>
    %724 = math.exp %723 : vector<2x32xf32>
    %cst_200 = arith.constant 1.000000e+00 : f32
    %725 = vector.broadcast %cst_200 : f32 to vector<2x32xf32>
    %726 = arith.addf %725, %724 : vector<2x32xf32>
    %727 = arith.divf %725, %726 : vector<2x32xf32>
    %728 = arith.mulf %719, %701 : vector<2x32xf32>
    %729 = arith.mulf %713, %721 : vector<2x32xf32>
    %730 = arith.addf %728, %729 : vector<2x32xf32>
    %731 = math.tanh %730 : vector<2x32xf32>
    %732 = arith.mulf %727, %731 : vector<2x32xf32>
    %c14_201 = arith.constant 14 : index
    %c0_202 = arith.constant 0 : index
    %733 = vector.load %arg16[%c14_201, %c0_202] : memref<16x128xf32, #tpu.memory_space<vmem>>, vector<2x128xf32>
    %734 = arith.truncf %732 : vector<2x32xf32> to vector<2x32xbf16>
    %cst_203 = arith.constant dense<0.000000e+00> : vector<2x128xf32>
    %735 = tpu.matmul %734, %529, %cst_203 {dimension_numbers = #tpu.dot_dimension_numbers<[1], [0], [0], [1], [0, 0, 1, 1], [], []>} : vector<2x32xbf16>, vector<32x128xbf16>, vector<2x128xf32> -> vector<2x128xf32>
    %736 = arith.addf %733, %735 : vector<2x128xf32>
    %737 = vector.extract_strided_slice %736 {offsets = [0, 0], sizes = [2, 32], strides = [1, 1]} : vector<2x128xf32> to vector<2x32xf32>
    %738 = arith.negf %737 : vector<2x32xf32>
    %739 = math.exp %738 : vector<2x32xf32>
    %cst_204 = arith.constant 1.000000e+00 : f32
    %740 = vector.broadcast %cst_204 : f32 to vector<2x32xf32>
    %741 = arith.addf %740, %739 : vector<2x32xf32>
    %742 = arith.divf %740, %741 : vector<2x32xf32>
    %743 = vector.extract_strided_slice %736 {offsets = [0, 32], sizes = [2, 32], strides = [1, 1]} : vector<2x128xf32> to vector<2x32xf32>
    %744 = arith.negf %743 : vector<2x32xf32>
    %745 = math.exp %744 : vector<2x32xf32>
    %cst_205 = arith.constant 1.000000e+00 : f32
    %746 = vector.broadcast %cst_205 : f32 to vector<2x32xf32>
    %747 = arith.addf %746, %745 : vector<2x32xf32>
    %748 = arith.divf %746, %747 : vector<2x32xf32>
    %749 = vector.extract_strided_slice %736 {offsets = [0, 64], sizes = [2, 32], strides = [1, 1]} : vector<2x128xf32> to vector<2x32xf32>
    %750 = math.tanh %749 : vector<2x32xf32>
    %751 = vector.extract_strided_slice %736 {offsets = [0, 96], sizes = [2, 32], strides = [1, 1]} : vector<2x128xf32> to vector<2x32xf32>
    %752 = arith.negf %751 : vector<2x32xf32>
    %753 = math.exp %752 : vector<2x32xf32>
    %cst_206 = arith.constant 1.000000e+00 : f32
    %754 = vector.broadcast %cst_206 : f32 to vector<2x32xf32>
    %755 = arith.addf %754, %753 : vector<2x32xf32>
    %756 = arith.divf %754, %755 : vector<2x32xf32>
    %757 = arith.mulf %748, %730 : vector<2x32xf32>
    %758 = arith.mulf %742, %750 : vector<2x32xf32>
    %759 = arith.addf %757, %758 : vector<2x32xf32>
    %760 = math.tanh %759 : vector<2x32xf32>
    %761 = arith.mulf %756, %760 : vector<2x32xf32>
    %762 = tpu.concatenate %761, %520 in 1 : vector<2x32xf32>, vector<2x32xf32> -> vector<2x64xf32>
    %c0_207 = arith.constant 0 : index
    %c0_208 = arith.constant 0 : index
    %763 = vector.load %arg13[%c0_207, %c0_208] : memref<64x4xf32, #tpu.memory_space<vmem>>, vector<64x4xf32>
    %cst_209 = arith.constant dense<0.000000e+00> : vector<2x4xf32>
    %764 = tpu.matmul %762, %763, %cst_209 {dimension_numbers = #tpu.dot_dimension_numbers<[1], [0], [0], [1], [0, 0, 1, 1], [], []>} : vector<2x64xf32>, vector<64x4xf32>, vector<2x4xf32> -> vector<2x4xf32>
    %c0_210 = arith.constant 0 : index
    %c0_211 = arith.constant 0 : index
    %765 = vector.load %arg14[%c0_210, %c0_211] : memref<1x4xf32, #tpu.memory_space<vmem>>, vector<1x4xf32>
    %766 = vector.broadcast %765 : vector<1x4xf32> to vector<2x4xf32>
    %767 = arith.addf %764, %766 : vector<2x4xf32>
    %c0_212 = arith.constant 0 : index
    %c0_213 = arith.constant 0 : index
    %768 = vector.load %arg15[%c0_212, %c0_213] : memref<2x4xf32, #tpu.memory_space<vmem>>, vector<2x4xf32>
    tpu.vector_store %arg15[%c0_212, %c0_213], %767 {strides = array<i32>} : memref<2x4xf32, #tpu.memory_space<vmem>>, vector<2x4xf32>,
    return
  }
}

</mosaic_0001>

<bundles_post_ra>
// kernel: tpu_custom_call.1
= control target key start
LH: loop header
LB: loop body
LE: loop exit
PB: predicated region body
PF: predicated region fallthrough
CT: control target
= control target key end

     0   :  { %20 = vsyncpa [#allocation6], 0  ;;  %s3987_s0 = inlined_call_operand.hbm [shape: bf16[16,32], index: 0, kind: input, shape index: {}]   ;;  %s3988_s1 = inlined_call_operand.hbm [shape: bf16[16,32], index: 1, kind: input, shape index: {}]   ;;  %s3989_s2 = inlined_call_operand.hbm [shape: bf16[32,128], index: 2, kind: input, shape index: {}]   ;;  %s3990_s3 = inlined_call_operand.hbm [shape: bf16[32,128], index: 3, kind: input, shape index: {}]   ;;  %s3991_s4 = inlined_call_operand.vmem [shape: bf16[32,128], index: 4, kind: input, shape index: {}]   ;;  %s3992_s5 = inlined_call_operand.hbm [shape: bf16[32,128], index: 5, kind: input, shape index: {}]   ;;  %s3993_s6 = inlined_call_operand.vmem [shape: f32[1,128], index: 6, kind: input, shape index: {}]   ;;  %s3994_s7 = inlined_call_operand.vmem [shape: f32[1,128], index: 7, kind: input, shape index: {}]   ;;  %s3995_s8 = inlined_call_operand.vmem [shape: bf16[64,128], index: 8, kind: input, shape index: {}]   ;;  %s3996_s9 = inlined_call_operand.vmem [shape: bf16[32,128], index: 9, kind: input, shape index: {}]   ;;  %s3997_s10 = inlined_call_operand.vmem [shape: f32[1,128], index: 10, kind: input, shape index: {}]   ;;  %s3998_s11 = inlined_call_operand.vmem [shape: bf16[64,128], index: 11, kind: input, shape index: {}]   ;;  %s3999_s12 = inlined_call_operand.vmem [shape: f32[1,128], index: 12, kind: input, shape index: {}]   ;;  %s4000_s13 = inlined_call_operand.vmem [shape: f32[64,4], index: 13, kind: input, shape index: {}]   ;;  %s4001_s14 = inlined_call_operand.vmem [shape: f32[1,4], index: 14, kind: input, shape index: {}]   ;;  %s4002_s15 = inlined_call_operand.hbm [shape: f32[2,4], index: 15, kind: output, shape index: {}]  }
   0x1   :  { %21 = vsyncpa [#allocation9], 0 }
   0x2   :  { %22 = vsyncpa [#allocation12], 0 }
   0x3   :  { %23 = vsyncpa [#allocation7], 0  ;;  %s3254_s18 = smov [#allocation8]   ;;  %s3255_s20 = smov [#allocation11]  }
   0x4   :  { %s41_s19 = sshll.u32 %s3254_s18, 4  ;;  %s65_s21 = sshll.u32 %s3255_s20, 4  ;;  %s42_s19 = int_to_ptr.vmem [resolvable:$true] %s41_s19  ;;  %s3348_s21 = int_to_ptr.vmem [resolvable:$true] %s65_s21 }
   0x5   :  { %s3114_s24 = scalar_lea.hbm %s3988_s1, 128 }
   0x6   :  { %p3115_p0 = scmp.ne.s32.totalorder %s3988_s1, %s3114_s24  ;;  %p3118_p1 = scmp.lt.u32.totalorder %s3114_s24, %s3988_s1 }
   0x8   :  { %p3120_p2 = pnand %p3118_p1, %p3115_p0 }
   0xa   :  { %3123 = shalt.err (!%p3120_p2)
}
   0xb   :  { %s3124_s29 = scalar_lea.vmem %s42_s19, 128  ;;  %p3129_p4 = scmp.lt.s32.totalorder %s42_s19, %s42_s19 }
   0xc   :  { %p3125_p3 = scmp.ne.s32.totalorder %s42_s19, %s3124_s29  ;;  %p3130_p5 = scmp.lt.s32.totalorder %s3124_s29, %s3124_s29 }
   0xe   :  { %p3131_p6 = por %p3130_p5, %p3129_p4 }
  0x10   :  { %p3132_p7 = pnand %p3131_p6, %p3125_p3 }
  0x12   :  { %3135 = shalt.err (!%p3132_p7)
}
  0x13   :  { %s3256_s30 = smov 64   ;;  %s3257_s16 = smov 4  }
  0x14   :  { %47 = dma.hbm_to_vmem [thread:$0]  %s3988_s1, 128, %s42_s19, [#allocation9], %s3256_s30, %s3256_s30, %s3257_s16  }
  0x15   :  { %s3136_s23 = scalar_lea.hbm %s3990_s3, 256 }
  0x16   :  { %p3137_p8 = scmp.ne.s32.totalorder %s3990_s3, %s3136_s23  ;;  %p3140_p9 = scmp.lt.u32.totalorder %s3136_s23, %s3990_s3 }
  0x18   :  { %p3142_p10 = pnand %p3140_p9, %p3137_p8 }
  0x1a   :  { %3145 = shalt.err (!%p3142_p10)
}
  0x1b   :  { %s3146_s28 = scalar_lea.vmem %s3348_s21, 256  ;;  %p3151_p12 = scmp.lt.s32.totalorder %s3348_s21, %s3348_s21 }
  0x1c   :  { %p3147_p11 = scmp.ne.s32.totalorder %s3348_s21, %s3146_s28  ;;  %p3152_p13 = scmp.lt.s32.totalorder %s3146_s28, %s3146_s28 }
  0x1e   :  { %p3153_p0 = por %p3152_p13, %p3151_p12 }
  0x20   :  { %p3154_p1 = pnand %p3153_p0, %p3147_p11 }
  0x22   :  { %3157 = shalt.err (!%p3154_p1)
}
  0x23   :  { %71 = dma.hbm_to_vmem [thread:$0]  %s3990_s3, 256, %s3348_s21, [#allocation12], %s3256_s30, %s3256_s30, %s3257_s16  }
  0x24   :  { %s3258_s29 = smov [#allocation5]   ;;  %s3259_s18 = smov [#allocation10]  }
  0x25   :  { %s29_s17 = sshll.u32 %s3258_s29, 4  ;;  %s53_s20 = sshll.u32 %s3259_s18, 4  ;;  %s30_s17 = int_to_ptr.vmem [resolvable:$true] %s29_s17  ;;  %s3385_s20 = int_to_ptr.vmem [resolvable:$true] %s53_s20 }
  0x26   :  { %s3158_s24 = scalar_lea.hbm %s3987_s0, 128 }
  0x27   :  { %p3159_p2 = scmp.ne.s32.totalorder %s3987_s0, %s3158_s24  ;;  %p3162_p3 = scmp.lt.u32.totalorder %s3158_s24, %s3987_s0 }
  0x29   :  { %p3164_p4 = pnand %p3162_p3, %p3159_p2 }
  0x2b   :  { %3167 = shalt.err (!%p3164_p4)
}
  0x2c   :  { %s3168_s3 = scalar_lea.vmem %s30_s17, 128  ;;  %p3173_p6 = scmp.lt.s32.totalorder %s30_s17, %s30_s17 }
  0x2d   :  { %p3169_p5 = scmp.ne.s32.totalorder %s30_s17, %s3168_s3  ;;  %p3174_p7 = scmp.lt.s32.totalorder %s3168_s3, %s3168_s3 }
  0x2f   :  { %p3175_p8 = por %p3174_p7, %p3173_p6 }
  0x31   :  { %p3176_p9 = pnand %p3175_p8, %p3169_p5 }
  0x33   :  { %3179 = shalt.err (!%p3176_p9)
}
  0x34   :  { %35 = dma.hbm_to_vmem [thread:$0]  %s3987_s0, 128, %s30_s17, [#allocation6], %s3256_s30, %s3256_s30, %s3257_s16  }
  0x35   :  { %s3180_s18 = scalar_lea.hbm %s3989_s2, 256 }
  0x36   :  { %p3181_p10 = scmp.ne.s32.totalorder %s3989_s2, %s3180_s18  ;;  %p3184_p11 = scmp.lt.u32.totalorder %s3180_s18, %s3989_s2 }
  0x38   :  { %p3186_p12 = pnand %p3184_p11, %p3181_p10 }
  0x3a   :  { %3189 = shalt.err (!%p3186_p12)
}
  0x3b   :  { %s3190_s26 = scalar_lea.vmem %s3385_s20, 256  ;;  %p3195_p0 = scmp.lt.s32.totalorder %s3385_s20, %s3385_s20 }
  0x3c   :  { %p3191_p13 = scmp.ne.s32.totalorder %s3385_s20, %s3190_s26  ;;  %p3196_p1 = scmp.lt.s32.totalorder %s3190_s26, %s3190_s26 }
  0x3e   :  { %p3197_p2 = por %p3196_p1, %p3195_p0 }
  0x40   :  { %p3198_p3 = pnand %p3197_p2, %p3191_p13 }
  0x42   :  { %3201 = shalt.err (!%p3198_p3)
}
  0x43   :  { %59 = dma.hbm_to_vmem [thread:$0]  %s3989_s2, 256, %s3385_s20, [#allocation9], %s3256_s30, %s3256_s30, %s3257_s16  }
  0x44   :  { %s3260_s27 = smov [#allocation13]   ;;  %s3202_s1 = scalar_lea.hbm %s3992_s5, 256 }
  0x45   :  { %s79_s28 = sshll.u32 %s3260_s27, 4  ;;  %p3203_p4 = scmp.ne.s32.totalorder %s3992_s5, %s3202_s1  ;;  %s80_s28 = int_to_ptr.vmem [resolvable:$true] %s79_s28 }
  0x46   :  { %p3206_p5 = scmp.lt.u32.totalorder %s3202_s1, %s3992_s5 }
  0x48   :  { %p3208_p6 = pnand %p3206_p5, %p3203_p4 }
  0x4a   :  { %3211 = shalt.err (!%p3208_p6)
}
  0x4b   :  { %s3212_s23 = scalar_lea.vmem %s80_s28, 256  ;;  %p3217_p8 = scmp.lt.s32.totalorder %s80_s28, %s80_s28 }
  0x4c   :  { %p3213_p7 = scmp.ne.s32.totalorder %s80_s28, %s3212_s23  ;;  %p3218_p9 = scmp.lt.s32.totalorder %s3212_s23, %s3212_s23 }
  0x4e   :  { %p3219_p10 = por %p3218_p9, %p3217_p8 }
  0x50   :  { %p3220_p11 = pnand %p3219_p10, %p3213_p7 }
  0x52   :  { %3223 = shalt.err (!%p3220_p11)
}
  0x53   :  { %85 = dma.hbm_to_vmem [thread:$0]  %s3992_s5, 256, %s80_s28, [#allocation12], %s3256_s30, %s3256_s30, %s3257_s16  }
  0x54   :  { %3246 = dma.done.wait [#allocation6], 128  }
  0x55   :  { %3247 = vsyncadd [#allocation6], 4294967168 }
  0x56   :  { %3248 = dma.done.wait [#allocation9], 384  }
  0x57   :  { %3249 = vsyncadd [#allocation9], 4294966912 }
  0x58   :  { %3250 = dma.done.wait [#allocation12], 512  }
  0x59   :  { %3251 = vsyncadd [#allocation12], 4294966784  ;;  %v3261_v0 = vmov 0.0   ;;  %vm3262_vm0 = vmmov 0   ;;  %v2894_v1 = vld [vmem:[#allocation10] sm:$0xff]   ;;  %v2895_v2 = vld [vmem:[#allocation10 + $0x8] sm:$0xff]  }
  0x5a   :  { %2617 = vmatprep.subr.bf16.mxu1 %v3261_v0  ;;  %2621 = vmatprep.mubr.msk.bf16.mxu1 %vm3262_vm0, %v3261_v0  ;;  %v3447_v3 = vld [vmem:[%s3991_s4] sm:$0xff]   ;;  %v2896_v4 = vld [vmem:[#allocation5] sm:$0xff]   ;;  %vm150_vm1 = vcmask 261120   ;;  %v3455_v6 = vld [vmem:[%s3991_s4 + $0x8] sm:$0xff]   ;;  %v3263_v10 = vmov 0   ;;  %vm444_vm2 = vcmask 254976  }
  0x5b   :  { %2633 = vmatprep.subr.bf16.mxu0 %v3261_v0  ;;  %2637 = vmatprep.mubr.msk.bf16.mxu0 %vm3262_vm0, %v3261_v0  ;;  %v2897_v5 = vld [vmem:[#allocation11] sm:$0xff]   ;;  %v2899_v7 = vld [vmem:[#allocation11 + $0x8] sm:$0xff]   ;;  %v3462_v9 = vld [vmem:[#allocation13] sm:$0xff]   ;;  %vm450_vm3 = vcmask 517376   ;;  %vm1585_vm4 = vcmask 523264   ;;  %vm2425_vm5 = vcmask 25600  }
  0x5c   :  { %2618 = vmatpush3.bf16.msra.mxu1 %v2894_v1  ;;  %2634 = vmatpush3.bf16.msra.mxu0 %v3447_v3  ;;  %v2901_v8 = vld [vmem:[#allocation8] sm:$0xff]   ;;  %v3473_v11 = vld [vmem:[#allocation13 + $0x8] sm:$0xff]   ;;  %v2444_v12 = vld [vmem:[%s3993_s6] ss:$0 sm:$0xff]  ;;  %s3264_s6 = smov 32  }
  0x5d   :  { %2619 = vmatprep.subr.bf16.mxu1 %v3261_v0  ;;  %2635 = vmatprep.subr.bf16.mxu0 %v3261_v0  ;;  %v2449_v20 = vld [vmem:[%s3994_s7] ss:$0 sm:$0xff] }
  0x60   :  { %2620 = vmatpush3.bf16.msra.mxu1 %v2895_v2  ;;  %2636 = vmatpush3.bf16.msra.mxu0 %v3455_v6 }
  0x61   :  { %2625 = vmatprep.subr.bf16.mxu1 %v3261_v0  ;;  %2649 = vmatprep.subr.bf16.mxu0 %v3261_v0 }
  0x63   :  { %2622 = vmatmul.mubr.msk.bf16.vlgmr.msra.gmra.mrb[0].mxu1 %vm150_vm1, %v2896_v4  ;;  %2638 = vmatmul.mubr.bf16.vlgmr.msra.gmra.mrb[0].mxu0 %v3263_v10 }
  0x64   :  { %2626 = vmatpush3.bf16.msra.mxu1 %v2897_v5  ;;  %2629 = vmatprep.mubr.msk.bf16.mxu1 %vm3262_vm0, %v3261_v0 }
  0x65   :  { %2627 = vmatprep.subr.bf16.mxu1 %v3261_v0  ;;  %2650 = vmatpush3.bf16.msra.mxu0 %v3447_v3 }
  0x66   :  { %2651 = vmatprep.subr.bf16.mxu0 %v3261_v0  ;;  %2653 = vmatprep.mubr.msk.bf16.mxu0 %vm3262_vm0, %v3261_v0 }
  0x68   :  { %2628 = vmatpush3.bf16.msra.mxu1 %v2899_v7 }
  0x69   :  { %2641 = vmatprep.subr.bf16.mxu1 %v3261_v0  ;;  %2652 = vmatpush3.bf16.msra.mxu0 %v3455_v6 }
  0x6a   :  { %2665 = vmatprep.subr.bf16.mxu0 %v3261_v0 }
  0x6b   :  { %2630 = vmatmul.mubr.msk.bf16.vlgmr.msra.gmra.mrb[4].mxu1 %vm150_vm1, %v2901_v8 }
  0x6c   :  { %2642 = vmatpush3.bf16.msra.mxu1 %v3462_v9  ;;  %2645 = vmatprep.mubr.msk.bf16.mxu1 %vm3262_vm0, %v3261_v0 }
  0x6d   :  { %2643 = vmatprep.subr.bf16.mxu1 %v3261_v0 }
  0x70   :  { %2644 = vmatpush3.bf16.msra.mxu1 %v3473_v11 }
  0x71   :  { %2657 = vmatprep.subr.bf16.mxu1 %v3261_v0 }
  0x73   :  { %2646 = vmatmul.mubr.bf16.vlgmr.msra.gmra.mrb[8].mxu1 %v3263_v10 }
  0x74   :  { %2658 = vmatpush3.bf16.msra.mxu1 %v3462_v9  ;;  %2661 = vmatprep.mubr.msk.bf16.mxu1 %vm3262_vm0, %v3261_v0 }
  0x75   :  { %2659 = vmatprep.subr.bf16.mxu1 %v3261_v0 }
  0x78   :  { %2660 = vmatpush3.bf16.msra.mxu1 %v3473_v11 }
  0x79   :  { %2673 = vmatprep.subr.bf16.mxu1 %v3261_v0 }
 0x136   :  { %v188_v13 = vpop.f32.mrb[0].mxu1  ;;  %v331_v19 = vpop.f32.mrb[0].mxu0 }
 0x137   :  { %v189_v14 = vadd.f32 %v2444_v12, %v188_v13  ;;  %v2623_v15 = vpop.f32.mrb[1].mxu1  ;;  %v2639_v21 = vpop.f32.mrb[1].mxu0 }
 0x138   :  { %v191_v16 = vpop.f32.mrb[2].mxu1  ;;  %v334_v22 = vpop.f32.mrb[2].mxu0 }
 0x139   :  { %195 = vst [vmem:[#allocation2] sm:$0xff] %v189_v14  ;;  %v192_v17 = vadd.f32 %v2444_v12, %v191_v16  ;;  %v2624_v18 = vpop.f32.mrb[3].mxu1  ;;  %v2640_v24 = vpop.f32.mrb[3].mxu0 }
 0x13b   :  { %196 = vst [vmem:[#allocation2 + $0x8] sm:$0xff] %v192_v17 }
 0x13e   :  { %v264_v23 = vpop.f32.mrb[4].mxu1 }
 0x13f   :  { %v265_v25 = vadd.f32 %v2449_v20, %v264_v23  ;;  %v2631_v26 = vpop.f32.mrb[5].mxu1 }
 0x140   :  { %v267_v27 = vpop.f32.mrb[6].mxu1  ;;  %v281_v28 = vld [vmem:[#allocation2] sm:$0x3]  ;;  %v452_v7 = vld [vmem:[#allocation2 + $0x2] sm:$0x3] }
 0x141   :  { %271 = vst [vmem:[#allocation3] sm:$0xff] %v265_v25  ;;  %v268_v29 = vadd.f32 %v2449_v20, %v267_v27  ;;  %v337_v30 = vadd.f32 %v331_v19, %v281_v28  ;;  %v2632_v31 = vpop.f32.mrb[7].mxu1 }
 0x143   :  { %272 = vst [vmem:[#allocation3 + $0x8] sm:$0xff] %v268_v29  ;;  %2914 = vtanh.f32 %v337_v30  ;;  %v2458_v40 = vmul.f32 -1.442695, %v337_v30 }
 0x146   :  { %v385_v32 = vpop.f32.mrb[8].mxu1 }
 0x147   :  { %v2647_v33 = vpop.f32.mrb[9].mxu1 }
 0x148   :  { %v338_v34 = vld [vmem:[#allocation3] sm:$0x3]  ;;  %v388_v35 = vpop.f32.mrb[10].mxu1  ;;  %v501_v16 = vld [vmem:[#allocation3 + $0x2] sm:$0x3] }
 0x149   :  { %v391_v36 = vadd.f32 %v385_v32, %v338_v34  ;;  %v2648_v37 = vpop.f32.mrb[11].mxu1 }
 0x14b   :  { %2916 = vtanh.f32 %v391_v36  ;;  %v2459_v41 = vmul.f32 -1.442695, %v391_v36 }
 0x14c   :  { %2918 = vpow2.f32 %v2458_v40 }
 0x14d   :  { %v2915_v38 = vpop.eup %2914  ;;  %2920 = vpow2.f32 %v2459_v41 }
 0x14e   :  { %401 = vrot.lane.b32.xlu0 %v2915_v38, %s3256_s30 }
 0x155   :  { %v2917_v39 = vpop.eup %2916 }
 0x156   :  { %425 = vrot.lane.b32.xlu0 %v2917_v39, %s3256_s30  ;;  %v2919_v42 = vpop.eup %2918 }
 0x157   :  { %v395_v43 = vadd.f32 1.0, %v2919_v42  ;;  %v2921_v44 = vpop.eup %2920 }
 0x158   :  { %v419_v45 = vadd.f32 1.0, %v2921_v44 }
 0x159   :  { %2922 = vrcp.f32 %v395_v43 }
 0x15a   :  { %2924 = vrcp.f32 %v419_v45 }
 0x163   :  { %v2923_v46 = vpop.eup %2922 }
 0x164   :  { %v2925_v49 = vpop.eup %2924  ;;  %v399_v52 = vmul.f32 0.0, %v2923_v46 }
 0x165   :  { %v423_v55 = vmul.f32 0.0, %v2925_v49 }
 0x1c0   :  { %v402_v47 = vpop.permute.xlu0 %401 }
 0x1c1   :  { %v404_v48 = vmul.f32 %v2923_v46, %v402_v47 }
 0x1c3   :  { %406 = vrot.lane.b32.xlu1 %v404_v48, %s3264_s6 }
 0x1c8   :  { %v426_v50 = vpop.permute.xlu0 %425 }
 0x1c9   :  { %v428_v51 = vmul.f32 %v2925_v49, %v426_v50 }
 0x1cb   :  { %430 = vrot.lane.b32.xlu1 %v428_v51, %s3264_s6 }
 0x235   :  { %v407_v53 = vpop.permute.xlu1 %406 }
 0x236   :  { %v3499_v54 = vadd.f32 %v407_v53, %v399_v52  ;;  %v608_v52 = vld [vmem:[#allocation2 + $0x4] sm:$0x3] }
 0x238   :  { %2926 = vtanh.f32 %v3499_v54 }
 0x23d   :  { %v431_v56 = vpop.permute.xlu1 %430 }
 0x23e   :  { %v3502_v57 = vadd.f32 %v431_v56, %v423_v55 }
 0x240   :  { %2928 = vtanh.f32 %v3502_v57 }
 0x242   :  { %v2927_v58 = vpop.eup %2926 }
 0x243   :  { %412 = vrot.lane.b32.xlu0 %v2927_v58, %s3256_s30  ;;  %v657_v58 = vld [vmem:[#allocation3 + $0x4] sm:$0x3] }
 0x24a   :  { %v2929_v59 = vpop.eup %2928 }
 0x24b   :  { %436 = vrot.lane.b32.xlu1 %v2929_v59, %s3256_s30 }
 0x2b5   :  { %v413_v60 = vpop.permute.xlu0 %412 }
 0x2b6   :  { %v3507_v61 = vmul.f32 %v2923_v46, %v413_v60 }
 0x2b8   :  { %v453_v62 = vpack.c.bf16 %v3507_v61, %v3507_v61 }
 0x2ba   :  { %455 = vrot.lane.b32.xlu0 %v453_v62, %s3264_s6 }
 0x2bd   :  { %v437_v63 = vpop.permute.xlu1 %436 }
 0x2be   :  { %v3512_v1 = vmul.f32 %v2925_v49, %v437_v63 }
 0x2c0   :  { %v502_v2 = vpack.c.bf16 %v3512_v1, %v3512_v1 }
 0x2c2   :  { %504 = vrot.lane.b32.xlu1 %v502_v2, %s3264_s6 }
 0x32c   :  { %v456_v4 = vpop.permute.xlu0 %455 }
 0x32d   :  { %2654 = vmatmul.mubr.msk.bf16.vlgmr.msra.gmra.mrb[4].mxu0 %vm150_vm1, %v456_v4 }
 0x32e   :  { %2666 = vmatpush3.bf16.msra.mxu0 %v3447_v3  ;;  %2669 = vmatprep.mubr.msk.bf16.mxu0 %vm3262_vm0, %v3261_v0 }
 0x32f   :  { %2667 = vmatprep.subr.bf16.mxu0 %v3261_v0 }
 0x332   :  { %2668 = vmatpush3.bf16.msra.mxu0 %v3455_v6 }
 0x333   :  { %2681 = vmatprep.subr.bf16.mxu0 %v3261_v0 }
 0x334   :  { %v505_v5 = vpop.permute.xlu1 %504 }
 0x335   :  { %2662 = vmatmul.mubr.msk.bf16.vlgmr.msra.gmra.mrb[12].mxu1 %vm150_vm1, %v505_v5 }
 0x336   :  { %2674 = vmatpush3.bf16.msra.mxu1 %v3462_v9  ;;  %2677 = vmatprep.mubr.msk.bf16.mxu1 %vm3262_vm0, %v3261_v0 }
 0x337   :  { %2675 = vmatprep.subr.bf16.mxu1 %v3261_v0 }
 0x33a   :  { %2676 = vmatpush3.bf16.msra.mxu1 %v3473_v11 }
 0x33b   :  { %2689 = vmatprep.subr.bf16.mxu1 %v3261_v0 }
 0x400   :  { %v494_v8 = vpop.f32.mrb[4].mxu0 }
 0x401   :  { %v500_v12 = vadd.f32 %v494_v8, %v452_v7  ;;  %v2655_v13 = vpop.f32.mrb[5].mxu0 }
 0x402   :  { %v497_v14 = vpop.f32.mrb[6].mxu0 }
 0x403   :  { %2930 = vtanh.f32 %v500_v12  ;;  %v2656_v15 = vpop.f32.mrb[7].mxu0  ;;  %v2462_v24 = vmul.f32 -1.442695, %v500_v12 }
 0x408   :  { %v543_v17 = vpop.f32.mrb[12].mxu1 }
 0x409   :  { %v549_v18 = vadd.f32 %v543_v17, %v501_v16  ;;  %v2663_v19 = vpop.f32.mrb[13].mxu1 }
 0x40a   :  { %v546_v20 = vpop.f32.mrb[14].mxu1 }
 0x40b   :  { %2932 = vtanh.f32 %v549_v18  ;;  %v2664_v21 = vpop.f32.mrb[15].mxu1  ;;  %v2463_v25 = vmul.f32 -1.442695, %v549_v18 }
 0x40c   :  { %2934 = vpow2.f32 %v2462_v24 }
 0x40d   :  { %v2931_v22 = vpop.eup %2930  ;;  %2936 = vpow2.f32 %v2463_v25 }
 0x40e   :  { %559 = vrot.lane.b32.xlu0 %v2931_v22, %s3256_s30 }
 0x415   :  { %v2933_v23 = vpop.eup %2932 }
 0x416   :  { %583 = vrot.lane.b32.xlu1 %v2933_v23, %s3256_s30  ;;  %v2935_v26 = vpop.eup %2934 }
 0x417   :  { %v553_v27 = vadd.f32 1.0, %v2935_v26  ;;  %v2937_v28 = vpop.eup %2936 }
 0x418   :  { %v577_v29 = vadd.f32 1.0, %v2937_v28 }
 0x419   :  { %2938 = vrcp.f32 %v553_v27 }
 0x41a   :  { %2940 = vrcp.f32 %v577_v29 }
 0x423   :  { %v2939_v30 = vpop.eup %2938 }
 0x424   :  { %v2941_v33 = vpop.eup %2940  ;;  %v557_v36 = vmul.f32 %v2939_v30, %v3499_v54 }
 0x425   :  { %v581_v39 = vmul.f32 %v2941_v33, %v3502_v57 }
 0x480   :  { %v560_v31 = vpop.permute.xlu0 %559 }
 0x481   :  { %v562_v32 = vmul.f32 %v2939_v30, %v560_v31 }
 0x483   :  { %564 = vrot.lane.b32.xlu0 %v562_v32, %s3264_s6 }
 0x488   :  { %v584_v34 = vpop.permute.xlu1 %583 }
 0x489   :  { %v586_v35 = vmul.f32 %v2941_v33, %v584_v34 }
 0x48b   :  { %588 = vrot.lane.b32.xlu1 %v586_v35, %s3264_s6 }
 0x4f5   :  { %v565_v37 = vpop.permute.xlu0 %564 }
 0x4f6   :  { %v3536_v38 = vadd.f32 %v565_v37, %v557_v36 }
 0x4f8   :  { %2942 = vtanh.f32 %v3536_v38 }
 0x4fd   :  { %v589_v40 = vpop.permute.xlu1 %588 }
 0x4fe   :  { %v3540_v41 = vadd.f32 %v589_v40, %v581_v39 }
 0x500   :  { %2944 = vtanh.f32 %v3540_v41 }
 0x502   :  { %v2943_v42 = vpop.eup %2942 }
 0x503   :  { %570 = vrot.lane.b32.xlu0 %v2943_v42, %s3256_s30 }
 0x50a   :  { %v2945_v43 = vpop.eup %2944 }
 0x50b   :  { %594 = vrot.lane.b32.xlu1 %v2945_v43, %s3256_s30 }
 0x575   :  { %v571_v44 = vpop.permute.xlu0 %570 }
 0x576   :  { %v3545_v45 = vmul.f32 %v2939_v30, %v571_v44  ;;  %v813_v44 = vld [vmem:[#allocation3 + $0x6] sm:$0x3] }
 0x578   :  { %v609_v46 = vpack.c.bf16 %v3545_v45, %v3545_v45 }
 0x57a   :  { %611 = vrot.lane.b32.xlu0 %v609_v46, %s3264_s6 }
 0x57d   :  { %v595_v47 = vpop.permute.xlu1 %594 }
 0x57e   :  { %v3550_v48 = vmul.f32 %v2941_v33, %v595_v47 }
 0x580   :  { %v658_v49 = vpack.c.bf16 %v3550_v48, %v3550_v48 }
 0x582   :  { %660 = vrot.lane.b32.xlu1 %v658_v49, %s3264_s6 }
 0x5ec   :  { %v612_v50 = vpop.permute.xlu0 %611 }
 0x5ed   :  { %2670 = vmatmul.mubr.msk.bf16.vlgmr.msra.gmra.mrb[8].mxu0 %vm150_vm1, %v612_v50 }
 0x5ee   :  { %2682 = vmatpush3.bf16.msra.mxu0 %v3447_v3  ;;  %2685 = vmatprep.mubr.msk.bf16.mxu0 %vm3262_vm0, %v3261_v0 }
 0x5ef   :  { %2683 = vmatprep.subr.bf16.mxu0 %v3261_v0 }
 0x5f2   :  { %2684 = vmatpush3.bf16.msra.mxu0 %v3455_v6 }
 0x5f3   :  { %2697 = vmatprep.subr.bf16.mxu0 %v3261_v0 }
 0x5f4   :  { %v661_v51 = vpop.permute.xlu1 %660 }
 0x5f5   :  { %2678 = vmatmul.mubr.msk.bf16.vlgmr.msra.gmra.mrb[16].mxu1 %vm150_vm1, %v661_v51 }
 0x5f6   :  { %2690 = vmatpush3.bf16.msra.mxu1 %v3462_v9  ;;  %2693 = vmatprep.mubr.msk.bf16.mxu1 %vm3262_vm0, %v3261_v0 }
 0x5f7   :  { %2691 = vmatprep.subr.bf16.mxu1 %v3261_v0 }
 0x5fa   :  { %2692 = vmatpush3.bf16.msra.mxu1 %v3473_v11 }
 0x5fb   :  { %2705 = vmatprep.subr.bf16.mxu1 %v3261_v0 }
 0x6c0   :  { %v650_v53 = vpop.f32.mrb[8].mxu0 }
 0x6c1   :  { %v656_v54 = vadd.f32 %v650_v53, %v608_v52  ;;  %v2671_v55 = vpop.f32.mrb[9].mxu0 }
 0x6c2   :  { %v653_v56 = vpop.f32.mrb[10].mxu0 }
 0x6c3   :  { %2946 = vtanh.f32 %v656_v54  ;;  %v2672_v57 = vpop.f32.mrb[11].mxu0  ;;  %v2466_v7 = vmul.f32 -1.442695, %v656_v54 }
 0x6c8   :  { %v699_v59 = vpop.f32.mrb[16].mxu1 }
 0x6c9   :  { %v705_v60 = vadd.f32 %v699_v59, %v657_v58  ;;  %v2679_v62 = vpop.f32.mrb[17].mxu1 }
 0x6ca   :  { %v702_v63 = vpop.f32.mrb[18].mxu1 }
 0x6cb   :  { %2948 = vtanh.f32 %v705_v60  ;;  %v2680_v2 = vpop.f32.mrb[19].mxu1  ;;  %v2467_v8 = vmul.f32 -1.442695, %v705_v60 }
 0x6cc   :  { %2950 = vpow2.f32 %v2466_v7 }
 0x6cd   :  { %v2947_v4 = vpop.eup %2946  ;;  %2952 = vpow2.f32 %v2467_v8 }
 0x6ce   :  { %715 = vrot.lane.b32.xlu0 %v2947_v4, %s3256_s30 }
 0x6d5   :  { %v2949_v5 = vpop.eup %2948 }
 0x6d6   :  { %739 = vrot.lane.b32.xlu1 %v2949_v5, %s3256_s30  ;;  %v2951_v12 = vpop.eup %2950 }
 0x6d7   :  { %v709_v13 = vadd.f32 1.0, %v2951_v12  ;;  %v2953_v14 = vpop.eup %2952 }
 0x6d8   :  { %v733_v15 = vadd.f32 1.0, %v2953_v14 }
 0x6d9   :  { %2954 = vrcp.f32 %v709_v13 }
 0x6da   :  { %2956 = vrcp.f32 %v733_v15 }
 0x6e3   :  { %v2955_v16 = vpop.eup %2954 }
 0x6e4   :  { %v2957_v19 = vpop.eup %2956  ;;  %v713_v22 = vmul.f32 %v2955_v16, %v3536_v38  ;;  %v764_v38 = vld [vmem:[#allocation2 + $0x6] sm:$0x3] }
 0x6e5   :  { %v737_v25 = vmul.f32 %v2957_v19, %v3540_v41 }
 0x740   :  { %v716_v17 = vpop.permute.xlu0 %715 }
 0x741   :  { %v718_v18 = vmul.f32 %v2955_v16, %v716_v17 }
 0x743   :  { %720 = vrot.lane.b32.xlu0 %v718_v18, %s3264_s6 }
 0x748   :  { %v740_v20 = vpop.permute.xlu1 %739 }
 0x749   :  { %v742_v21 = vmul.f32 %v2957_v19, %v740_v20 }
 0x74b   :  { %744 = vrot.lane.b32.xlu1 %v742_v21, %s3264_s6 }
 0x7b5   :  { %v721_v23 = vpop.permute.xlu0 %720 }
 0x7b6   :  { %v3574_v24 = vadd.f32 %v721_v23, %v713_v22 }
 0x7b8   :  { %2958 = vtanh.f32 %v3574_v24 }
 0x7bd   :  { %v745_v26 = vpop.permute.xlu1 %744 }
 0x7be   :  { %v3578_v27 = vadd.f32 %v745_v26, %v737_v25  ;;  %v920_v26 = vld [vmem:[#allocation2 + $0x8] sm:$0x3] }
 0x7c0   :  { %2960 = vtanh.f32 %v3578_v27 }
 0x7c2   :  { %v2959_v28 = vpop.eup %2958 }
 0x7c3   :  { %726 = vrot.lane.b32.xlu0 %v2959_v28, %s3256_s30 }
 0x7ca   :  { %v2961_v29 = vpop.eup %2960 }
 0x7cb   :  { %750 = vrot.lane.b32.xlu1 %v2961_v29, %s3256_s30 }
 0x835   :  { %v727_v30 = vpop.permute.xlu0 %726 }
 0x836   :  { %v3583_v31 = vmul.f32 %v2955_v16, %v727_v30 }
 0x838   :  { %v765_v32 = vpack.c.bf16 %v3583_v31, %v3583_v31 }
 0x83a   :  { %767 = vrot.lane.b32.xlu0 %v765_v32, %s3264_s6 }
 0x83d   :  { %v751_v33 = vpop.permute.xlu1 %750 }
 0x83e   :  { %v3588_v34 = vmul.f32 %v2957_v19, %v751_v33  ;;  %v969_v33 = vld [vmem:[#allocation3 + $0x8] sm:$0x3] }
 0x840   :  { %v814_v35 = vpack.c.bf16 %v3588_v34, %v3588_v34 }
 0x842   :  { %816 = vrot.lane.b32.xlu1 %v814_v35, %s3264_s6 }
 0x8ac   :  { %v768_v36 = vpop.permute.xlu0 %767 }
 0x8ad   :  { %2686 = vmatmul.mubr.msk.bf16.vlgmr.msra.gmra.mrb[12].mxu0 %vm150_vm1, %v768_v36 }
 0x8ae   :  { %2698 = vmatpush3.bf16.msra.mxu0 %v3447_v3  ;;  %2701 = vmatprep.mubr.msk.bf16.mxu0 %vm3262_vm0, %v3261_v0 }
 0x8af   :  { %2699 = vmatprep.subr.bf16.mxu0 %v3261_v0 }
 0x8b2   :  { %2700 = vmatpush3.bf16.msra.mxu0 %v3455_v6 }
 0x8b3   :  { %2713 = vmatprep.subr.bf16.mxu0 %v3261_v0 }
 0x8b4   :  { %v817_v37 = vpop.permute.xlu1 %816 }
 0x8b5   :  { %2694 = vmatmul.mubr.msk.bf16.vlgmr.msra.gmra.mrb[20].mxu1 %vm150_vm1, %v817_v37 }
 0x8b6   :  { %2706 = vmatpush3.bf16.msra.mxu1 %v3462_v9  ;;  %2709 = vmatprep.mubr.msk.bf16.mxu1 %vm3262_vm0, %v3261_v0 }
 0x8b7   :  { %2707 = vmatprep.subr.bf16.mxu1 %v3261_v0 }
 0x8ba   :  { %2708 = vmatpush3.bf16.msra.mxu1 %v3473_v11 }
 0x8bb   :  { %2721 = vmatprep.subr.bf16.mxu1 %v3261_v0 }
 0x980   :  { %v806_v39 = vpop.f32.mrb[12].mxu0 }
 0x981   :  { %v812_v40 = vadd.f32 %v806_v39, %v764_v38  ;;  %v2687_v41 = vpop.f32.mrb[13].mxu0 }
 0x982   :  { %v809_v42 = vpop.f32.mrb[14].mxu0 }
 0x983   :  { %2962 = vtanh.f32 %v812_v40  ;;  %v2688_v43 = vpop.f32.mrb[15].mxu0  ;;  %v2470_v54 = vmul.f32 -1.442695, %v812_v40 }
 0x988   :  { %v855_v46 = vpop.f32.mrb[20].mxu1 }
 0x989   :  { %v861_v47 = vadd.f32 %v855_v46, %v813_v44  ;;  %v2695_v49 = vpop.f32.mrb[21].mxu1 }
 0x98a   :  { %v858_v50 = vpop.f32.mrb[22].mxu1 }
 0x98b   :  { %2964 = vtanh.f32 %v861_v47  ;;  %v2696_v51 = vpop.f32.mrb[23].mxu1  ;;  %v2471_v55 = vmul.f32 -1.442695, %v861_v47 }
 0x98c   :  { %2966 = vpow2.f32 %v2470_v54 }
 0x98d   :  { %v2963_v52 = vpop.eup %2962  ;;  %2968 = vpow2.f32 %v2471_v55 }
 0x98e   :  { %871 = vrot.lane.b32.xlu0 %v2963_v52, %s3256_s30 }
 0x995   :  { %v2965_v53 = vpop.eup %2964 }
 0x996   :  { %895 = vrot.lane.b32.xlu1 %v2965_v53, %s3256_s30  ;;  %v2967_v56 = vpop.eup %2966 }
 0x997   :  { %v865_v57 = vadd.f32 1.0, %v2967_v56  ;;  %v2969_v58 = vpop.eup %2968 }
 0x998   :  { %v889_v59 = vadd.f32 1.0, %v2969_v58 }
 0x999   :  { %2970 = vrcp.f32 %v865_v57 }
 0x99a   :  { %2972 = vrcp.f32 %v889_v59 }
 0x9a3   :  { %v2971_v60 = vpop.eup %2970 }
 0x9a4   :  { %v2973_v2 = vpop.eup %2972  ;;  %v869_v7 = vmul.f32 %v2971_v60, %v3574_v24 }
 0x9a5   :  { %v893_v13 = vmul.f32 %v2973_v2, %v3578_v27 }
 0xa00   :  { %v872_v62 = vpop.permute.xlu0 %871 }
 0xa01   :  { %v874_v63 = vmul.f32 %v2971_v60, %v872_v62 }
 0xa03   :  { %876 = vrot.lane.b32.xlu0 %v874_v63, %s3264_s6 }
 0xa08   :  { %v896_v4 = vpop.permute.xlu1 %895 }
 0xa09   :  { %v898_v5 = vmul.f32 %v2973_v2, %v896_v4 }
 0xa0b   :  { %900 = vrot.lane.b32.xlu1 %v898_v5, %s3264_s6 }
 0xa75   :  { %v877_v8 = vpop.permute.xlu0 %876 }
 0xa76   :  { %v3612_v12 = vadd.f32 %v877_v8, %v869_v7 }
 0xa78   :  { %2974 = vtanh.f32 %v3612_v12 }
 0xa7d   :  { %v901_v14 = vpop.permute.xlu1 %900 }
 0xa7e   :  { %v3616_v15 = vadd.f32 %v901_v14, %v893_v13 }
 0xa80   :  { %2976 = vtanh.f32 %v3616_v15 }
 0xa82   :  { %v2975_v16 = vpop.eup %2974 }
 0xa83   :  { %882 = vrot.lane.b32.xlu0 %v2975_v16, %s3256_s30  ;;  %v1076_v16 = vld [vmem:[#allocation2 + $0xa] sm:$0x3] }
 0xa8a   :  { %v2977_v17 = vpop.eup %2976 }
 0xa8b   :  { %906 = vrot.lane.b32.xlu1 %v2977_v17, %s3256_s30 }
 0xaf5   :  { %v883_v18 = vpop.permute.xlu0 %882 }
 0xaf6   :  { %v3621_v19 = vmul.f32 %v2971_v60, %v883_v18 }
 0xaf8   :  { %v921_v20 = vpack.c.bf16 %v3621_v19, %v3621_v19 }
 0xafa   :  { %923 = vrot.lane.b32.xlu0 %v921_v20, %s3264_s6 }
 0xafd   :  { %v907_v21 = vpop.permute.xlu1 %906 }
 0xafe   :  { %v3626_v22 = vmul.f32 %v2973_v2, %v907_v21 }
 0xb00   :  { %v970_v23 = vpack.c.bf16 %v3626_v22, %v3626_v22 }
 0xb02   :  { %972 = vrot.lane.b32.xlu1 %v970_v23, %s3264_s6 }
 0xb6c   :  { %v924_v24 = vpop.permute.xlu0 %923 }
 0xb6d   :  { %2702 = vmatmul.mubr.msk.bf16.vlgmr.msra.gmra.mrb[16].mxu0 %vm150_vm1, %v924_v24  ;;  %v1125_v24 = vld [vmem:[#allocation3 + $0xa] sm:$0x3] }
 0xb6e   :  { %2714 = vmatpush3.bf16.msra.mxu0 %v3447_v3  ;;  %2717 = vmatprep.mubr.msk.bf16.mxu0 %vm3262_vm0, %v3261_v0 }
 0xb6f   :  { %2715 = vmatprep.subr.bf16.mxu0 %v3261_v0 }
 0xb72   :  { %2716 = vmatpush3.bf16.msra.mxu0 %v3455_v6 }
 0xb73   :  { %2729 = vmatprep.subr.bf16.mxu0 %v3261_v0 }
 0xb74   :  { %v973_v25 = vpop.permute.xlu1 %972 }
 0xb75   :  { %2710 = vmatmul.mubr.msk.bf16.vlgmr.msra.gmra.mrb[24].mxu1 %vm150_vm1, %v973_v25 }
 0xb76   :  { %2722 = vmatpush3.bf16.msra.mxu1 %v3462_v9  ;;  %2725 = vmatprep.mubr.msk.bf16.mxu1 %vm3262_vm0, %v3261_v0 }
 0xb77   :  { %2723 = vmatprep.subr.bf16.mxu1 %v3261_v0 }
 0xb7a   :  { %2724 = vmatpush3.bf16.msra.mxu1 %v3473_v11 }
 0xb7b   :  { %2737 = vmatprep.subr.bf16.mxu1 %v3261_v0 }
 0xc40   :  { %v962_v27 = vpop.f32.mrb[16].mxu0 }
 0xc41   :  { %v968_v28 = vadd.f32 %v962_v27, %v920_v26  ;;  %v2703_v29 = vpop.f32.mrb[17].mxu0 }
 0xc42   :  { %v965_v30 = vpop.f32.mrb[18].mxu0 }
 0xc43   :  { %2978 = vtanh.f32 %v968_v28  ;;  %v2704_v32 = vpop.f32.mrb[19].mxu0  ;;  %v2474_v42 = vmul.f32 -1.442695, %v968_v28 }
 0xc48   :  { %v1011_v35 = vpop.f32.mrb[24].mxu1 }
 0xc49   :  { %v1017_v36 = vadd.f32 %v1011_v35, %v969_v33  ;;  %v2711_v37 = vpop.f32.mrb[25].mxu1 }
 0xc4a   :  { %v1014_v38 = vpop.f32.mrb[26].mxu1 }
 0xc4b   :  { %2980 = vtanh.f32 %v1017_v36  ;;  %v2712_v39 = vpop.f32.mrb[27].mxu1  ;;  %v2475_v43 = vmul.f32 -1.442695, %v1017_v36 }
 0xc4c   :  { %2982 = vpow2.f32 %v2474_v42 }
 0xc4d   :  { %v2979_v40 = vpop.eup %2978  ;;  %2984 = vpow2.f32 %v2475_v43 }
 0xc4e   :  { %1027 = vrot.lane.b32.xlu0 %v2979_v40, %s3256_s30 }
 0xc55   :  { %v2981_v41 = vpop.eup %2980 }
 0xc56   :  { %1051 = vrot.lane.b32.xlu1 %v2981_v41, %s3256_s30  ;;  %v2983_v44 = vpop.eup %2982 }
 0xc57   :  { %v1021_v46 = vadd.f32 1.0, %v2983_v44  ;;  %v2985_v47 = vpop.eup %2984 }
 0xc58   :  { %v1045_v49 = vadd.f32 1.0, %v2985_v47 }
 0xc59   :  { %2986 = vrcp.f32 %v1021_v46 }
 0xc5a   :  { %2988 = vrcp.f32 %v1045_v49 }
 0xc63   :  { %v2987_v50 = vpop.eup %2986 }
 0xc64   :  { %v2989_v53 = vpop.eup %2988  ;;  %v1025_v56 = vmul.f32 %v2987_v50, %v3612_v12 }
 0xc65   :  { %v1049_v59 = vmul.f32 %v2989_v53, %v3616_v15 }
 0xcc0   :  { %v1028_v51 = vpop.permute.xlu0 %1027 }
 0xcc1   :  { %v1030_v52 = vmul.f32 %v2987_v50, %v1028_v51 }
 0xcc3   :  { %1032 = vrot.lane.b32.xlu0 %v1030_v52, %s3264_s6 }
 0xcc8   :  { %v1052_v54 = vpop.permute.xlu1 %1051 }
 0xcc9   :  { %v1054_v55 = vmul.f32 %v2989_v53, %v1052_v54 }
 0xccb   :  { %1056 = vrot.lane.b32.xlu1 %v1054_v55, %s3264_s6 }
 0xd35   :  { %v1033_v57 = vpop.permute.xlu0 %1032 }
 0xd36   :  { %v3650_v58 = vadd.f32 %v1033_v57, %v1025_v56 }
 0xd38   :  { %2990 = vtanh.f32 %v3650_v58 }
 0xd3d   :  { %v1057_v60 = vpop.permute.xlu1 %1056 }
 0xd3e   :  { %v3654_v62 = vadd.f32 %v1057_v60, %v1049_v59 }
 0xd40   :  { %2992 = vtanh.f32 %v3654_v62 }
 0xd42   :  { %v2991_v63 = vpop.eup %2990 }
 0xd43   :  { %1038 = vrot.lane.b32.xlu0 %v2991_v63, %s3256_s30 }
 0xd4a   :  { %v2993_v2 = vpop.eup %2992 }
 0xd4b   :  { %1062 = vrot.lane.b32.xlu1 %v2993_v2, %s3256_s30 }
 0xdb5   :  { %v1039_v4 = vpop.permute.xlu0 %1038 }
 0xdb6   :  { %v3659_v5 = vmul.f32 %v2987_v50, %v1039_v4 }
 0xdb8   :  { %v1077_v7 = vpack.c.bf16 %v3659_v5, %v3659_v5 }
 0xdba   :  { %1079 = vrot.lane.b32.xlu0 %v1077_v7, %s3264_s6 }
 0xdbd   :  { %v1063_v8 = vpop.permute.xlu1 %1062 }
 0xdbe   :  { %v3664_v12 = vmul.f32 %v2989_v53, %v1063_v8 }
 0xdc0   :  { %v1126_v13 = vpack.c.bf16 %v3664_v12, %v3664_v12 }
 0xdc2   :  { %1128 = vrot.lane.b32.xlu1 %v1126_v13, %s3264_s6 }
 0xe2c   :  { %v1080_v14 = vpop.permute.xlu0 %1079 }
 0xe2d   :  { %2718 = vmatmul.mubr.msk.bf16.vlgmr.msra.gmra.mrb[20].mxu0 %vm150_vm1, %v1080_v14  ;;  %v1281_v14 = vld [vmem:[#allocation3 + $0xc] sm:$0x3] }
 0xe2e   :  { %2730 = vmatpush3.bf16.msra.mxu0 %v3447_v3  ;;  %2733 = vmatprep.mubr.msk.bf16.mxu0 %vm3262_vm0, %v3261_v0 }
 0xe2f   :  { %2731 = vmatprep.subr.bf16.mxu0 %v3261_v0 }
 0xe32   :  { %2732 = vmatpush3.bf16.msra.mxu0 %v3455_v6 }
 0xe33   :  { %2745 = vmatprep.subr.bf16.mxu0 %v3261_v0 }
 0xe34   :  { %v1129_v15 = vpop.permute.xlu1 %1128 }
 0xe35   :  { %2726 = vmatmul.mubr.msk.bf16.vlgmr.msra.gmra.mrb[28].mxu1 %vm150_vm1, %v1129_v15 }
 0xe36   :  { %2738 = vmatpush3.bf16.msra.mxu1 %v3462_v9  ;;  %2741 = vmatprep.mubr.msk.bf16.mxu1 %vm3262_vm0, %v3261_v0 }
 0xe37   :  { %2739 = vmatprep.subr.bf16.mxu1 %v3261_v0 }
 0xe3a   :  { %2740 = vmatpush3.bf16.msra.mxu1 %v3473_v11 }
 0xe3b   :  { %2753 = vmatprep.subr.bf16.mxu1 %v3261_v0 }
 0xf00   :  { %v1118_v17 = vpop.f32.mrb[20].mxu0 }
 0xf01   :  { %v1124_v18 = vadd.f32 %v1118_v17, %v1076_v16  ;;  %v2719_v20 = vpop.f32.mrb[21].mxu0 }
 0xf02   :  { %v1121_v21 = vpop.f32.mrb[22].mxu0 }
 0xf03   :  { %2994 = vtanh.f32 %v1124_v18  ;;  %v2720_v23 = vpop.f32.mrb[23].mxu0  ;;  %v2478_v33 = vmul.f32 -1.442695, %v1124_v18 }
 0xf08   :  { %v1167_v25 = vpop.f32.mrb[28].mxu1 }
 0xf09   :  { %v1173_v26 = vadd.f32 %v1167_v25, %v1125_v24  ;;  %v2727_v27 = vpop.f32.mrb[29].mxu1 }
 0xf0a   :  { %v1170_v28 = vpop.f32.mrb[30].mxu1 }
 0xf0b   :  { %2996 = vtanh.f32 %v1173_v26  ;;  %v2728_v29 = vpop.f32.mrb[31].mxu1  ;;  %v2479_v35 = vmul.f32 -1.442695, %v1173_v26 }
 0xf0c   :  { %2998 = vpow2.f32 %v2478_v33 }
 0xf0d   :  { %v2995_v30 = vpop.eup %2994  ;;  %3000 = vpow2.f32 %v2479_v35 }
 0xf0e   :  { %1183 = vrot.lane.b32.xlu0 %v2995_v30, %s3256_s30 }
 0xf15   :  { %v2997_v32 = vpop.eup %2996 }
 0xf16   :  { %1207 = vrot.lane.b32.xlu1 %v2997_v32, %s3256_s30  ;;  %v2999_v36 = vpop.eup %2998 }
 0xf17   :  { %v1177_v37 = vadd.f32 1.0, %v2999_v36  ;;  %v3001_v38 = vpop.eup %3000 }
 0xf18   :  { %v1201_v39 = vadd.f32 1.0, %v3001_v38 }
 0xf19   :  { %3002 = vrcp.f32 %v1177_v37 }
 0xf1a   :  { %3004 = vrcp.f32 %v1201_v39 }
 0xf23   :  { %v3003_v40 = vpop.eup %3002 }
 0xf24   :  { %v3005_v43 = vpop.eup %3004  ;;  %v1181_v47 = vmul.f32 %v3003_v40, %v3650_v58 }
 0xf25   :  { %v1205_v51 = vmul.f32 %v3005_v43, %v3654_v62 }
 0xf80   :  { %v1184_v41 = vpop.permute.xlu0 %1183 }
 0xf81   :  { %v1186_v42 = vmul.f32 %v3003_v40, %v1184_v41 }
 0xf83   :  { %1188 = vrot.lane.b32.xlu0 %v1186_v42, %s3264_s6 }
 0xf88   :  { %v1208_v44 = vpop.permute.xlu1 %1207 }
 0xf89   :  { %v1210_v46 = vmul.f32 %v3005_v43, %v1208_v44 }
 0xf8b   :  { %1212 = vrot.lane.b32.xlu1 %v1210_v46, %s3264_s6 }
 0xff5   :  { %v1189_v49 = vpop.permute.xlu0 %1188 }
 0xff6   :  { %v3688_v50 = vadd.f32 %v1189_v49, %v1181_v47 }
 0xff8   :  { %3006 = vtanh.f32 %v3688_v50 }
 0xffd   :  { %v1213_v52 = vpop.permute.xlu1 %1212 }
 0xffe   :  { %v3692_v53 = vadd.f32 %v1213_v52, %v1205_v51 }
0x1000   :  { %3008 = vtanh.f32 %v3692_v53 }
0x1002   :  { %v3007_v54 = vpop.eup %3006 }
0x1003   :  { %1194 = vrot.lane.b32.xlu0 %v3007_v54, %s3256_s30  ;;  %v1388_v54 = vld [vmem:[#allocation2 + $0xe] sm:$0x3] }
0x100a   :  { %v3009_v55 = vpop.eup %3008 }
0x100b   :  { %1218 = vrot.lane.b32.xlu1 %v3009_v55, %s3256_s30 }
0x1075   :  { %v1195_v56 = vpop.permute.xlu0 %1194 }
0x1076   :  { %v3697_v57 = vmul.f32 %v3003_v40, %v1195_v56 }
0x1078   :  { %v1233_v58 = vpack.c.bf16 %v3697_v57, %v3697_v57 }
0x107a   :  { %1235 = vrot.lane.b32.xlu0 %v1233_v58, %s3264_s6 }
0x107d   :  { %v1219_v59 = vpop.permute.xlu1 %1218 }
0x107e   :  { %v3702_v60 = vmul.f32 %v3005_v43, %v1219_v59 }
0x1080   :  { %v1282_v62 = vpack.c.bf16 %v3702_v60, %v3702_v60 }
0x1082   :  { %1284 = vrot.lane.b32.xlu1 %v1282_v62, %s3264_s6 }
0x10ec   :  { %v1236_v63 = vpop.permute.xlu0 %1235 }
0x10ed   :  { %2734 = vmatmul.mubr.msk.bf16.vlgmr.msra.gmra.mrb[24].mxu0 %vm150_vm1, %v1236_v63  ;;  %v1437_v63 = vld [vmem:[#allocation3 + $0xe] sm:$0x3] }
0x10ee   :  { %2746 = vmatpush3.bf16.msra.mxu0 %v3447_v3  ;;  %2749 = vmatprep.mubr.msk.bf16.mxu0 %vm3262_vm0, %v3261_v0  ;;  %v1232_v3 = vld [vmem:[#allocation2 + $0xc] sm:$0x3] }
0x10ef   :  { %2747 = vmatprep.subr.bf16.mxu0 %v3261_v0 }
0x10f2   :  { %2748 = vmatpush3.bf16.msra.mxu0 %v3455_v6 }
0x10f3   :  { %2761 = vmatprep.subr.bf16.mxu0 %v3261_v0 }
0x10f4   :  { %v1285_v2 = vpop.permute.xlu1 %1284 }
0x10f5   :  { %2742 = vmatmul.mubr.msk.bf16.vlgmr.msra.gmra.mrb[32].mxu1 %vm150_vm1, %v1285_v2 }
0x10f6   :  { %2754 = vmatpush3.bf16.msra.mxu1 %v3462_v9  ;;  %2757 = vmatprep.mubr.msk.bf16.mxu1 %vm3262_vm0, %v3261_v0 }
0x10f7   :  { %2755 = vmatprep.subr.bf16.mxu1 %v3261_v0 }
0x10fa   :  { %2756 = vmatpush3.bf16.msra.mxu1 %v3473_v11 }
0x10fb   :  { %2773 = vmatprep.subr.bf16.mxu1 %v3261_v0 }
0x11c0   :  { %v1274_v4 = vpop.f32.mrb[24].mxu0 }
0x11c1   :  { %v1280_v7 = vadd.f32 %v1274_v4, %v1232_v3  ;;  %v2735_v6 = vpop.f32.mrb[25].mxu0 }
0x11c2   :  { %v1277_v8 = vpop.f32.mrb[26].mxu0 }
0x11c3   :  { %3010 = vtanh.f32 %v1280_v7  ;;  %v2736_v13 = vpop.f32.mrb[27].mxu0  ;;  %v2482_v21 = vmul.f32 -1.442695, %v1280_v7 }
0x11c8   :  { %v1323_v15 = vpop.f32.mrb[32].mxu1 }
0x11c9   :  { %v1329_v16 = vadd.f32 %v1323_v15, %v1281_v14  ;;  %v2743_v9 = vpop.f32.mrb[33].mxu1 }
0x11ca   :  { %v1326_v17 = vpop.f32.mrb[34].mxu1 }
0x11cb   :  { %3012 = vtanh.f32 %v1329_v16  ;;  %v2744_v18 = vpop.f32.mrb[35].mxu1  ;;  %v2483_v23 = vmul.f32 -1.442695, %v1329_v16 }
0x11cc   :  { %3014 = vpow2.f32 %v2482_v21 }
0x11cd   :  { %v3011_v20 = vpop.eup %3010  ;;  %3016 = vpow2.f32 %v2483_v23 }
0x11ce   :  { %1339 = vrot.lane.b32.xlu0 %v3011_v20, %s3256_s30 }
0x11d5   :  { %v3013_v11 = vpop.eup %3012 }
0x11d6   :  { %1363 = vrot.lane.b32.xlu1 %v3013_v11, %s3256_s30  ;;  %v3015_v24 = vpop.eup %3014 }
0x11d7   :  { %v1333_v25 = vadd.f32 1.0, %v3015_v24  ;;  %v3017_v26 = vpop.eup %3016 }
0x11d8   :  { %v1357_v27 = vadd.f32 1.0, %v3017_v26 }
0x11d9   :  { %3018 = vrcp.f32 %v1333_v25 }
0x11da   :  { %3020 = vrcp.f32 %v1357_v27 }
0x11e3   :  { %v3019_v28 = vpop.eup %3018 }
0x11e4   :  { %v3021_v32 = vpop.eup %3020  ;;  %v1337_v36 = vmul.f32 %v3019_v28, %v3688_v50 }
0x11e5   :  { %v1361_v39 = vmul.f32 %v3021_v32, %v3692_v53 }
0x1240   :  { %v1340_v29 = vpop.permute.xlu0 %1339 }
0x1241   :  { %v1342_v30 = vmul.f32 %v3019_v28, %v1340_v29 }
0x1243   :  { %1344 = vrot.lane.b32.xlu0 %v1342_v30, %s3264_s6 }
0x1248   :  { %v1364_v33 = vpop.permute.xlu1 %1363 }
0x1249   :  { %v1366_v35 = vmul.f32 %v3021_v32, %v1364_v33 }
0x124b   :  { %1368 = vrot.lane.b32.xlu1 %v1366_v35, %s3264_s6 }
0x12b5   :  { %v1345_v37 = vpop.permute.xlu0 %1344 }
0x12b6   :  { %v1347_v38 = vadd.f32 %v1345_v37, %v1337_v36 }
0x12b8   :  { %3022 = vtanh.f32 %v1347_v38 }
0x12bd   :  { %v1369_v40 = vpop.permute.xlu1 %1368 }
0x12be   :  { %v1371_v41 = vadd.f32 %v1369_v40, %v1361_v39 }
0x12c0   :  { %3024 = vtanh.f32 %v1371_v41 }
0x12c2   :  { %v3023_v42 = vpop.eup %3022 }
0x12c3   :  { %1350 = vrot.lane.b32.xlu0 %v3023_v42, %s3256_s30 }
0x12ca   :  { %v3025_v43 = vpop.eup %3024 }
0x12cb   :  { %1374 = vrot.lane.b32.xlu1 %v3025_v43, %s3256_s30 }
0x1335   :  { %v1351_v44 = vpop.permute.xlu0 %1350 }
0x1336   :  { %v3729_v46 = vmul.f32 %v3019_v28, %v1351_v44 }
0x1338   :  { %v1389_v47 = vpack.c.bf16 %v3729_v46, %v3729_v46 }
0x133a   :  { %1391 = vrot.lane.b32.xlu0 %v1389_v47, %s3264_s6 }
0x133d   :  { %v1375_v49 = vpop.permute.xlu1 %1374 }
0x133e   :  { %v3734_v50 = vmul.f32 %v3021_v32, %v1375_v49 }
0x1340   :  { %v1438_v51 = vpack.c.bf16 %v3734_v50, %v3734_v50 }
0x1342   :  { %1440 = vrot.lane.b32.xlu1 %v1438_v51, %s3264_s6 }
0x13ac   :  { %v1392_v52 = vpop.permute.xlu0 %1391 }
0x13ad   :  { %2750 = vmatmul.mubr.msk.bf16.vlgmr.msra.gmra.mrb[28].mxu0 %vm150_vm1, %v1392_v52 }
0x13ae   :  { %2769 = vmatprep.mubr.msk.bf16.mxu0 %vm3262_vm0, %v3261_v0 }
0x13b4   :  { %v1441_v53 = vpop.permute.xlu1 %1440 }
0x13b5   :  { %2758 = vmatmul.mubr.msk.bf16.vlgmr.msra.gmra.mrb[36].mxu1 %vm150_vm1, %v1441_v53 }
0x13b6   :  { %2781 = vmatprep.mubr.msk.bf16.mxu1 %vm3262_vm0, %v3261_v0 }
0x1480   :  { %v1430_v55 = vpop.f32.mrb[28].mxu0 }
0x1481   :  { %v1436_v56 = vadd.f32 %v1430_v55, %v1388_v54  ;;  %v2751_v58 = vpop.f32.mrb[29].mxu0  ;;  %v3837_v54 = vld [vmem:[%s3996_s9] sm:$0xff]  }
0x1482   :  { %v1433_v59 = vpop.f32.mrb[30].mxu0 }
0x1483   :  { %3026 = vtanh.f32 %v1436_v56  ;;  %v2752_v62 = vpop.f32.mrb[31].mxu0  ;;  %v2486_v14 = vmul.f32 -1.442695, %v1436_v56  ;;  %v3844_v56 = vld [vmem:[%s3996_s9 + $0x8] sm:$0xff]  }
0x1488   :  { %v1479_v2 = vpop.f32.mrb[36].mxu1 }
0x1489   :  { %v1485_v3 = vadd.f32 %v1479_v2, %v1437_v63  ;;  %v2759_v4 = vpop.f32.mrb[37].mxu1 }
0x148a   :  { %v1482_v7 = vpop.f32.mrb[38].mxu1 }
0x148b   :  { %3028 = vtanh.f32 %v1485_v3  ;;  %v2760_v6 = vpop.f32.mrb[39].mxu1  ;;  %v2487_v15 = vmul.f32 -1.442695, %v1485_v3 }
0x148c   :  { %3030 = vpow2.f32 %v2486_v14  ;;  %v2495_v14 = vld [vmem:[%s3997_s10] ss:$0 sm:$0xff] }
0x148d   :  { %v3027_v8 = vpop.eup %3026  ;;  %3032 = vpow2.f32 %v2487_v15 }
0x148e   :  { %1495 = vrot.lane.b32.xlu0 %v3027_v8, %s3256_s30 }
0x1495   :  { %v3029_v13 = vpop.eup %3028 }
0x1496   :  { %1519 = vrot.lane.b32.xlu1 %v3029_v13, %s3256_s30  ;;  %v3031_v16 = vpop.eup %3030 }
0x1497   :  { %v1489_v9 = vadd.f32 1.0, %v3031_v16  ;;  %v3033_v17 = vpop.eup %3032 }
0x1498   :  { %v1513_v18 = vadd.f32 1.0, %v3033_v17 }
0x1499   :  { %3034 = vrcp.f32 %v1489_v9 }
0x149a   :  { %3036 = vrcp.f32 %v1513_v18 }
0x14a3   :  { %v3035_v20 = vpop.eup %3034 }
0x14a4   :  { %v3748_v23 = vpop.eup %3036  ;;  %v1493_v26 = vmul.f32 %v3035_v20, %v1347_v38 }
0x14a5   :  { %v1517_v29 = vmul.f32 %v3748_v23, %v1371_v41 }
0x1500   :  { %v1496_v11 = vpop.permute.xlu0 %1495 }
0x1501   :  { %v1498_v21 = vmul.f32 %v3035_v20, %v1496_v11 }
0x1503   :  { %1500 = vrot.lane.b32.xlu0 %v1498_v21, %s3264_s6 }
0x1508   :  { %v1520_v24 = vpop.permute.xlu1 %1519 }
0x1509   :  { %v1522_v25 = vmul.f32 %v3748_v23, %v1520_v24 }
0x150b   :  { %1524 = vrot.lane.b32.xlu1 %v1522_v25, %s3264_s6 }
0x1575   :  { %v1501_v27 = vpop.permute.xlu0 %1500 }
0x1576   :  { %v1503_v28 = vadd.f32 %v1501_v27, %v1493_v26 }
0x1578   :  { %3038 = vtanh.f32 %v1503_v28 }
0x157d   :  { %v1525_v30 = vpop.permute.xlu1 %1524 }
0x157e   :  { %v1527_v32 = vadd.f32 %v1525_v30, %v1517_v29 }
0x1580   :  { %3040 = vtanh.f32 %v1527_v32 }
0x1582   :  { %v3039_v33 = vpop.eup %3038 }
0x1583   :  { %1506 = vrot.lane.b32.xlu0 %v3039_v33, %s3256_s30 }
0x1587   :  { %441 = vrot.lane.b32.xlu0 %v3507_v61, %s3264_s6  ;;  %v2904_v61 = vld [vmem:[%s3998_s11] sm:$0xff]  }
0x1588   :  { %2762 = vmatpush3.bf16.msra.mxu0 %v2904_v61 }
0x1589   :  { %2763 = vmatprep.subr.bf16.mxu0 %v3261_v0 }
0x158a   :  { %v3041_v35 = vpop.eup %3040 }
0x158b   :  { %599 = vrot.lane.b32.xlu0 %v3545_v45, %s3264_s6  ;;  %1530 = vrot.lane.b32.xlu1 %v3041_v35, %s3256_s30  ;;  %v2906_v45 = vld [vmem:[%s3998_s11 + $0x10] sm:$0xff]  }
0x158f   :  { %755 = vrot.lane.b32.xlu0 %v3583_v31, %s3264_s6  ;;  %447 = vrot.lane.b32.xlu1 %v3512_v1, %s3256_s30  ;;  %v2905_v1 = vld [vmem:[%s3998_s11 + $0x8] sm:$0xff]   ;;  %v2908_v31 = vld [vmem:[%s3995_s8] sm:$0xff]  }
0x1590   :  { %2764 = vmatpush3.bf16.msra.mxu0 %v2905_v1  ;;  %2774 = vmatpush3.bf16.msra.mxu1 %v2908_v31 }
0x1591   :  { %2765 = vmatprep.subr.bf16.mxu0 %v3261_v0  ;;  %2775 = vmatprep.subr.bf16.mxu1 %v3261_v0 }
0x1593   :  { %911 = vrot.lane.b32.xlu0 %v3621_v19, %s3264_s6  ;;  %604 = vrot.lane.b32.xlu1 %v3550_v48, %s3256_s30  ;;  %v2907_v48 = vld [vmem:[%s3998_s11 + $0x18] sm:$0xff]   ;;  %v2910_v19 = vld [vmem:[%s3995_s8 + $0x10] sm:$0xff]  }
0x1594   :  { %2766 = vmatpush3.bf16.msra.mxu0 %v2906_v45 }
0x1595   :  { %2767 = vmatprep.subr.bf16.mxu0 %v3261_v0 }
0x1597   :  { %1067 = vrot.lane.b32.xlu0 %v3659_v5, %s3264_s6  ;;  %760 = vrot.lane.b32.xlu1 %v3588_v34, %s3256_s30  ;;  %v2909_v34 = vld [vmem:[%s3995_s8 + $0x8] sm:$0xff]  }
0x1598   :  { %2768 = vmatpush3.bf16.msra.mxu0 %v2907_v48  ;;  %2776 = vmatpush3.bf16.msra.mxu1 %v2909_v34 }
0x1599   :  { %2785 = vmatprep.subr.bf16.mxu0 %v3261_v0  ;;  %2777 = vmatprep.subr.bf16.mxu1 %v3261_v0 }
0x159b   :  { %1223 = vrot.lane.b32.xlu0 %v3697_v57, %s3264_s6  ;;  %916 = vrot.lane.b32.xlu1 %v3626_v22, %s3256_s30 }
0x159c   :  { %2778 = vmatpush3.bf16.msra.mxu1 %v2910_v19 }
0x159d   :  { %2779 = vmatprep.subr.bf16.mxu1 %v3261_v0 }
0x159f   :  { %1379 = vrot.lane.b32.xlu0 %v3729_v46, %s3264_s6  ;;  %1072 = vrot.lane.b32.xlu1 %v3664_v12, %s3256_s30  ;;  %v2911_v12 = vld [vmem:[%s3995_s8 + $0x18] sm:$0xff]   ;;  %s3267_s8 = smov [#allocation14]  }
0x15a0   :  { %2780 = vmatpush3.bf16.msra.mxu1 %v2911_v12  ;;  %s2433_s24 = sshll.u32 %s3267_s8, 4  ;;  %s2434_s24 = int_to_ptr.vmem [resolvable:$true] %s2433_s24 }
0x15a1   :  { %2793 = vmatprep.subr.bf16.mxu1 %v3261_v0  ;;  %p3229_p13 = scmp.lt.s32.totalorder %s2434_s24, %s2434_s24 }
0x15a3   :  { %1228 = vrot.lane.b32.xlu1 %v3702_v60, %s3256_s30 }
0x15a7   :  { %1384 = vrot.lane.b32.xlu1 %v3734_v50, %s3256_s30 }
0x15f5   :  { %v1507_v22 = vpop.permute.xlu0 %1506 }
0x15f6   :  { %v1509_v5 = vmul.f32 %v3035_v20, %v1507_v22 }
0x15f8   :  { %1535 = vrot.lane.b32.xlu0 %v1509_v5, %s3264_s6 }
0x15f9   :  { %v442_v57 = vpop.permute.xlu0 %441 }
0x15fa   :  { %445 = vst.msk [vmem:[#allocation4] sm:$0x3] %vm444_vm2, %v442_v57 }
0x15fd   :  { %v600_v60 = vpop.permute.xlu0 %599  ;;  %v1531_v36 = vpop.permute.xlu1 %1530 }
0x15fe   :  { %602 = vst.msk [vmem:[#allocation4 + $0x2] sm:$0x3] %vm444_vm2, %v600_v60  ;;  %v1533_v37 = vmul.f32 %v3748_v23, %v1531_v36 }
0x1600   :  { %1540 = vrot.lane.b32.xlu1 %v1533_v37, %s3256_s30 }
0x1601   :  { %v756_v38 = vpop.permute.xlu0 %755  ;;  %v448_v39 = vpop.permute.xlu1 %447 }
0x1602   :  { %758 = vst.msk [vmem:[#allocation4 + $0x4] sm:$0x3] %vm444_vm2, %v756_v38 }
0x1603   :  { %451 = vst.msk [vmem:[#allocation4 + $0xe] sm:$0x3] %vm450_vm3, %v448_v39 }
0x1605   :  { %v912_v40 = vpop.permute.xlu0 %911  ;;  %v605_v41 = vpop.permute.xlu1 %604 }
0x1606   :  { %914 = vst.msk [vmem:[#allocation4 + $0x6] sm:$0x3] %vm444_vm2, %v912_v40 }
0x1607   :  { %607 = vst.msk [vmem:[#allocation4 + $0xc] sm:$0x3] %vm450_vm3, %v605_v41 }
0x1609   :  { %v1068_v42 = vpop.permute.xlu0 %1067  ;;  %v761_v43 = vpop.permute.xlu1 %760 }
0x160a   :  { %763 = vst.msk [vmem:[#allocation4 + $0xa] sm:$0x3] %vm450_vm3, %v761_v43 }
0x160d   :  { %v1224_v44 = vpop.permute.xlu0 %1223  ;;  %v917_v46 = vpop.permute.xlu1 %916 }
0x160e   :  { %1226 = vst.msk [vmem:[#allocation4 + $0xa] sm:$0x3] %vm444_vm2, %v1224_v44 }
0x160f   :  { %919 = vst.msk [vmem:[#allocation4 + $0x8] sm:$0x3] %vm450_vm3, %v917_v46 }
0x1610   :  { %1070 = vst.msk [vmem:[#allocation4 + $0x8] sm:$0x3] %vm444_vm2, %v1068_v42 }
0x1611   :  { %v1380_v47 = vpop.permute.xlu0 %1379  ;;  %v1073_v49 = vpop.permute.xlu1 %1072 }
0x1612   :  { %1382 = vst.msk [vmem:[#allocation4 + $0xc] sm:$0x3] %vm444_vm2, %v1380_v47 }
0x1613   :  { %1075 = vst.msk [vmem:[#allocation4 + $0x6] sm:$0x3] %vm450_vm3, %v1073_v49 }
0x1615   :  { %v1229_v50 = vpop.permute.xlu1 %1228 }
0x1616   :  { %1231 = vst.msk [vmem:[#allocation4 + $0x4] sm:$0x3] %vm450_vm3, %v1229_v50 }
0x1619   :  { %v1385_v51 = vpop.permute.xlu1 %1384 }
0x161a   :  { %1387 = vst.msk [vmem:[#allocation4 + $0x2] sm:$0x3] %vm450_vm3, %v1385_v51 }
0x166a   :  { %v1536_v52 = vpop.permute.xlu0 %1535 }
0x166b   :  { %1538 = vst.msk [vmem:[#allocation4 + $0xe] sm:$0x3] %vm444_vm2, %v1536_v52  ;;  %v1544_v53 = vsel %vm150_vm1, %v1536_v52, %v448_v39 }
0x166c   :  { %v1545_v55 = vpack.c.bf16 %v1544_v53, %v1544_v53 }
0x166e   :  { %2770 = vmatmul.mubr.msk.bf16.vlgmr.msra.gmra.mrb[32].mxu0 %vm1585_vm4, %v1545_v55 }
0x166f   :  { %2786 = vmatpush3.bf16.msra.mxu0 %v3837_v54  ;;  %2789 = vmatprep.mubr.msk.bf16.mxu0 %vm3262_vm0, %v3261_v0 }
0x1670   :  { %2787 = vmatprep.subr.bf16.mxu0 %v3261_v0 }
0x1672   :  { %v1541_v58 = vpop.permute.xlu1 %1540  ;;  %v1648_v62 = vld [vmem:[#allocation4 + $0x8] sm:$0xff] }
0x1673   :  { %1543 = vst.msk [vmem:[#allocation4] sm:$0x3] %vm450_vm3, %v1541_v58  ;;  %2788 = vmatpush3.bf16.msra.mxu0 %v3844_v56 }
0x1674   :  { %2801 = vmatprep.subr.bf16.mxu0 %v3261_v0 }
0x1676   :  { %2790 = vmatmul.mubr.bf16.vlgmr.msra.gmra.mrb[36].mxu0 %v3263_v10 }
0x1677   :  { %2802 = vmatpush3.bf16.msra.mxu0 %v3837_v54  ;;  %2805 = vmatprep.mubr.msk.bf16.mxu0 %vm3262_vm0, %v3261_v0 }
0x1678   :  { %2803 = vmatprep.subr.bf16.mxu0 %v3261_v0 }
0x167a   :  { %v1647_v59 = vld [vmem:[#allocation4] sm:$0xff] }
0x167b   :  { %v1649_v63 = vpack.c.bf16 %v1648_v62, %v1647_v59  ;;  %2804 = vmatpush3.bf16.msra.mxu0 %v3844_v56 }
0x167c   :  { %2817 = vmatprep.subr.bf16.mxu0 %v3261_v0 }
0x167d   :  { %2782 = vmatmul.mubr.msk.bf16.vlgmr.msra.gmra.mrb[40].mxu1 %vm1585_vm4, %v1649_v63 }
0x167e   :  { %2794 = vmatpush3.bf16.msra.mxu1 %v3837_v54  ;;  %2797 = vmatprep.mubr.msk.bf16.mxu1 %vm3262_vm0, %v3261_v0 }
0x167f   :  { %2795 = vmatprep.subr.bf16.mxu1 %v3261_v0 }
0x1682   :  { %2796 = vmatpush3.bf16.msra.mxu1 %v3844_v56 }
0x1683   :  { %2809 = vmatprep.subr.bf16.mxu1 %v3261_v0 }
0x1741   :  { %v3866_v10 = vpop.f32.mrb[32].mxu0 }
0x1742   :  { %v2771_v2 = vpop.f32.mrb[33].mxu0 }
0x1743   :  { %v1626_v3 = vpop.f32.mrb[34].mxu0 }
0x1744   :  { %v2772_v4 = vpop.f32.mrb[35].mxu0 }
0x1749   :  { %v1786_v7 = vpop.f32.mrb[36].mxu0 }
0x174a   :  { %v2791_v6 = vpop.f32.mrb[37].mxu0 }
0x174b   :  { %v1789_v8 = vpop.f32.mrb[38].mxu0 }
0x174c   :  { %v2792_v13 = vpop.f32.mrb[39].mxu0 }
0x1750   :  { %v1726_v15 = vpop.f32.mrb[40].mxu1 }
0x1751   :  { %v1727_v16 = vadd.f32 %v2495_v14, %v1726_v15  ;;  %v2783_v9 = vpop.f32.mrb[41].mxu1 }
0x1752   :  { %v1729_v17 = vpop.f32.mrb[42].mxu1 }
0x1753   :  { %1733 = vst [vmem:[#allocation2] sm:$0xff] %v1727_v16  ;;  %v1730_v18 = vadd.f32 %v2495_v14, %v1729_v17  ;;  %v2784_v20 = vpop.f32.mrb[43].mxu1 }
0x1755   :  { %1734 = vst [vmem:[#allocation2 + $0x8] sm:$0xff] %v1730_v18 }
0x175a   :  { %v1739_v11 = vld [vmem:[#allocation2] sm:$0x3]  ;;  %v1817_v31 = vld [vmem:[#allocation2 + $0x2] sm:$0x3]  ;;  %v1890_v51 = vld [vmem:[#allocation2 + $0x4] sm:$0x3] }
0x175b   :  { %v1792_v21 = vadd.f32 %v1786_v7, %v1739_v11  ;;  %v1963_v20 = vld [vmem:[#allocation2 + $0x6] sm:$0x3] }
0x175d   :  { %3042 = vtanh.f32 %v1792_v21  ;;  %v2503_v24 = vmul.f32 -1.442695, %v1792_v21 }
0x175f   :  { %3044 = vpow2.f32 %v2503_v24 }
0x1767   :  { %v3043_v23 = vpop.eup %3042 }
0x1768   :  { %1802 = vrot.lane.b32.xlu0 %v3043_v23, %s3256_s30 }
0x1769   :  { %v3045_v25 = vpop.eup %3044 }
0x176a   :  { %v1796_v26 = vadd.f32 1.0, %v3045_v25 }
0x176c   :  { %3046 = vrcp.f32 %v1796_v26 }
0x1776   :  { %v3047_v27 = vpop.eup %3046 }
0x1777   :  { %v1800_v30 = vmul.f32 0.0, %v3047_v27 }
0x17da   :  { %v1803_v28 = vpop.permute.xlu0 %1802 }
0x17db   :  { %v1805_v29 = vmul.f32 %v3047_v27, %v1803_v28 }
0x17dd   :  { %1807 = vrot.lane.b32.xlu1 %v1805_v29, %s3264_s6 }
0x184f   :  { %v1808_v32 = vpop.permute.xlu1 %1807 }
0x1850   :  { %v1810_v33 = vadd.f32 %v1808_v32, %v1800_v30 }
0x1852   :  { %3048 = vtanh.f32 %v1810_v33 }
0x185c   :  { %v3049_v35 = vpop.eup %3048 }
0x185d   :  { %1813 = vrot.lane.b32.xlu0 %v3049_v35, %s3256_s30 }
0x18cf   :  { %v1814_v61 = vpop.permute.xlu0 %1813 }
0x18d0   :  { %v1816_v1 = vmul.f32 %v3047_v27, %v1814_v61 }
0x18d2   :  { %v1818_v45 = vpack.c.bf16 %v1816_v1, %v1816_v1 }
0x18d4   :  { %1820 = vrot.lane.b32.xlu1 %v1818_v45, %s3264_s6 }
0x1946   :  { %v1821_v48 = vpop.permute.xlu1 %1820 }
0x1947   :  { %2798 = vmatmul.mubr.msk.bf16.vlgmr.msra.gmra.mrb[44].mxu1 %vm150_vm1, %v1821_v48 }
0x1948   :  { %2810 = vmatpush3.bf16.msra.mxu1 %v3837_v54  ;;  %2813 = vmatprep.mubr.msk.bf16.mxu1 %vm3262_vm0, %v3261_v0 }
0x1949   :  { %2811 = vmatprep.subr.bf16.mxu1 %v3261_v0 }
0x194c   :  { %2812 = vmatpush3.bf16.msra.mxu1 %v3844_v56 }
0x194d   :  { %2825 = vmatprep.subr.bf16.mxu1 %v3261_v0 }
0x1a1a   :  { %v1859_v34 = vpop.f32.mrb[44].mxu1 }
0x1a1b   :  { %v1865_v19 = vadd.f32 %v1859_v34, %v1817_v31  ;;  %v2799_v22 = vpop.f32.mrb[45].mxu1 }
0x1a1c   :  { %v1862_v5 = vpop.f32.mrb[46].mxu1  ;;  %v2036_v22 = vld [vmem:[#allocation2 + $0x8] sm:$0x3] }
0x1a1d   :  { %3050 = vtanh.f32 %v1865_v19  ;;  %v2800_v12 = vpop.f32.mrb[47].mxu1  ;;  %v2505_v60 = vmul.f32 -1.442695, %v1865_v19 }
0x1a1f   :  { %3052 = vpow2.f32 %v2505_v60 }
0x1a27   :  { %v3051_v57 = vpop.eup %3050 }
0x1a28   :  { %1875 = vrot.lane.b32.xlu0 %v3051_v57, %s3256_s30 }
0x1a29   :  { %v3053_v36 = vpop.eup %3052 }
0x1a2a   :  { %v1869_v37 = vadd.f32 1.0, %v3053_v36 }
0x1a2c   :  { %3054 = vrcp.f32 %v1869_v37 }
0x1a36   :  { %v3055_v38 = vpop.eup %3054 }
0x1a37   :  { %v1873_v41 = vmul.f32 %v3055_v38, %v1810_v33 }
0x1a9a   :  { %v1876_v39 = vpop.permute.xlu0 %1875 }
0x1a9b   :  { %v1878_v40 = vmul.f32 %v3055_v38, %v1876_v39 }
0x1a9d   :  { %1880 = vrot.lane.b32.xlu1 %v1878_v40, %s3264_s6 }
0x1b0f   :  { %v1881_v42 = vpop.permute.xlu1 %1880 }
0x1b10   :  { %v1883_v43 = vadd.f32 %v1881_v42, %v1873_v41 }
0x1b12   :  { %3056 = vtanh.f32 %v1883_v43 }
0x1b1c   :  { %v3057_v44 = vpop.eup %3056 }
0x1b1d   :  { %1886 = vrot.lane.b32.xlu0 %v3057_v44, %s3256_s30 }
0x1b8f   :  { %v1887_v46 = vpop.permute.xlu0 %1886 }
0x1b90   :  { %v1889_v47 = vmul.f32 %v3055_v38, %v1887_v46 }
0x1b92   :  { %v1891_v49 = vpack.c.bf16 %v1889_v47, %v1889_v47 }
0x1b94   :  { %1893 = vrot.lane.b32.xlu1 %v1891_v49, %s3264_s6 }
0x1c06   :  { %v1894_v50 = vpop.permute.xlu1 %1893 }
0x1c07   :  { %2806 = vmatmul.mubr.msk.bf16.vlgmr.msra.gmra.mrb[40].mxu0 %vm150_vm1, %v1894_v50 }
0x1c08   :  { %2818 = vmatpush3.bf16.msra.mxu0 %v3837_v54  ;;  %2821 = vmatprep.mubr.msk.bf16.mxu0 %vm3262_vm0, %v3261_v0 }
0x1c09   :  { %2819 = vmatprep.subr.bf16.mxu0 %v3261_v0 }
0x1c0c   :  { %2820 = vmatpush3.bf16.msra.mxu0 %v3844_v56 }
0x1c0d   :  { %2833 = vmatprep.subr.bf16.mxu0 %v3261_v0 }
0x1cda   :  { %v1932_v52 = vpop.f32.mrb[40].mxu0 }
0x1cdb   :  { %v1938_v53 = vadd.f32 %v1932_v52, %v1890_v51  ;;  %v2807_v55 = vpop.f32.mrb[41].mxu0 }
0x1cdc   :  { %v1935_v58 = vpop.f32.mrb[42].mxu0  ;;  %v2109_v55 = vld [vmem:[#allocation2 + $0xa] sm:$0x3] }
0x1cdd   :  { %3058 = vtanh.f32 %v1938_v53  ;;  %v2808_v59 = vpop.f32.mrb[43].mxu0  ;;  %v2507_v63 = vmul.f32 -1.442695, %v1938_v53 }
0x1cdf   :  { %3060 = vpow2.f32 %v2507_v63 }
0x1ce7   :  { %v3059_v62 = vpop.eup %3058 }
0x1ce8   :  { %1948 = vrot.lane.b32.xlu0 %v3059_v62, %s3256_s30 }
0x1ce9   :  { %v3061_v2 = vpop.eup %3060 }
0x1cea   :  { %v1942_v3 = vadd.f32 1.0, %v3061_v2 }
0x1cec   :  { %3062 = vrcp.f32 %v1942_v3 }
0x1cf6   :  { %v3063_v4 = vpop.eup %3062 }
0x1cf7   :  { %v1946_v8 = vmul.f32 %v3063_v4, %v1883_v43 }
0x1d5a   :  { %v1949_v7 = vpop.permute.xlu0 %1948 }
0x1d5b   :  { %v1951_v6 = vmul.f32 %v3063_v4, %v1949_v7 }
0x1d5d   :  { %1953 = vrot.lane.b32.xlu1 %v1951_v6, %s3264_s6 }
0x1dcf   :  { %v1954_v13 = vpop.permute.xlu1 %1953 }
0x1dd0   :  { %v1956_v14 = vadd.f32 %v1954_v13, %v1946_v8 }
0x1dd2   :  { %3064 = vtanh.f32 %v1956_v14 }
0x1ddc   :  { %v3065_v15 = vpop.eup %3064 }
0x1ddd   :  { %1959 = vrot.lane.b32.xlu0 %v3065_v15, %s3256_s30 }
0x1e4f   :  { %v1960_v16 = vpop.permute.xlu0 %1959 }
0x1e50   :  { %v1962_v9 = vmul.f32 %v3063_v4, %v1960_v16 }
0x1e52   :  { %v1964_v17 = vpack.c.bf16 %v1962_v9, %v1962_v9 }
0x1e54   :  { %1966 = vrot.lane.b32.xlu1 %v1964_v17, %s3264_s6 }
0x1ec6   :  { %v1967_v18 = vpop.permute.xlu1 %1966 }
0x1ec7   :  { %2814 = vmatmul.mubr.msk.bf16.vlgmr.msra.gmra.mrb[48].mxu1 %vm150_vm1, %v1967_v18 }
0x1ec8   :  { %2826 = vmatpush3.bf16.msra.mxu1 %v3837_v54  ;;  %2829 = vmatprep.mubr.msk.bf16.mxu1 %vm3262_vm0, %v3261_v0 }
0x1ec9   :  { %2827 = vmatprep.subr.bf16.mxu1 %v3261_v0 }
0x1ecc   :  { %2828 = vmatpush3.bf16.msra.mxu1 %v3844_v56 }
0x1ecd   :  { %2841 = vmatprep.subr.bf16.mxu1 %v3261_v0 }
0x1f9a   :  { %v2005_v11 = vpop.f32.mrb[48].mxu1 }
0x1f9b   :  { %v2011_v21 = vadd.f32 %v2005_v11, %v1963_v20  ;;  %v2815_v23 = vpop.f32.mrb[49].mxu1  ;;  %v2182_v11 = vld [vmem:[#allocation2 + $0xc] sm:$0x3] }
0x1f9c   :  { %v2008_v24 = vpop.f32.mrb[50].mxu1 }
0x1f9d   :  { %3066 = vtanh.f32 %v2011_v21  ;;  %v2816_v25 = vpop.f32.mrb[51].mxu1  ;;  %v2509_v27 = vmul.f32 -1.442695, %v2011_v21 }
0x1f9f   :  { %3068 = vpow2.f32 %v2509_v27 }
0x1fa7   :  { %v3067_v26 = vpop.eup %3066 }
0x1fa8   :  { %2021 = vrot.lane.b32.xlu0 %v3067_v26, %s3256_s30 }
0x1fa9   :  { %v3069_v28 = vpop.eup %3068 }
0x1faa   :  { %v2015_v29 = vadd.f32 1.0, %v3069_v28 }
0x1fac   :  { %3070 = vrcp.f32 %v2015_v29 }
0x1fb6   :  { %v3071_v30 = vpop.eup %3070 }
0x1fb7   :  { %v2019_v35 = vmul.f32 %v3071_v30, %v1956_v14 }
0x201a   :  { %v2022_v32 = vpop.permute.xlu0 %2021 }
0x201b   :  { %v2024_v33 = vmul.f32 %v3071_v30, %v2022_v32 }
0x201d   :  { %2026 = vrot.lane.b32.xlu1 %v2024_v33, %s3264_s6 }
0x208f   :  { %v2027_v61 = vpop.permute.xlu1 %2026 }
0x2090   :  { %v2029_v1 = vadd.f32 %v2027_v61, %v2019_v35 }
0x2092   :  { %3072 = vtanh.f32 %v2029_v1 }
0x209c   :  { %v3073_v45 = vpop.eup %3072 }
0x209d   :  { %2032 = vrot.lane.b32.xlu0 %v3073_v45, %s3256_s30 }
0x210f   :  { %v2033_v48 = vpop.permute.xlu0 %2032 }
0x2110   :  { %v2035_v31 = vmul.f32 %v3071_v30, %v2033_v48  ;;  %v2488_v48 = vld [vmem:[%s3999_s12] ss:$0 sm:$0xff]  ;;  %s3265_s12 = smov 96  }
0x2112   :  { %v2037_v34 = vpack.c.bf16 %v2035_v31, %v2035_v31  ;;  %v1624_v31 = vadd.f32 %v2488_v48, %v3866_v10 }
0x2114   :  { %2039 = vrot.lane.b32.xlu1 %v2037_v34, %s3264_s6 }
0x2186   :  { %v2040_v19 = vpop.permute.xlu1 %2039 }
0x2187   :  { %2822 = vmatmul.mubr.msk.bf16.vlgmr.msra.gmra.mrb[44].mxu0 %vm150_vm1, %v2040_v19 }
0x2188   :  { %2834 = vmatpush3.bf16.msra.mxu0 %v3837_v54  ;;  %2837 = vmatprep.mubr.msk.bf16.mxu0 %vm3262_vm0, %v3261_v0 }
0x2189   :  { %2835 = vmatprep.subr.bf16.mxu0 %v3261_v0 }
0x218c   :  { %2836 = vmatpush3.bf16.msra.mxu0 %v3844_v56 }
0x225a   :  { %v2078_v5 = vpop.f32.mrb[44].mxu0 }
0x225b   :  { %v2084_v12 = vadd.f32 %v2078_v5, %v2036_v22  ;;  %v2823_v57 = vpop.f32.mrb[45].mxu0 }
0x225c   :  { %v2081_v60 = vpop.f32.mrb[46].mxu0 }
0x225d   :  { %3074 = vtanh.f32 %v2084_v12  ;;  %v2824_v36 = vpop.f32.mrb[47].mxu0  ;;  %v2511_v38 = vmul.f32 -1.442695, %v2084_v12  ;;  %v2494_v12 = vmul.f32 -1.442695, %v1624_v31 }
0x225f   :  { %3076 = vpow2.f32 %v2511_v38 }
0x2267   :  { %v3075_v37 = vpop.eup %3074 }
0x2268   :  { %2094 = vrot.lane.b32.xlu0 %v3075_v37, %s3256_s30 }
0x2269   :  { %v3077_v39 = vpop.eup %3076 }
0x226a   :  { %v2088_v40 = vadd.f32 1.0, %v3077_v39 }
0x226c   :  { %3078 = vrcp.f32 %v2088_v40  ;;  %v2255_v40 = vld [vmem:[#allocation2 + $0xe] sm:$0x3] }
0x2276   :  { %v3079_v41 = vpop.eup %3078 }
0x2277   :  { %v2092_v44 = vmul.f32 %v3079_v41, %v2029_v1 }
0x22da   :  { %v2095_v42 = vpop.permute.xlu0 %2094 }
0x22db   :  { %v2097_v43 = vmul.f32 %v3079_v41, %v2095_v42 }
0x22dd   :  { %2099 = vrot.lane.b32.xlu1 %v2097_v43, %s3264_s6 }
0x234f   :  { %v2100_v46 = vpop.permute.xlu1 %2099 }
0x2350   :  { %v2102_v47 = vadd.f32 %v2100_v46, %v2092_v44 }
0x2352   :  { %3080 = vtanh.f32 %v2102_v47 }
0x235c   :  { %v3081_v49 = vpop.eup %3080 }
0x235d   :  { %2105 = vrot.lane.b32.xlu0 %v3081_v49, %s3256_s30 }
0x23cf   :  { %v2106_v50 = vpop.permute.xlu0 %2105 }
0x23d0   :  { %v2108_v51 = vmul.f32 %v3079_v41, %v2106_v50 }
0x23d2   :  { %v2110_v52 = vpack.c.bf16 %v2108_v51, %v2108_v51 }
0x23d4   :  { %2112 = vrot.lane.b32.xlu1 %v2110_v52, %s3264_s6 }
0x2446   :  { %v2113_v53 = vpop.permute.xlu1 %2112 }
0x2447   :  { %2830 = vmatmul.mubr.msk.bf16.vlgmr.msra.gmra.mrb[52].mxu1 %vm150_vm1, %v2113_v53 }
0x2448   :  { %2842 = vmatpush3.bf16.msra.mxu1 %v3837_v54  ;;  %2845 = vmatprep.mubr.msk.bf16.mxu1 %vm3262_vm0, %v3261_v0 }
0x2449   :  { %2843 = vmatprep.subr.bf16.mxu1 %v3261_v0 }
0x244c   :  { %2844 = vmatpush3.bf16.msra.mxu1 %v3844_v56 }
0x251a   :  { %v2151_v58 = vpop.f32.mrb[52].mxu1 }
0x251b   :  { %v2157_v59 = vadd.f32 %v2151_v58, %v2109_v55  ;;  %v2831_v62 = vpop.f32.mrb[53].mxu1 }
0x251c   :  { %v2154_v63 = vpop.f32.mrb[54].mxu1 }
0x251d   :  { %3082 = vtanh.f32 %v2157_v59  ;;  %v2832_v2 = vpop.f32.mrb[55].mxu1  ;;  %v2513_v4 = vmul.f32 -1.442695, %v2157_v59  ;;  %v2337_v63 = vld [vmem:[%s4000_s13] sm:$0xff] }
0x251e   :  { %v2338_v2 = vld [vmem:[%s4000_s13 + $0x8] sm:$0xff] }
0x251f   :  { %3084 = vpow2.f32 %v2513_v4  ;;  %v3266_v4 = vmov 0.0|0.0  }
0x2520   :  { %2868 = vmatprep.subr.bf16.mxu0 %v3266_v4 }
0x2527   :  { %v3083_v3 = vpop.eup %3082 }
0x2528   :  { %2167 = vrot.lane.b32.xlu0 %v3083_v3, %s3256_s30  ;;  %v2339_v3 = vld [vmem:[%s4000_s13 + $0x10] sm:$0xff] }
0x2529   :  { %v3085_v54 = vpop.eup %3084 }
0x252a   :  { %v2161_v7 = vadd.f32 1.0, %v3085_v54  ;;  %v2869_v54 = vpack.c.bf16 %v2338_v2, %v2337_v63 }
0x252c   :  { %3086 = vrcp.f32 %v2161_v7  ;;  %v2340_v7 = vld [vmem:[%s4000_s13 + $0x18] sm:$0xff] }
0x2536   :  { %v3087_v6 = vpop.eup %3086 }
0x2537   :  { %v2165_v56 = vmul.f32 %v3087_v6, %v2102_v47 }
0x259a   :  { %v2168_v8 = vpop.permute.xlu0 %2167 }
0x259b   :  { %v2170_v13 = vmul.f32 %v3087_v6, %v2168_v8  ;;  %v2341_v8 = vld [vmem:[%s4000_s13 + $0x20] sm:$0xff] }
0x259d   :  { %2172 = vrot.lane.b32.xlu1 %v2170_v13, %s3264_s6  ;;  %v2342_v13 = vld [vmem:[%s4000_s13 + $0x28] sm:$0xff] }
0x260f   :  { %v2173_v14 = vpop.permute.xlu1 %2172 }
0x2610   :  { %v2175_v15 = vadd.f32 %v2173_v14, %v2165_v56  ;;  %v2875_v56 = vpack.c.bf16 %v2342_v13, %v2341_v8  ;;  %v2343_v14 = vld [vmem:[%s4000_s13 + $0x30] sm:$0xff] }
0x2612   :  { %3088 = vtanh.f32 %v2175_v15 }
0x261c   :  { %v3089_v16 = vpop.eup %3088 }
0x261d   :  { %2178 = vrot.lane.b32.xlu0 %v3089_v16, %s3256_s30 }
0x268f   :  { %v2179_v9 = vpop.permute.xlu0 %2178 }
0x2690   :  { %v2181_v17 = vmul.f32 %v3087_v6, %v2179_v9  ;;  %v2872_v6 = vpack.c.bf16 %v2340_v7, %v2339_v3 }
0x2692   :  { %v2183_v18 = vpack.c.bf16 %v2181_v17, %v2181_v17 }
0x2694   :  { %2185 = vrot.lane.b32.xlu1 %v2183_v18, %s3264_s6 }
0x2706   :  { %v2186_v20 = vpop.permute.xlu1 %2185 }
0x2707   :  { %2838 = vmatmul.mubr.msk.bf16.vlgmr.msra.gmra.mrb[48].mxu0 %vm150_vm1, %v2186_v20 }
0x2708   :  { %2865 = vmatprep.mubr.msk.f32.mxu0 %vm3262_vm0, %v3261_v0  ;;  %2870 = vmatpush3.bf16.msra.mxu0 %v2869_v54 }
0x2709   :  { %2871 = vmatprep.subr.bf16.mxu0 %v3266_v4 }
0x270c   :  { %2873 = vmatpush3.bf16.msra.mxu0 %v2872_v6 }
0x270d   :  { %2874 = vmatprep.subr.bf16.mxu0 %v3266_v4 }
0x2710   :  { %2876 = vmatpush3.bf16.msra.mxu0 %v2875_v56 }
0x2711   :  { %2877 = vmatprep.subr.bf16.mxu0 %v3266_v4 }
0x27da   :  { %v2224_v21 = vpop.f32.mrb[48].mxu0 }
0x27db   :  { %v2230_v23 = vadd.f32 %v2224_v21, %v2182_v11  ;;  %v2839_v24 = vpop.f32.mrb[49].mxu0 }
0x27dc   :  { %v2227_v25 = vpop.f32.mrb[50].mxu0 }
0x27dd   :  { %3090 = vtanh.f32 %v2230_v23  ;;  %v2840_v26 = vpop.f32.mrb[51].mxu0  ;;  %v2515_v28 = vmul.f32 -1.442695, %v2230_v23  ;;  %v2518_v25 = vld [vmem:[%s4001_s14] ss:$0 sm:$0xff] }
0x27df   :  { %3092 = vpow2.f32 %v2515_v28 }
0x27e7   :  { %v3091_v27 = vpop.eup %3090 }
0x27e8   :  { %2240 = vrot.lane.b32.xlu0 %v3091_v27, %s3256_s30 }
0x27e9   :  { %v3093_v29 = vpop.eup %3092 }
0x27ea   :  { %v2234_v30 = vadd.f32 1.0, %v3093_v29 }
0x27ec   :  { %3094 = vrcp.f32 %v2234_v30 }
0x27f6   :  { %v3095_v32 = vpop.eup %3094 }
0x27f7   :  { %v2238_v0 = vmul.f32 %v3095_v32, %v2175_v15  ;;  %v2344_v15 = vld [vmem:[%s4000_s13 + $0x38] sm:$0xff] }
0x27f8   :  { %v2878_v17 = vpack.c.bf16 %v2344_v15, %v2343_v14 }
0x27fa   :  { %2879 = vmatpush3.bf16.msra.mxu0 %v2878_v17 }
0x285a   :  { %v2241_v33 = vpop.permute.xlu0 %2240 }
0x285b   :  { %v2243_v35 = vmul.f32 %v3095_v32, %v2241_v33 }
0x285d   :  { %2245 = vrot.lane.b32.xlu1 %v2243_v35, %s3264_s6 }
0x28cf   :  { %v2246_v61 = vpop.permute.xlu1 %2245 }
0x28d0   :  { %v2248_v1 = vadd.f32 %v2246_v61, %v2238_v0 }
0x28d2   :  { %3096 = vtanh.f32 %v2248_v1 }
0x28d3   :  { %3098 = vtanh.f32 %v1624_v31 }
0x28d4   :  { %3100 = vpow2.f32 %v2494_v12 }
0x28dc   :  { %v3097_v45 = vpop.eup %3096 }
0x28dd   :  { %2251 = vrot.lane.b32.xlu0 %v3097_v45, %s3256_s30  ;;  %v3099_v5 = vpop.eup %3098 }
0x28de   :  { %v3101_v57 = vpop.eup %3100 }
0x28df   :  { %v1632_v60 = vadd.f32 1.0, %v3101_v57 }
0x28e1   :  { %3102 = vrcp.f32 %v1632_v60 }
0x28eb   :  { %v3103_v37 = vpop.eup %3102 }
0x294f   :  { %v2252_v34 = vpop.permute.xlu0 %2251 }
0x2950   :  { %v2254_v19 = vmul.f32 %v3095_v32, %v2252_v34 }
0x2952   :  { %v2256_v22 = vpack.c.bf16 %v2254_v19, %v2254_v19 }
0x2954   :  { %2258 = vrot.lane.b32.xlu1 %v2256_v22, %s3264_s6 }
0x2958   :  { %1637 = vrot.lane.b32.xlu1 %v3099_v5, %s3256_s30 }
0x29c6   :  { %v2259_v36 = vpop.permute.xlu1 %2258 }
0x29c7   :  { %2846 = vmatmul.mubr.msk.bf16.vlgmr.msra.gmra.mrb[56].mxu1 %vm150_vm1, %v2259_v36 }
0x29ca   :  { %v1638_v38 = vpop.permute.xlu1 %1637 }
0x29cb   :  { %v1640_v10 = vmul.f32 %v3103_v37, %v1638_v38 }
0x29cd   :  { %3104 = vtanh.f32 %v1640_v10 }
0x29d7   :  { %v3105_v39 = vpop.eup %3104 }
0x29d8   :  { %1643 = vrot.lane.b32.xlu1 %v3105_v39, %s3265_s12 }
0x2a4a   :  { %v1644_v9 = vpop.permute.xlu1 %1643 }
0x2a4b   :  { %v1646_v18 = vmul.f32 %v3103_v37, %v1644_v9 }
0x2a9a   :  { %v2297_v41 = vpop.f32.mrb[56].mxu1 }
0x2a9b   :  { %v2303_v42 = vadd.f32 %v2297_v41, %v2255_v40  ;;  %v2847_v43 = vpop.f32.mrb[57].mxu1 }
0x2a9c   :  { %v2300_v44 = vpop.f32.mrb[58].mxu1 }
0x2a9d   :  { %3106 = vtanh.f32 %v2303_v42  ;;  %v2848_v46 = vpop.f32.mrb[59].mxu1  ;;  %v2517_v49 = vmul.f32 -1.442695, %v2303_v42 }
0x2a9f   :  { %3108 = vpow2.f32 %v2517_v49 }
0x2aa7   :  { %v3107_v47 = vpop.eup %3106 }
0x2aa8   :  { %2313 = vrot.lane.b32.xlu0 %v3107_v47, %s3256_s30 }
0x2aa9   :  { %v3109_v50 = vpop.eup %3108 }
0x2aaa   :  { %v2307_v51 = vadd.f32 1.0, %v3109_v50 }
0x2aac   :  { %3110 = vrcp.f32 %v2307_v51 }
0x2ab6   :  { %v3111_v52 = vpop.eup %3110 }
0x2ab7   :  { %v2311_v58 = vmul.f32 %v3111_v52, %v2248_v1 }
0x2b1a   :  { %v2314_v53 = vpop.permute.xlu0 %2313 }
0x2b1b   :  { %v2316_v55 = vmul.f32 %v3111_v52, %v2314_v53 }
0x2b1d   :  { %2318 = vrot.lane.b32.xlu0 %v2316_v55, %s3264_s6 }
0x2b8f   :  { %v2319_v59 = vpop.permute.xlu0 %2318 }
0x2b90   :  { %v2321_v62 = vadd.f32 %v2319_v59, %v2311_v58 }
0x2b92   :  { %3112 = vtanh.f32 %v2321_v62 }
0x2b9c   :  { %v3113_v16 = vpop.eup %3112 }
0x2b9d   :  { %2324 = vrot.lane.b32.xlu0 %v3113_v16, %s3256_s30 }
0x2ba1   :  { %2333 = vrot.lane.b32.xlu0 %v1646_v18, %s3256_s30  ;;  %s3224_s30 = scalar_lea.vmem %s2434_s24, 32 }
0x2ba2   :  { %p3225_p12 = scmp.ne.s32.totalorder %s2434_s24, %s3224_s30  ;;  %p3230_p0 = scmp.lt.s32.totalorder %s3224_s30, %s3224_s30 }
0x2ba4   :  { %p3231_p1 = por %p3230_p0, %p3229_p13 }
0x2ba6   :  { %p3232_p2 = pnand %p3231_p1, %p3225_p12 }
0x2c0f   :  { %v2325_v20 = vpop.permute.xlu0 %2324 }
0x2c10   :  { %v2327_v11 = vmul.f32 %v3111_v52, %v2325_v20 }
0x2c12   :  { %2329 = vrot.lane.b32.xlu1 %v2327_v11, %s3264_s6 }
0x2c13   :  { %v2334_v21 = vpop.permute.xlu0 %2333 }
0x2c84   :  { %v2330_v23 = vpop.permute.xlu1 %2329 }
0x2c85   :  { %v2336_v24 = vsel %vm150_vm1, %v2330_v23, %v2334_v21 }
0x2c86   :  { %2866 = vmatmul.mubr.msk.f32.vlgmr.msra.gmra.mrb[52].mxu0 %vm1585_vm4, %v2336_v24 }
0x2d59   :  { %v2421_v26 = vpop.f32.mrb[52].mxu0 }
0x2d5a   :  { %v2422_v27 = vadd.f32 %v2518_v25, %v2421_v26  ;;  %v2867_v28 = vpop.f32.mrb[53].mxu0 }
0x2d5c   :  { %2426 = vst.msk [vmem:[#allocation14] sm:$0x3] %vm2425_vm5, %v2422_v27 }
0x2d5d   :  { %3235 = shalt.err (!%p3232_p2)
}
0x2d5e   :  { %s3236_s4 = scalar_lea.hbm %s4002_s15, 32 }
0x2d5f   :  { %p3237_p3 = scmp.ne.s32.totalorder %s4002_s15, %s3236_s4  ;;  %p3240_p4 = scmp.lt.u32.totalorder %s3236_s4, %s4002_s15 }
0x2d61   :  { %p3242_p5 = pnand %p3240_p4, %p3237_p3 }
0x2d63   :  { %3245 = shalt.err (!%p3242_p5)
}
0x2d64   :  { %2436 = dma.vmem_to_hbm [thread:$0]  %s2434_s24, 32, %s4002_s15, [#allocation7]  }
0x2d65   :  { %3252 = dma.done.wait [#allocation7], 32  }
0x2d66   :  { %3253 = vsyncadd [#allocation7], 4294967264 }
0x2d67   :  { %2440 = vsyncpa [#allocation6], 1 }
0x2d68   :  { %2441 = vsyncpa [#allocation9], 1 }
0x2d69   :  { %2442 = vsyncpa [#allocation12], 1 }
0x2d6a   :  { %2443 = vsyncpa [#allocation7], 1 }

</bundles_post_ra>
